<compile_context>
chip_gen: v7x
topology: tpu7x:2x2x1
jax: 0.10.0
libtpu: 0.0.40
codegen_flags: <defaults>
</compile_context>

<pallas_src>
import jax
import jax.numpy as jnp
from jax.experimental import pallas as pl
from jax.experimental.pallas import tpu as pltpu


LANE = 128          # lane width: M tiles are multiples of this
K_ALIGN = 16        # bf16 sublane packing: contraction dim padded to this
TM_MAX = 512        # keeps the K=1152 layers inside v5e's 16 MiB scoped VMEM

LAYERS = [32, 64, 128]
N_IN = 3
N_OUT = 5
# (kernel, stride, pad, output_padding) for the 8 ConvTranspose2d layers.
UP_CFG = [(3, 1, 1, 0), (3, 2, 1, 1)] * len(LAYERS) + [(3, 2, 1, 1), (7, 2, 3, 1)]


def _ceil_to(v, m):
    return -(-v // m) * m


# ----------------------------------------------------------------------------
# Pallas kernels:  out[C, tm] = bf16( max(W @ P + bias, floor) (+ residual) )
#   W    [C, K]  bf16, BN scale pre-folded          (resident across the grid)
#   P    [K, tm] bf16 patch tile                    (pipelined over the grid)
#   bias/floor [C, 1] f32; floor = 0 (ReLU row) or -inf (linear row)
#   residual   [C, tm] bf16 (added AFTER the ReLU, per the Block semantics)
# ----------------------------------------------------------------------------
def _mm_kernel(w_ref, p_ref, b_ref, f_ref, o_ref):
    acc = jnp.dot(w_ref[...], p_ref[...], preferred_element_type=jnp.float32)
    acc = jnp.maximum(acc + b_ref[...], f_ref[...])
    o_ref[...] = acc.astype(o_ref.dtype)


def _mm_res_kernel(w_ref, p_ref, b_ref, f_ref, r_ref, o_ref):
    acc = jnp.dot(w_ref[...], p_ref[...], preferred_element_type=jnp.float32)
    acc = jnp.maximum(acc + b_ref[...], f_ref[...])
    acc = acc + r_ref[...].astype(jnp.float32)
    o_ref[...] = acc.astype(o_ref.dtype)


def _pallas_matmul(wmat, patches, bias, floor, residual=None):
    """wmat [C,K] bf16, patches [K,M] bf16, bias/floor [C,1] f32,
    residual [C,M] bf16 or None.  Returns [C, M] bf16."""
    C, K = wmat.shape
    Kp, M = patches.shape
    assert K == Kp
    mp = _ceil_to(M, LANE)
    # >= 2 grid steps whenever possible so dimension_semantics=("parallel",)
    # can shard across v7x's two TensorCores (no effect on 1-TC v5e/v6e).
    tm = mp if mp < 2 * LANE else min(TM_MAX, _ceil_to(mp // 2, LANE))
    Mp = _ceil_to(mp, tm)
    if Mp != M:
        patches = jnp.pad(patches, ((0, 0), (0, Mp - M)))
        if residual is not None:
            residual = jnp.pad(residual, ((0, 0), (0, Mp - M)))

    args = [wmat, patches, bias, floor]
    in_specs = [
        pl.BlockSpec((C, K), lambda m: (0, 0)),      # weight, VMEM-resident
        pl.BlockSpec((K, tm), lambda m: (0, m)),     # patch tile, pipelined
        pl.BlockSpec((C, 1), lambda m: (0, 0)),      # bias, resident
        pl.BlockSpec((C, 1), lambda m: (0, 0)),      # ReLU floor, resident
    ]
    kernel = _mm_kernel
    if residual is not None:
        args.append(residual)
        in_specs.append(pl.BlockSpec((C, tm), lambda m: (0, m)))
        kernel = _mm_res_kernel

    bytes_accessed = (2 * C * K + 2 * K * Mp + 8 * C + 2 * C * Mp
                      + (2 * C * Mp if residual is not None else 0))
    out = pl.pallas_call(
        kernel,
        grid=(Mp // tm,),
        in_specs=in_specs,
        out_specs=pl.BlockSpec((C, tm), lambda m: (0, m)),
        out_shape=jax.ShapeDtypeStruct((C, Mp), jnp.bfloat16),
        compiler_params=pltpu.CompilerParams(dimension_semantics=("parallel",)),
        cost_estimate=pl.CostEstimate(flops=2 * C * K * Mp, transcendentals=0,
                                      bytes_accessed=bytes_accessed),
    )(*args)
    return out[:, :M]


# ----------------------------------------------------------------------------
# Channels-first conv wrapper (im2col in XLA; compute + epilogue in Pallas).
# ----------------------------------------------------------------------------
def conv2d_cf(x, p, *, k, stride, pad, residual=None):
    """x: [Cin, N, H, W] bf16.  p: {"w": [Cout, K16] bf16 (BN scale folded),
    "b"/"floor": [Cout, 1] f32}.  Returns [Cout, N, Ho, Wo] bf16."""
    Cin, N, H, W = x.shape
    Cout, K16 = p["w"].shape
    Ho = (H + 2 * pad - k) // stride + 1
    Wo = (W + 2 * pad - k) // stride + 1
    # TODO(synk): form the patch matrix inside the kernel (tap-grid axis /
    # halo DMA) instead of materializing [K, M] via XLA (perf review item 2).
    xp = jnp.pad(x, ((0, 0), (0, 0), (pad, pad), (pad, pad))) if pad else x
    cols = []
    for i in range(k):
        for j in range(k):
            cols.append(xp[:, :, i:i + stride * Ho:stride, j:j + stride * Wo:stride])
    M = N * Ho * Wo
    patches = jnp.stack(cols, axis=1).reshape(Cin * k * k, M)   # K order (c,ky,kx)
    if K16 != Cin * k * k:                      # bf16 sublane alignment of K
        patches = jnp.pad(patches, ((0, K16 - Cin * k * k), (0, 0)))
    res = residual.reshape(Cout, M) if residual is not None else None
    out = _pallas_matmul(p["w"], patches, p["b"], p["floor"], res)
    return out.reshape(Cout, N, Ho, Wo)


# ----------------------------------------------------------------------------
# ConvTranspose2d via sub-pixel (phase) decomposition (stride 2) or a plain
# flipped-kernel conv (stride 1).  BN + ReLU are folded into the same call.
# ----------------------------------------------------------------------------
def _phase_meta(k, stride, pad, out_pad):
    s = stride
    assert out_pad == s + 2 * pad - k, "phase decomposition assumes Ho == s*H"
    p_lo = k - 1 - pad
    taps = []
    for r in range(s):
        js = [j for j in range(k) if (j - (p_lo - r)) % s == 0]
        taps.append([(j, (r + j - p_lo) // s) for j in js])
    all_d = [d for lst in taps for _, d in lst]
    return taps, min(all_d), max(all_d)


def deconv_forward(x, p, k, stride, pad, out_pad):
    """ConvTranspose2d (+ folded BN + ReLU).  x: [Cin, N, H, W] bf16."""
    if stride == 1:
        assert out_pad == 0
        return conv2d_cf(x, p, k=k, stride=1, pad=k - 1 - pad)
    _, d_min, d_max = _phase_meta(k, stride, pad, out_pad)
    kd = d_max - d_min + 1
    xp = jnp.pad(x, ((0, 0), (0, 0), (-d_min, d_max), (-d_min, d_max)))
    y = conv2d_cf(xp, p, k=kd, stride=1, pad=0)      # [s*s*Cout, N, H, W]
    s = stride
    Cout = y.shape[0] // (s * s)
    _, N, H, W = x.shape
    # TODO(synk): do this interleave in-kernel (strided stores) or fold it into
    # the next layer's tap offsets instead of a tiny XLA transpose (item 5).
    y = y.reshape(s, s, Cout, N, H, W)
    return jnp.transpose(y, (2, 3, 4, 0, 5, 1)).reshape(Cout, N, H * s, W * s)


# ----------------------------------------------------------------------------
# Offline parameter folding (run once, outside the jitted forward)
# ----------------------------------------------------------------------------
def _fold_bn(bn, conv_bias=None, eps=1e-5):
    s = bn["gamma"] / jnp.sqrt(bn["var"] + eps)
    b = bn["beta"] - bn["mean"] * s
    if conv_bias is not None:
        b = b + conv_bias * s
    return s, b


def _pack_plan(w4d, bias, relu_rows):
    """w4d: [Cout, Cin, kh, kw] f32 with the BN scale already folded in."""
    Cout, Cin, kh, kw = w4d.shape
    K = Cin * kh * kw
    K16 = _ceil_to(K, K_ALIGN)
    wmat = w4d.reshape(Cout, K)
    if K16 != K:
        wmat = jnp.pad(wmat, ((0, 0), (0, K16 - K)))
    floor = jnp.where(relu_rows, jnp.float32(0.0), jnp.float32(-jnp.inf))
    return {"w": wmat.astype(jnp.bfloat16),
            "b": bias.reshape(Cout, 1).astype(jnp.float32),
            "floor": floor.reshape(Cout, 1).astype(jnp.float32)}


def _flip_swap(w_iokk):
    """ConvTranspose2d weight [Cin, Cout, k, k] -> forward-conv [Cout, Cin, k, k]."""
    return jnp.transpose(w_iokk[:, :, ::-1, ::-1], (1, 0, 2, 3))


def prepare_params(params):
    """PyTorch-layout params -> MXU-ready pre-folded plan (arrays only)."""
    relu = lambda c: jnp.ones((c,), bool)
    plan = {}

    s0, b0 = _fold_bn(params["bn0"])
    plan["conv0"] = _pack_plan(params["conv0"] * s0[:, None, None, None], b0,
                               relu(s0.shape[0]))

    plan["blocks"] = []
    for bp in params["blocks"]:
        l, cin = bp["c1"].shape[0], bp["c1"].shape[1]
        s1, b1 = _fold_bn(bp["bn1"])
        s2, b2 = _fold_bn(bp["bn2"])
        sd, bd = _fold_bn(bp["ds_bn"], conv_bias=bp["ds_b"])
        # Pack the 1x1 stride-2 downsample conv into conv1's call: its weight
        # goes on the centre tap of the 3x3 grid, its rows get floor = -inf.
        w1 = bp["c1"] * s1[:, None, None, None]
        wds = jnp.zeros((l, cin, 3, 3), jnp.float32)
        wds = wds.at[:, :, 1, 1].set(bp["ds_w"][:, :, 0, 0] * sd[:, None])
        plan["blocks"].append({
            "c1ds": _pack_plan(
                jnp.concatenate([w1, wds], axis=0),
                jnp.concatenate([b1, bd]),
                jnp.concatenate([relu(l), jnp.zeros((l,), bool)])),
            "c2": _pack_plan(bp["c2"] * s2[:, None, None, None], b2, relu(l)),
        })

    # conv_out (1x1, bias=False) composed offline into the first (stride-1)
    # up-path deconv:  W'[o,c,ky,kx] = sum_m Wdeconv[o,m,ky,kx] * Wout[m,c].
    ku, su_, pu, opu = UP_CFG[0]
    assert su_ == 1 and opu == 0
    g, bu = _fold_bn(params["up"][0]["bn"])
    wd = _flip_swap(params["up"][0]["w"])                       # [5, 5, 3, 3]
    wc = jnp.einsum("omyx,mc->ocyx", wd, params["conv_out"][:, :, 0, 0])
    plan["up0"] = _pack_plan(wc * g[:, None, None, None], bu, relu(N_OUT))

    plan["up_rest"] = []
    for (k, s, p, op), up in zip(UP_CFG[1:], params["up"][1:]):
        g, bu = _fold_bn(up["bn"])
        wf = _flip_swap(up["w"])                                # [Cout, Cin, k, k]
        if s == 1:
            plan["up_rest"].append(
                _pack_plan(wf * g[:, None, None, None], bu, relu(N_OUT)))
            continue
        taps, d_min, d_max = _phase_meta(k, s, p, op)
        kd = d_max - d_min + 1
        cout, cin = wf.shape[0], wf.shape[1]
        wall = jnp.zeros((s, s, cout, cin, kd, kd), jnp.float32)
        for ry in range(s):
            for rx in range(s):
                for (jy, dy) in taps[ry]:
                    for (jx, dx) in taps[rx]:
                        wall = wall.at[ry, rx, :, :, dy - d_min, dx - d_min].set(
                            wf[:, :, jy, jx])
        wall = wall * g[None, None, :, None, None, None]
        plan["up_rest"].append(
            _pack_plan(wall.reshape(s * s * cout, cin, kd, kd),
                       jnp.tile(bu, s * s), relu(s * s * cout)))
    return plan


# ----------------------------------------------------------------------------
# Model forward (Pallas path)
# ----------------------------------------------------------------------------
@jax.jit
def fcn_forward(plan, x_nchw):
    N, _, H, W = x_nchw.shape
    x = jnp.transpose(x_nchw, (1, 0, 2, 3)).astype(jnp.bfloat16)  # [C, N, H, W]

    # --- down path ---
    z = conv2d_cf(x, plan["conv0"], k=7, stride=2, pad=3)
    # Dropout(p=0.2): inference-mode identity.
    for bp in plan["blocks"]:
        l = bp["c2"]["w"].shape[0]
        y = conv2d_cf(z, bp["c1ds"], k=3, stride=2, pad=1)        # [2l, N, Ho, Wo]
        z = conv2d_cf(y[:l], bp["c2"], k=3, stride=1, pad=1, residual=y[l:])

    # --- up path (conv_out is pre-composed into the first layer's weights) ---
    ku, _, pu, _ = UP_CFG[0]
    z = conv2d_cf(z, plan["up0"], k=ku, stride=1, pad=ku - 1 - pu)
    for cfg, p in zip(UP_CFG[1:], plan["up_rest"]):
        z = deconv_forward(z, p, *cfg)

    z = jnp.transpose(z, (1, 0, 2, 3))                            # -> NCHW
    return z[:N, :N_OUT, :H, :W].astype(jnp.float32)


# ----------------------------------------------------------------------------
# Pure-f32 JAX reference of the PyTorch module (inference mode)
# ----------------------------------------------------------------------------
def _bn_ref(x, bn, eps=1e-5):
    s = bn["gamma"] / jnp.sqrt(bn["var"] + eps)
    b = bn["beta"] - bn["mean"] * s
    return x * s[None, :, None, None] + b[None, :, None, None]


def _conv_ref(x, w, stride, pad, bias=None):
    y = jax.lax.conv_general_dilated(
        x, w, (stride, stride), [(pad, pad), (pad, pad)],
        dimension_numbers=("NCHW", "OIHW", "NCHW"))
    if bias is not None:
        y = y + bias[None, :, None, None]
    return y


def _deconv_ref(x, w_iokk, k, stride, pad, out_pad):
    lo = k - 1 - pad
    return jax.lax.conv_general_dilated(
        x, _flip_swap(w_iokk), (1, 1), [(lo, lo + out_pad), (lo, lo + out_pad)],
        lhs_dilation=(stride, stride),
        dimension_numbers=("NCHW", "OIHW", "NCHW"))


@jax.jit
def fcn_forward_ref(params, x):
    N, _, H, W = x.shape
    z = jax.nn.relu(_bn_ref(_conv_ref(x, params["conv0"], 2, 3), params["bn0"]))
    for bp in params["blocks"]:
        idn = _bn_ref(_conv_ref(z, bp["ds_w"], 2, 0, bias=bp["ds_b"]), bp["ds_bn"])
        h = jax.nn.relu(_bn_ref(_conv_ref(z, bp["c1"], 2, 1), bp["bn1"]))
        h = jax.nn.relu(_bn_ref(_conv_ref(h, bp["c2"], 1, 1), bp["bn2"]))
        z = h + idn
    z = _conv_ref(z, params["conv_out"], 1, 0)
    for (k, s, p, op), up in zip(UP_CFG, params["up"]):
        z = jax.nn.relu(_bn_ref(_deconv_ref(z, up["w"], k, s, p, op), up["bn"]))
    return z[:N, :N_OUT, :H, :W]


# ----------------------------------------------------------------------------
# Deterministic parameter initialization (shapes match the PyTorch module)
# ----------------------------------------------------------------------------
def init_params(key):
    key_box = [key]

    def nxt():
        key_box[0], sub = jax.random.split(key_box[0])
        return sub

    def conv_w(shape):
        return 0.1 * jax.random.normal(nxt(), shape, jnp.float32)

    def bn(c):
        return {
            "gamma": 1.0 + 0.1 * jax.random.normal(nxt(), (c,), jnp.float32),
            "beta": 0.1 * jax.random.normal(nxt(), (c,), jnp.float32),
            "mean": 0.1 * jax.random.normal(nxt(), (c,), jnp.float32),
            "var": 1.0 + 0.1 * jnp.abs(jax.random.normal(nxt(), (c,), jnp.float32)),
        }

    params = {"conv0": conv_w((32, N_IN, 7, 7)), "bn0": bn(32),
              "blocks": [], "conv_out": None, "up": []}
    c = 32
    for l in LAYERS:
        params["blocks"].append({
            "c1": conv_w((l, c, 3, 3)), "bn1": bn(l),
            "c2": conv_w((l, l, 3, 3)), "bn2": bn(l),
            "ds_w": conv_w((l, c, 1, 1)),
            "ds_b": 0.1 * jax.random.normal(nxt(), (l,), jnp.float32),
            "ds_bn": bn(l),
        })
        c = l
    params["conv_out"] = conv_w((N_OUT, c, 1, 1))
    for (k, _, _, _) in UP_CFG:
        # ConvTranspose2d weight layout: [Cin, Cout, kh, kw]
        params["up"].append({"w": conv_w((N_OUT, N_OUT, k, k)), "bn": bn(N_OUT)})
    return params


if __name__ == "__main__":
    key = jax.random.PRNGKey(0)
    k_in, k_par = jax.random.split(key)
    x = jax.random.normal(k_in, (2, N_IN, 16, 16), jnp.float32)
    params = init_params(k_par)
    plan = prepare_params(params)                 # offline weight folding

    out = jax.block_until_ready(fcn_forward(plan, x))
    assert out.shape == (2, N_OUT, 16, 16), out.shape
    assert out.dtype == jnp.float32
    assert bool(jnp.all(jnp.isfinite(out)))

    # Tolerance check of the bf16 Pallas path against a pure-f32 JAX reference.
    ref = jax.block_until_ready(fcn_forward_ref(params, x))
    err = float(jnp.max(jnp.abs(out - ref)))
    scale = float(jnp.max(jnp.abs(ref)))
    assert err <= 0.1 * max(1.0, scale), ("mismatch vs f32 reference", err, scale)

    print("KERNEL_OK")
</pallas_src>

<mosaic_0001>
module attributes {stable_mosaic.version = 11 : i64} {
  func.func @_mm_kernel(%arg0: i32, %arg1: memref<32x160xbf16, #tpu.memory_space<vmem>>, %arg2: memref<160x128xbf16, #tpu.memory_space<vmem>>, %arg3: memref<32x1xf32, #tpu.memory_space<vmem>>, %arg4: memref<32x1xf32, #tpu.memory_space<vmem>>, %arg5: memref<32x128xbf16, #tpu.memory_space<vmem>>) attributes {dimension_semantics = [#tpu.dimension_semantics<parallel>], iteration_bounds = array<i64: 1>, scalar_prefetch = 0 : i64, scratch_operands = 0 : i64, tpu.core_type = #tpu.core_type<tc>, window_params = [{pipeline_mode = #tpu.pipeline_mode<synchronous>, transform_indices = @transform_0, window_bounds = array<i64: 32, 160>}, {transform_indices = @transform_1, window_bounds = array<i64: 160, 128>}, {pipeline_mode = #tpu.pipeline_mode<synchronous>, transform_indices = @transform_2, window_bounds = array<i64: 32, 1>}, {pipeline_mode = #tpu.pipeline_mode<synchronous>, transform_indices = @transform_3, window_bounds = array<i64: 32, 1>}, {transform_indices = @transform_4, window_bounds = array<i64: 32, 128>}]} {
    %c0 = arith.constant 0 : index
    %c0_0 = arith.constant 0 : index
    %0 = vector.load %arg1[%c0, %c0_0] : memref<32x160xbf16, #tpu.memory_space<vmem>>, vector<32x160xbf16>
    %c0_1 = arith.constant 0 : index
    %c0_2 = arith.constant 0 : index
    %1 = vector.load %arg2[%c0_1, %c0_2] : memref<160x128xbf16, #tpu.memory_space<vmem>>, vector<160x128xbf16>
    %cst = arith.constant dense<0.000000e+00> : vector<32x128xf32>
    %2 = tpu.matmul %0, %1, %cst {dimension_numbers = #tpu.dot_dimension_numbers<[1], [0], [0], [1], [0, 0, 1, 1], [], []>} : vector<32x160xbf16>, vector<160x128xbf16>, vector<32x128xf32> -> vector<32x128xf32>
    %c0_3 = arith.constant 0 : index
    %c0_4 = arith.constant 0 : index
    %3 = vector.load %arg3[%c0_3, %c0_4] : memref<32x1xf32, #tpu.memory_space<vmem>>, vector<32x1xf32>
    %4 = vector.broadcast %3 : vector<32x1xf32> to vector<32x128xf32>
    %5 = arith.addf %2, %4 : vector<32x128xf32>
    %c0_5 = arith.constant 0 : index
    %c0_6 = arith.constant 0 : index
    %6 = vector.load %arg4[%c0_5, %c0_6] : memref<32x1xf32, #tpu.memory_space<vmem>>, vector<32x1xf32>
    %7 = vector.broadcast %6 : vector<32x1xf32> to vector<32x128xf32>
    %8 = arith.maximumf %5, %7 : vector<32x128xf32>
    %9 = arith.truncf %8 : vector<32x128xf32> to vector<32x128xbf16>
    %c0_7 = arith.constant 0 : index
    %c0_8 = arith.constant 0 : index
    %10 = vector.load %arg5[%c0_7, %c0_8] : memref<32x128xbf16, #tpu.memory_space<vmem>>, vector<32x128xbf16>
    tpu.vector_store %arg5[%c0_7, %c0_8], %9 {strides = array<i32>} : memref<32x128xbf16, #tpu.memory_space<vmem>>, vector<32x128xbf16>,
    return
  }
  func.func @transform_0(%arg0: i32) -> (i32, i32) {
    %c0_i32 = arith.constant 0 : i32
    %c0_i32_0 = arith.constant 0 : i32
    %c0_i32_1 = arith.constant 0 : i32
    return %c0_i32, %c0_i32_0 : i32, i32
  }
  func.func @transform_1(%arg0: i32) -> (i32, i32) {
    %c0_i32 = arith.constant 0 : i32
    %c0_i32_0 = arith.constant 0 : i32
    return %c0_i32, %arg0 : i32, i32
  }
  func.func @transform_2(%arg0: i32) -> (i32, i32) {
    %c0_i32 = arith.constant 0 : i32
    %c0_i32_0 = arith.constant 0 : i32
    %c0_i32_1 = arith.constant 0 : i32
    return %c0_i32, %c0_i32_0 : i32, i32
  }
  func.func @transform_3(%arg0: i32) -> (i32, i32) {
    %c0_i32 = arith.constant 0 : i32
    %c0_i32_0 = arith.constant 0 : i32
    %c0_i32_1 = arith.constant 0 : i32
    return %c0_i32, %c0_i32_0 : i32, i32
  }
  func.func @transform_4(%arg0: i32) -> (i32, i32) {
    %c0_i32 = arith.constant 0 : i32
    %c0_i32_0 = arith.constant 0 : i32
    return %c0_i32, %arg0 : i32, i32
  }
}

module attributes {stable_mosaic.version = 11 : i64} {
  func.func @_mm_kernel(%arg0: i32, %arg1: memref<64x288xbf16, #tpu.memory_space<vmem>>, %arg2: memref<288x128xbf16, #tpu.memory_space<vmem>>, %arg3: memref<64x1xf32, #tpu.memory_space<vmem>>, %arg4: memref<64x1xf32, #tpu.memory_space<vmem>>, %arg5: memref<64x128xbf16, #tpu.memory_space<vmem>>) attributes {dimension_semantics = [#tpu.dimension_semantics<parallel>], iteration_bounds = array<i64: 1>, scalar_prefetch = 0 : i64, scratch_operands = 0 : i64, tpu.core_type = #tpu.core_type<tc>, window_params = [{pipeline_mode = #tpu.pipeline_mode<synchronous>, transform_indices = @transform_0, window_bounds = array<i64: 64, 288>}, {transform_indices = @transform_1, window_bounds = array<i64: 288, 128>}, {pipeline_mode = #tpu.pipeline_mode<synchronous>, transform_indices = @transform_2, window_bounds = array<i64: 64, 1>}, {pipeline_mode = #tpu.pipeline_mode<synchronous>, transform_indices = @transform_3, window_bounds = array<i64: 64, 1>}, {transform_indices = @transform_4, window_bounds = array<i64: 64, 128>}]} {
    %c0 = arith.constant 0 : index
    %c0_0 = arith.constant 0 : index
    %0 = vector.load %arg1[%c0, %c0_0] : memref<64x288xbf16, #tpu.memory_space<vmem>>, vector<64x288xbf16>
    %c0_1 = arith.constant 0 : index
    %c0_2 = arith.constant 0 : index
    %1 = vector.load %arg2[%c0_1, %c0_2] : memref<288x128xbf16, #tpu.memory_space<vmem>>, vector<288x128xbf16>
    %cst = arith.constant dense<0.000000e+00> : vector<64x128xf32>
    %2 = tpu.matmul %0, %1, %cst {dimension_numbers = #tpu.dot_dimension_numbers<[1], [0], [0], [1], [0, 0, 1, 1], [], []>} : vector<64x288xbf16>, vector<288x128xbf16>, vector<64x128xf32> -> vector<64x128xf32>
    %c0_3 = arith.constant 0 : index
    %c0_4 = arith.constant 0 : index
    %3 = vector.load %arg3[%c0_3, %c0_4] : memref<64x1xf32, #tpu.memory_space<vmem>>, vector<64x1xf32>
    %4 = vector.broadcast %3 : vector<64x1xf32> to vector<64x128xf32>
    %5 = arith.addf %2, %4 : vector<64x128xf32>
    %c0_5 = arith.constant 0 : index
    %c0_6 = arith.constant 0 : index
    %6 = vector.load %arg4[%c0_5, %c0_6] : memref<64x1xf32, #tpu.memory_space<vmem>>, vector<64x1xf32>
    %7 = vector.broadcast %6 : vector<64x1xf32> to vector<64x128xf32>
    %8 = arith.maximumf %5, %7 : vector<64x128xf32>
    %9 = arith.truncf %8 : vector<64x128xf32> to vector<64x128xbf16>
    %c0_7 = arith.constant 0 : index
    %c0_8 = arith.constant 0 : index
    %10 = vector.load %arg5[%c0_7, %c0_8] : memref<64x128xbf16, #tpu.memory_space<vmem>>, vector<64x128xbf16>
    tpu.vector_store %arg5[%c0_7, %c0_8], %9 {strides = array<i32>} : memref<64x128xbf16, #tpu.memory_space<vmem>>, vector<64x128xbf16>,
    return
  }
  func.func @transform_0(%arg0: i32) -> (i32, i32) {
    %c0_i32 = arith.constant 0 : i32
    %c0_i32_0 = arith.constant 0 : i32
    %c0_i32_1 = arith.constant 0 : i32
    return %c0_i32, %c0_i32_0 : i32, i32
  }
  func.func @transform_1(%arg0: i32) -> (i32, i32) {
    %c0_i32 = arith.constant 0 : i32
    %c0_i32_0 = arith.constant 0 : i32
    return %c0_i32, %arg0 : i32, i32
  }
  func.func @transform_2(%arg0: i32) -> (i32, i32) {
    %c0_i32 = arith.constant 0 : i32
    %c0_i32_0 = arith.constant 0 : i32
    %c0_i32_1 = arith.constant 0 : i32
    return %c0_i32, %c0_i32_0 : i32, i32
  }
  func.func @transform_3(%arg0: i32) -> (i32, i32) {
    %c0_i32 = arith.constant 0 : i32
    %c0_i32_0 = arith.constant 0 : i32
    %c0_i32_1 = arith.constant 0 : i32
    return %c0_i32, %c0_i32_0 : i32, i32
  }
  func.func @transform_4(%arg0: i32) -> (i32, i32) {
    %c0_i32 = arith.constant 0 : i32
    %c0_i32_0 = arith.constant 0 : i32
    return %c0_i32, %arg0 : i32, i32
  }
}

module attributes {stable_mosaic.version = 11 : i64} {
  func.func @_mm_res_kernel(%arg0: i32, %arg1: memref<32x288xbf16, #tpu.memory_space<vmem>>, %arg2: memref<288x128xbf16, #tpu.memory_space<vmem>>, %arg3: memref<32x1xf32, #tpu.memory_space<vmem>>, %arg4: memref<32x1xf32, #tpu.memory_space<vmem>>, %arg5: memref<32x128xbf16, #tpu.memory_space<vmem>>, %arg6: memref<32x128xbf16, #tpu.memory_space<vmem>>) attributes {dimension_semantics = [#tpu.dimension_semantics<parallel>], iteration_bounds = array<i64: 1>, scalar_prefetch = 0 : i64, scratch_operands = 0 : i64, tpu.core_type = #tpu.core_type<tc>, window_params = [{pipeline_mode = #tpu.pipeline_mode<synchronous>, transform_indices = @transform_0, window_bounds = array<i64: 32, 288>}, {transform_indices = @transform_1, window_bounds = array<i64: 288, 128>}, {pipeline_mode = #tpu.pipeline_mode<synchronous>, transform_indices = @transform_2, window_bounds = array<i64: 32, 1>}, {pipeline_mode = #tpu.pipeline_mode<synchronous>, transform_indices = @transform_3, window_bounds = array<i64: 32, 1>}, {transform_indices = @transform_4, window_bounds = array<i64: 32, 128>}, {transform_indices = @transform_5, window_bounds = array<i64: 32, 128>}]} {
    %c0 = arith.constant 0 : index
    %c0_0 = arith.constant 0 : index
    %0 = vector.load %arg1[%c0, %c0_0] : memref<32x288xbf16, #tpu.memory_space<vmem>>, vector<32x288xbf16>
    %c0_1 = arith.constant 0 : index
    %c0_2 = arith.constant 0 : index
    %1 = vector.load %arg2[%c0_1, %c0_2] : memref<288x128xbf16, #tpu.memory_space<vmem>>, vector<288x128xbf16>
    %cst = arith.constant dense<0.000000e+00> : vector<32x128xf32>
    %2 = tpu.matmul %0, %1, %cst {dimension_numbers = #tpu.dot_dimension_numbers<[1], [0], [0], [1], [0, 0, 1, 1], [], []>} : vector<32x288xbf16>, vector<288x128xbf16>, vector<32x128xf32> -> vector<32x128xf32>
    %c0_3 = arith.constant 0 : index
    %c0_4 = arith.constant 0 : index
    %3 = vector.load %arg3[%c0_3, %c0_4] : memref<32x1xf32, #tpu.memory_space<vmem>>, vector<32x1xf32>
    %4 = vector.broadcast %3 : vector<32x1xf32> to vector<32x128xf32>
    %5 = arith.addf %2, %4 : vector<32x128xf32>
    %c0_5 = arith.constant 0 : index
    %c0_6 = arith.constant 0 : index
    %6 = vector.load %arg4[%c0_5, %c0_6] : memref<32x1xf32, #tpu.memory_space<vmem>>, vector<32x1xf32>
    %7 = vector.broadcast %6 : vector<32x1xf32> to vector<32x128xf32>
    %8 = arith.maximumf %5, %7 : vector<32x128xf32>
    %c0_7 = arith.constant 0 : index
    %c0_8 = arith.constant 0 : index
    %9 = vector.load %arg5[%c0_7, %c0_8] : memref<32x128xbf16, #tpu.memory_space<vmem>>, vector<32x128xbf16>
    %10 = arith.extf %9 : vector<32x128xbf16> to vector<32x128xf32>
    %11 = arith.addf %8, %10 : vector<32x128xf32>
    %12 = arith.truncf %11 : vector<32x128xf32> to vector<32x128xbf16>
    %c0_9 = arith.constant 0 : index
    %c0_10 = arith.constant 0 : index
    %13 = vector.load %arg6[%c0_9, %c0_10] : memref<32x128xbf16, #tpu.memory_space<vmem>>, vector<32x128xbf16>
    tpu.vector_store %arg6[%c0_9, %c0_10], %12 {strides = array<i32>} : memref<32x128xbf16, #tpu.memory_space<vmem>>, vector<32x128xbf16>,
    return
  }
  func.func @transform_0(%arg0: i32) -> (i32, i32) {
    %c0_i32 = arith.constant 0 : i32
    %c0_i32_0 = arith.constant 0 : i32
    %c0_i32_1 = arith.constant 0 : i32
    return %c0_i32, %c0_i32_0 : i32, i32
  }
  func.func @transform_1(%arg0: i32) -> (i32, i32) {
    %c0_i32 = arith.constant 0 : i32
    %c0_i32_0 = arith.constant 0 : i32
    return %c0_i32, %arg0 : i32, i32
  }
  func.func @transform_2(%arg0: i32) -> (i32, i32) {
    %c0_i32 = arith.constant 0 : i32
    %c0_i32_0 = arith.constant 0 : i32
    %c0_i32_1 = arith.constant 0 : i32
    return %c0_i32, %c0_i32_0 : i32, i32
  }
  func.func @transform_3(%arg0: i32) -> (i32, i32) {
    %c0_i32 = arith.constant 0 : i32
    %c0_i32_0 = arith.constant 0 : i32
    %c0_i32_1 = arith.constant 0 : i32
    return %c0_i32, %c0_i32_0 : i32, i32
  }
  func.func @transform_4(%arg0: i32) -> (i32, i32) {
    %c0_i32 = arith.constant 0 : i32
    %c0_i32_0 = arith.constant 0 : i32
    return %c0_i32, %arg0 : i32, i32
  }
  func.func @transform_5(%arg0: i32) -> (i32, i32) {
    %c0_i32 = arith.constant 0 : i32
    %c0_i32_0 = arith.constant 0 : i32
    return %c0_i32, %arg0 : i32, i32
  }
}

module attributes {stable_mosaic.version = 11 : i64} {
  func.func @_mm_kernel(%arg0: i32, %arg1: memref<128x288xbf16, #tpu.memory_space<vmem>>, %arg2: memref<288x128xbf16, #tpu.memory_space<vmem>>, %arg3: memref<128x1xf32, #tpu.memory_space<vmem>>, %arg4: memref<128x1xf32, #tpu.memory_space<vmem>>, %arg5: memref<128x128xbf16, #tpu.memory_space<vmem>>) attributes {dimension_semantics = [#tpu.dimension_semantics<parallel>], iteration_bounds = array<i64: 1>, scalar_prefetch = 0 : i64, scratch_operands = 0 : i64, tpu.core_type = #tpu.core_type<tc>, window_params = [{pipeline_mode = #tpu.pipeline_mode<synchronous>, transform_indices = @transform_0, window_bounds = array<i64: 128, 288>}, {transform_indices = @transform_1, window_bounds = array<i64: 288, 128>}, {pipeline_mode = #tpu.pipeline_mode<synchronous>, transform_indices = @transform_2, window_bounds = array<i64: 128, 1>}, {pipeline_mode = #tpu.pipeline_mode<synchronous>, transform_indices = @transform_3, window_bounds = array<i64: 128, 1>}, {transform_indices = @transform_4, window_bounds = array<i64: 128, 128>}]} {
    %c0 = arith.constant 0 : index
    %c0_0 = arith.constant 0 : index
    %0 = vector.load %arg1[%c0, %c0_0] : memref<128x288xbf16, #tpu.memory_space<vmem>>, vector<128x288xbf16>
    %c0_1 = arith.constant 0 : index
    %c0_2 = arith.constant 0 : index
    %1 = vector.load %arg2[%c0_1, %c0_2] : memref<288x128xbf16, #tpu.memory_space<vmem>>, vector<288x128xbf16>
    %cst = arith.constant dense<0.000000e+00> : vector<128x128xf32>
    %2 = tpu.matmul %0, %1, %cst {dimension_numbers = #tpu.dot_dimension_numbers<[1], [0], [0], [1], [0, 0, 1, 1], [], []>} : vector<128x288xbf16>, vector<288x128xbf16>, vector<128x128xf32> -> vector<128x128xf32>
    %c0_3 = arith.constant 0 : index
    %c0_4 = arith.constant 0 : index
    %3 = vector.load %arg3[%c0_3, %c0_4] : memref<128x1xf32, #tpu.memory_space<vmem>>, vector<128x1xf32>
    %4 = vector.broadcast %3 : vector<128x1xf32> to vector<128x128xf32>
    %5 = arith.addf %2, %4 : vector<128x128xf32>
    %c0_5 = arith.constant 0 : index
    %c0_6 = arith.constant 0 : index
    %6 = vector.load %arg4[%c0_5, %c0_6] : memref<128x1xf32, #tpu.memory_space<vmem>>, vector<128x1xf32>
    %7 = vector.broadcast %6 : vector<128x1xf32> to vector<128x128xf32>
    %8 = arith.maximumf %5, %7 : vector<128x128xf32>
    %9 = arith.truncf %8 : vector<128x128xf32> to vector<128x128xbf16>
    %c0_7 = arith.constant 0 : index
    %c0_8 = arith.constant 0 : index
    %10 = vector.load %arg5[%c0_7, %c0_8] : memref<128x128xbf16, #tpu.memory_space<vmem>>, vector<128x128xbf16>
    tpu.vector_store %arg5[%c0_7, %c0_8], %9 {strides = array<i32>} : memref<128x128xbf16, #tpu.memory_space<vmem>>, vector<128x128xbf16>,
    return
  }
  func.func @transform_0(%arg0: i32) -> (i32, i32) {
    %c0_i32 = arith.constant 0 : i32
    %c0_i32_0 = arith.constant 0 : i32
    %c0_i32_1 = arith.constant 0 : i32
    return %c0_i32, %c0_i32_0 : i32, i32
  }
  func.func @transform_1(%arg0: i32) -> (i32, i32) {
    %c0_i32 = arith.constant 0 : i32
    %c0_i32_0 = arith.constant 0 : i32
    return %c0_i32, %arg0 : i32, i32
  }
  func.func @transform_2(%arg0: i32) -> (i32, i32) {
    %c0_i32 = arith.constant 0 : i32
    %c0_i32_0 = arith.constant 0 : i32
    %c0_i32_1 = arith.constant 0 : i32
    return %c0_i32, %c0_i32_0 : i32, i32
  }
  func.func @transform_3(%arg0: i32) -> (i32, i32) {
    %c0_i32 = arith.constant 0 : i32
    %c0_i32_0 = arith.constant 0 : i32
    %c0_i32_1 = arith.constant 0 : i32
    return %c0_i32, %c0_i32_0 : i32, i32
  }
  func.func @transform_4(%arg0: i32) -> (i32, i32) {
    %c0_i32 = arith.constant 0 : i32
    %c0_i32_0 = arith.constant 0 : i32
    return %c0_i32, %arg0 : i32, i32
  }
}

module attributes {stable_mosaic.version = 11 : i64} {
  func.func @_mm_res_kernel(%arg0: i32, %arg1: memref<64x576xbf16, #tpu.memory_space<vmem>>, %arg2: memref<576x128xbf16, #tpu.memory_space<vmem>>, %arg3: memref<64x1xf32, #tpu.memory_space<vmem>>, %arg4: memref<64x1xf32, #tpu.memory_space<vmem>>, %arg5: memref<64x128xbf16, #tpu.memory_space<vmem>>, %arg6: memref<64x128xbf16, #tpu.memory_space<vmem>>) attributes {dimension_semantics = [#tpu.dimension_semantics<parallel>], iteration_bounds = array<i64: 1>, scalar_prefetch = 0 : i64, scratch_operands = 0 : i64, tpu.core_type = #tpu.core_type<tc>, window_params = [{pipeline_mode = #tpu.pipeline_mode<synchronous>, transform_indices = @transform_0, window_bounds = array<i64: 64, 576>}, {transform_indices = @transform_1, window_bounds = array<i64: 576, 128>}, {pipeline_mode = #tpu.pipeline_mode<synchronous>, transform_indices = @transform_2, window_bounds = array<i64: 64, 1>}, {pipeline_mode = #tpu.pipeline_mode<synchronous>, transform_indices = @transform_3, window_bounds = array<i64: 64, 1>}, {transform_indices = @transform_4, window_bounds = array<i64: 64, 128>}, {transform_indices = @transform_5, window_bounds = array<i64: 64, 128>}]} {
    %c0 = arith.constant 0 : index
    %c0_0 = arith.constant 0 : index
    %0 = vector.load %arg1[%c0, %c0_0] : memref<64x576xbf16, #tpu.memory_space<vmem>>, vector<64x576xbf16>
    %c0_1 = arith.constant 0 : index
    %c0_2 = arith.constant 0 : index
    %1 = vector.load %arg2[%c0_1, %c0_2] : memref<576x128xbf16, #tpu.memory_space<vmem>>, vector<576x128xbf16>
    %cst = arith.constant dense<0.000000e+00> : vector<64x128xf32>
    %2 = tpu.matmul %0, %1, %cst {dimension_numbers = #tpu.dot_dimension_numbers<[1], [0], [0], [1], [0, 0, 1, 1], [], []>} : vector<64x576xbf16>, vector<576x128xbf16>, vector<64x128xf32> -> vector<64x128xf32>
    %c0_3 = arith.constant 0 : index
    %c0_4 = arith.constant 0 : index
    %3 = vector.load %arg3[%c0_3, %c0_4] : memref<64x1xf32, #tpu.memory_space<vmem>>, vector<64x1xf32>
    %4 = vector.broadcast %3 : vector<64x1xf32> to vector<64x128xf32>
    %5 = arith.addf %2, %4 : vector<64x128xf32>
    %c0_5 = arith.constant 0 : index
    %c0_6 = arith.constant 0 : index
    %6 = vector.load %arg4[%c0_5, %c0_6] : memref<64x1xf32, #tpu.memory_space<vmem>>, vector<64x1xf32>
    %7 = vector.broadcast %6 : vector<64x1xf32> to vector<64x128xf32>
    %8 = arith.maximumf %5, %7 : vector<64x128xf32>
    %c0_7 = arith.constant 0 : index
    %c0_8 = arith.constant 0 : index
    %9 = vector.load %arg5[%c0_7, %c0_8] : memref<64x128xbf16, #tpu.memory_space<vmem>>, vector<64x128xbf16>
    %10 = arith.extf %9 : vector<64x128xbf16> to vector<64x128xf32>
    %11 = arith.addf %8, %10 : vector<64x128xf32>
    %12 = arith.truncf %11 : vector<64x128xf32> to vector<64x128xbf16>
    %c0_9 = arith.constant 0 : index
    %c0_10 = arith.constant 0 : index
    %13 = vector.load %arg6[%c0_9, %c0_10] : memref<64x128xbf16, #tpu.memory_space<vmem>>, vector<64x128xbf16>
    tpu.vector_store %arg6[%c0_9, %c0_10], %12 {strides = array<i32>} : memref<64x128xbf16, #tpu.memory_space<vmem>>, vector<64x128xbf16>,
    return
  }
  func.func @transform_0(%arg0: i32) -> (i32, i32) {
    %c0_i32 = arith.constant 0 : i32
    %c0_i32_0 = arith.constant 0 : i32
    %c0_i32_1 = arith.constant 0 : i32
    return %c0_i32, %c0_i32_0 : i32, i32
  }
  func.func @transform_1(%arg0: i32) -> (i32, i32) {
    %c0_i32 = arith.constant 0 : i32
    %c0_i32_0 = arith.constant 0 : i32
    return %c0_i32, %arg0 : i32, i32
  }
  func.func @transform_2(%arg0: i32) -> (i32, i32) {
    %c0_i32 = arith.constant 0 : i32
    %c0_i32_0 = arith.constant 0 : i32
    %c0_i32_1 = arith.constant 0 : i32
    return %c0_i32, %c0_i32_0 : i32, i32
  }
  func.func @transform_3(%arg0: i32) -> (i32, i32) {
    %c0_i32 = arith.constant 0 : i32
    %c0_i32_0 = arith.constant 0 : i32
    %c0_i32_1 = arith.constant 0 : i32
    return %c0_i32, %c0_i32_0 : i32, i32
  }
  func.func @transform_4(%arg0: i32) -> (i32, i32) {
    %c0_i32 = arith.constant 0 : i32
    %c0_i32_0 = arith.constant 0 : i32
    return %c0_i32, %arg0 : i32, i32
  }
  func.func @transform_5(%arg0: i32) -> (i32, i32) {
    %c0_i32 = arith.constant 0 : i32
    %c0_i32_0 = arith.constant 0 : i32
    return %c0_i32, %arg0 : i32, i32
  }
}

module attributes {stable_mosaic.version = 11 : i64} {
  func.func @_mm_kernel(%arg0: i32, %arg1: memref<256x576xbf16, #tpu.memory_space<vmem>>, %arg2: memref<576x128xbf16, #tpu.memory_space<vmem>>, %arg3: memref<256x1xf32, #tpu.memory_space<vmem>>, %arg4: memref<256x1xf32, #tpu.memory_space<vmem>>, %arg5: memref<256x128xbf16, #tpu.memory_space<vmem>>) attributes {dimension_semantics = [#tpu.dimension_semantics<parallel>], iteration_bounds = array<i64: 1>, scalar_prefetch = 0 : i64, scratch_operands = 0 : i64, tpu.core_type = #tpu.core_type<tc>, window_params = [{pipeline_mode = #tpu.pipeline_mode<synchronous>, transform_indices = @transform_0, window_bounds = array<i64: 256, 576>}, {transform_indices = @transform_1, window_bounds = array<i64: 576, 128>}, {pipeline_mode = #tpu.pipeline_mode<synchronous>, transform_indices = @transform_2, window_bounds = array<i64: 256, 1>}, {pipeline_mode = #tpu.pipeline_mode<synchronous>, transform_indices = @transform_3, window_bounds = array<i64: 256, 1>}, {transform_indices = @transform_4, window_bounds = array<i64: 256, 128>}]} {
    %c0 = arith.constant 0 : index
    %c0_0 = arith.constant 0 : index
    %0 = vector.load %arg1[%c0, %c0_0] : memref<256x576xbf16, #tpu.memory_space<vmem>>, vector<256x576xbf16>
    %c0_1 = arith.constant 0 : index
    %c0_2 = arith.constant 0 : index
    %1 = vector.load %arg2[%c0_1, %c0_2] : memref<576x128xbf16, #tpu.memory_space<vmem>>, vector<576x128xbf16>
    %cst = arith.constant dense<0.000000e+00> : vector<256x128xf32>
    %2 = tpu.matmul %0, %1, %cst {dimension_numbers = #tpu.dot_dimension_numbers<[1], [0], [0], [1], [0, 0, 1, 1], [], []>} : vector<256x576xbf16>, vector<576x128xbf16>, vector<256x128xf32> -> vector<256x128xf32>
    %c0_3 = arith.constant 0 : index
    %c0_4 = arith.constant 0 : index
    %3 = vector.load %arg3[%c0_3, %c0_4] : memref<256x1xf32, #tpu.memory_space<vmem>>, vector<256x1xf32>
    %4 = vector.broadcast %3 : vector<256x1xf32> to vector<256x128xf32>
    %5 = arith.addf %2, %4 : vector<256x128xf32>
    %c0_5 = arith.constant 0 : index
    %c0_6 = arith.constant 0 : index
    %6 = vector.load %arg4[%c0_5, %c0_6] : memref<256x1xf32, #tpu.memory_space<vmem>>, vector<256x1xf32>
    %7 = vector.broadcast %6 : vector<256x1xf32> to vector<256x128xf32>
    %8 = arith.maximumf %5, %7 : vector<256x128xf32>
    %9 = arith.truncf %8 : vector<256x128xf32> to vector<256x128xbf16>
    %c0_7 = arith.constant 0 : index
    %c0_8 = arith.constant 0 : index
    %10 = vector.load %arg5[%c0_7, %c0_8] : memref<256x128xbf16, #tpu.memory_space<vmem>>, vector<256x128xbf16>
    tpu.vector_store %arg5[%c0_7, %c0_8], %9 {strides = array<i32>} : memref<256x128xbf16, #tpu.memory_space<vmem>>, vector<256x128xbf16>,
    return
  }
  func.func @transform_0(%arg0: i32) -> (i32, i32) {
    %c0_i32 = arith.constant 0 : i32
    %c0_i32_0 = arith.constant 0 : i32
    %c0_i32_1 = arith.constant 0 : i32
    return %c0_i32, %c0_i32_0 : i32, i32
  }
  func.func @transform_1(%arg0: i32) -> (i32, i32) {
    %c0_i32 = arith.constant 0 : i32
    %c0_i32_0 = arith.constant 0 : i32
    return %c0_i32, %arg0 : i32, i32
  }
  func.func @transform_2(%arg0: i32) -> (i32, i32) {
    %c0_i32 = arith.constant 0 : i32
    %c0_i32_0 = arith.constant 0 : i32
    %c0_i32_1 = arith.constant 0 : i32
    return %c0_i32, %c0_i32_0 : i32, i32
  }
  func.func @transform_3(%arg0: i32) -> (i32, i32) {
    %c0_i32 = arith.constant 0 : i32
    %c0_i32_0 = arith.constant 0 : i32
    %c0_i32_1 = arith.constant 0 : i32
    return %c0_i32, %c0_i32_0 : i32, i32
  }
  func.func @transform_4(%arg0: i32) -> (i32, i32) {
    %c0_i32 = arith.constant 0 : i32
    %c0_i32_0 = arith.constant 0 : i32
    return %c0_i32, %arg0 : i32, i32
  }
}

module attributes {stable_mosaic.version = 11 : i64} {
  func.func @_mm_res_kernel(%arg0: i32, %arg1: memref<128x1152xbf16, #tpu.memory_space<vmem>>, %arg2: memref<1152x128xbf16, #tpu.memory_space<vmem>>, %arg3: memref<128x1xf32, #tpu.memory_space<vmem>>, %arg4: memref<128x1xf32, #tpu.memory_space<vmem>>, %arg5: memref<128x128xbf16, #tpu.memory_space<vmem>>, %arg6: memref<128x128xbf16, #tpu.memory_space<vmem>>) attributes {dimension_semantics = [#tpu.dimension_semantics<parallel>], iteration_bounds = array<i64: 1>, scalar_prefetch = 0 : i64, scratch_operands = 0 : i64, tpu.core_type = #tpu.core_type<tc>, window_params = [{pipeline_mode = #tpu.pipeline_mode<synchronous>, transform_indices = @transform_0, window_bounds = array<i64: 128, 1152>}, {transform_indices = @transform_1, window_bounds = array<i64: 1152, 128>}, {pipeline_mode = #tpu.pipeline_mode<synchronous>, transform_indices = @transform_2, window_bounds = array<i64: 128, 1>}, {pipeline_mode = #tpu.pipeline_mode<synchronous>, transform_indices = @transform_3, window_bounds = array<i64: 128, 1>}, {transform_indices = @transform_4, window_bounds = array<i64: 128, 128>}, {transform_indices = @transform_5, window_bounds = array<i64: 128, 128>}]} {
    %c0 = arith.constant 0 : index
    %c0_0 = arith.constant 0 : index
    %0 = vector.load %arg1[%c0, %c0_0] : memref<128x1152xbf16, #tpu.memory_space<vmem>>, vector<128x1152xbf16>
    %c0_1 = arith.constant 0 : index
    %c0_2 = arith.constant 0 : index
    %1 = vector.load %arg2[%c0_1, %c0_2] : memref<1152x128xbf16, #tpu.memory_space<vmem>>, vector<1152x128xbf16>
    %cst = arith.constant dense<0.000000e+00> : vector<128x128xf32>
    %2 = tpu.matmul %0, %1, %cst {dimension_numbers = #tpu.dot_dimension_numbers<[1], [0], [0], [1], [0, 0, 1, 1], [], []>} : vector<128x1152xbf16>, vector<1152x128xbf16>, vector<128x128xf32> -> vector<128x128xf32>
    %c0_3 = arith.constant 0 : index
    %c0_4 = arith.constant 0 : index
    %3 = vector.load %arg3[%c0_3, %c0_4] : memref<128x1xf32, #tpu.memory_space<vmem>>, vector<128x1xf32>
    %4 = vector.broadcast %3 : vector<128x1xf32> to vector<128x128xf32>
    %5 = arith.addf %2, %4 : vector<128x128xf32>
    %c0_5 = arith.constant 0 : index
    %c0_6 = arith.constant 0 : index
    %6 = vector.load %arg4[%c0_5, %c0_6] : memref<128x1xf32, #tpu.memory_space<vmem>>, vector<128x1xf32>
    %7 = vector.broadcast %6 : vector<128x1xf32> to vector<128x128xf32>
    %8 = arith.maximumf %5, %7 : vector<128x128xf32>
    %c0_7 = arith.constant 0 : index
    %c0_8 = arith.constant 0 : index
    %9 = vector.load %arg5[%c0_7, %c0_8] : memref<128x128xbf16, #tpu.memory_space<vmem>>, vector<128x128xbf16>
    %10 = arith.extf %9 : vector<128x128xbf16> to vector<128x128xf32>
    %11 = arith.addf %8, %10 : vector<128x128xf32>
    %12 = arith.truncf %11 : vector<128x128xf32> to vector<128x128xbf16>
    %c0_9 = arith.constant 0 : index
    %c0_10 = arith.constant 0 : index
    %13 = vector.load %arg6[%c0_9, %c0_10] : memref<128x128xbf16, #tpu.memory_space<vmem>>, vector<128x128xbf16>
    tpu.vector_store %arg6[%c0_9, %c0_10], %12 {strides = array<i32>} : memref<128x128xbf16, #tpu.memory_space<vmem>>, vector<128x128xbf16>,
    return
  }
  func.func @transform_0(%arg0: i32) -> (i32, i32) {
    %c0_i32 = arith.constant 0 : i32
    %c0_i32_0 = arith.constant 0 : i32
    %c0_i32_1 = arith.constant 0 : i32
    return %c0_i32, %c0_i32_0 : i32, i32
  }
  func.func @transform_1(%arg0: i32) -> (i32, i32) {
    %c0_i32 = arith.constant 0 : i32
    %c0_i32_0 = arith.constant 0 : i32
    return %c0_i32, %arg0 : i32, i32
  }
  func.func @transform_2(%arg0: i32) -> (i32, i32) {
    %c0_i32 = arith.constant 0 : i32
    %c0_i32_0 = arith.constant 0 : i32
    %c0_i32_1 = arith.constant 0 : i32
    return %c0_i32, %c0_i32_0 : i32, i32
  }
  func.func @transform_3(%arg0: i32) -> (i32, i32) {
    %c0_i32 = arith.constant 0 : i32
    %c0_i32_0 = arith.constant 0 : i32
    %c0_i32_1 = arith.constant 0 : i32
    return %c0_i32, %c0_i32_0 : i32, i32
  }
  func.func @transform_4(%arg0: i32) -> (i32, i32) {
    %c0_i32 = arith.constant 0 : i32
    %c0_i32_0 = arith.constant 0 : i32
    return %c0_i32, %arg0 : i32, i32
  }
  func.func @transform_5(%arg0: i32) -> (i32, i32) {
    %c0_i32 = arith.constant 0 : i32
    %c0_i32_0 = arith.constant 0 : i32
    return %c0_i32, %arg0 : i32, i32
  }
}

module attributes {stable_mosaic.version = 11 : i64} {
  func.func @_mm_kernel(%arg0: i32, %arg1: memref<5x1152xbf16, #tpu.memory_space<vmem>>, %arg2: memref<1152x128xbf16, #tpu.memory_space<vmem>>, %arg3: memref<5x1xf32, #tpu.memory_space<vmem>>, %arg4: memref<5x1xf32, #tpu.memory_space<vmem>>, %arg5: memref<5x128xbf16, #tpu.memory_space<vmem>>) attributes {dimension_semantics = [#tpu.dimension_semantics<parallel>], iteration_bounds = array<i64: 1>, scalar_prefetch = 0 : i64, scratch_operands = 0 : i64, tpu.core_type = #tpu.core_type<tc>, window_params = [{pipeline_mode = #tpu.pipeline_mode<synchronous>, transform_indices = @transform_0, window_bounds = array<i64: 5, 1152>}, {transform_indices = @transform_1, window_bounds = array<i64: 1152, 128>}, {pipeline_mode = #tpu.pipeline_mode<synchronous>, transform_indices = @transform_2, window_bounds = array<i64: 5, 1>}, {pipeline_mode = #tpu.pipeline_mode<synchronous>, transform_indices = @transform_3, window_bounds = array<i64: 5, 1>}, {transform_indices = @transform_4, window_bounds = array<i64: 5, 128>}]} {
    %c0 = arith.constant 0 : index
    %c0_0 = arith.constant 0 : index
    %0 = vector.load %arg1[%c0, %c0_0] : memref<5x1152xbf16, #tpu.memory_space<vmem>>, vector<5x1152xbf16>
    %c0_1 = arith.constant 0 : index
    %c0_2 = arith.constant 0 : index
    %1 = vector.load %arg2[%c0_1, %c0_2] : memref<1152x128xbf16, #tpu.memory_space<vmem>>, vector<1152x128xbf16>
    %cst = arith.constant dense<0.000000e+00> : vector<5x128xf32>
    %2 = tpu.matmul %0, %1, %cst {dimension_numbers = #tpu.dot_dimension_numbers<[1], [0], [0], [1], [0, 0, 1, 1], [], []>} : vector<5x1152xbf16>, vector<1152x128xbf16>, vector<5x128xf32> -> vector<5x128xf32>
    %c0_3 = arith.constant 0 : index
    %c0_4 = arith.constant 0 : index
    %3 = vector.load %arg3[%c0_3, %c0_4] : memref<5x1xf32, #tpu.memory_space<vmem>>, vector<5x1xf32>
    %4 = vector.broadcast %3 : vector<5x1xf32> to vector<5x128xf32>
    %5 = arith.addf %2, %4 : vector<5x128xf32>
    %c0_5 = arith.constant 0 : index
    %c0_6 = arith.constant 0 : index
    %6 = vector.load %arg4[%c0_5, %c0_6] : memref<5x1xf32, #tpu.memory_space<vmem>>, vector<5x1xf32>
    %7 = vector.broadcast %6 : vector<5x1xf32> to vector<5x128xf32>
    %8 = arith.maximumf %5, %7 : vector<5x128xf32>
    %9 = arith.truncf %8 : vector<5x128xf32> to vector<5x128xbf16>
    %c0_7 = arith.constant 0 : index
    %c0_8 = arith.constant 0 : index
    %10 = vector.load %arg5[%c0_7, %c0_8] : memref<5x128xbf16, #tpu.memory_space<vmem>>, vector<5x128xbf16>
    tpu.vector_store %arg5[%c0_7, %c0_8], %9 {strides = array<i32>} : memref<5x128xbf16, #tpu.memory_space<vmem>>, vector<5x128xbf16>,
    return
  }
  func.func @transform_0(%arg0: i32) -> (i32, i32) {
    %c0_i32 = arith.constant 0 : i32
    %c0_i32_0 = arith.constant 0 : i32
    %c0_i32_1 = arith.constant 0 : i32
    return %c0_i32, %c0_i32_0 : i32, i32
  }
  func.func @transform_1(%arg0: i32) -> (i32, i32) {
    %c0_i32 = arith.constant 0 : i32
    %c0_i32_0 = arith.constant 0 : i32
    return %c0_i32, %arg0 : i32, i32
  }
  func.func @transform_2(%arg0: i32) -> (i32, i32) {
    %c0_i32 = arith.constant 0 : i32
    %c0_i32_0 = arith.constant 0 : i32
    %c0_i32_1 = arith.constant 0 : i32
    return %c0_i32, %c0_i32_0 : i32, i32
  }
  func.func @transform_3(%arg0: i32) -> (i32, i32) {
    %c0_i32 = arith.constant 0 : i32
    %c0_i32_0 = arith.constant 0 : i32
    %c0_i32_1 = arith.constant 0 : i32
    return %c0_i32, %c0_i32_0 : i32, i32
  }
  func.func @transform_4(%arg0: i32) -> (i32, i32) {
    %c0_i32 = arith.constant 0 : i32
    %c0_i32_0 = arith.constant 0 : i32
    return %c0_i32, %arg0 : i32, i32
  }
}

module attributes {stable_mosaic.version = 11 : i64} {
  func.func @_mm_kernel(%arg0: i32, %arg1: memref<20x32xbf16, #tpu.memory_space<vmem>>, %arg2: memref<32x128xbf16, #tpu.memory_space<vmem>>, %arg3: memref<20x1xf32, #tpu.memory_space<vmem>>, %arg4: memref<20x1xf32, #tpu.memory_space<vmem>>, %arg5: memref<20x128xbf16, #tpu.memory_space<vmem>>) attributes {dimension_semantics = [#tpu.dimension_semantics<parallel>], iteration_bounds = array<i64: 1>, scalar_prefetch = 0 : i64, scratch_operands = 0 : i64, tpu.core_type = #tpu.core_type<tc>, window_params = [{pipeline_mode = #tpu.pipeline_mode<synchronous>, transform_indices = @transform_0, window_bounds = array<i64: 20, 32>}, {transform_indices = @transform_1, window_bounds = array<i64: 32, 128>}, {pipeline_mode = #tpu.pipeline_mode<synchronous>, transform_indices = @transform_2, window_bounds = array<i64: 20, 1>}, {pipeline_mode = #tpu.pipeline_mode<synchronous>, transform_indices = @transform_3, window_bounds = array<i64: 20, 1>}, {transform_indices = @transform_4, window_bounds = array<i64: 20, 128>}]} {
    %c0 = arith.constant 0 : index
    %c0_0 = arith.constant 0 : index
    %0 = vector.load %arg1[%c0, %c0_0] : memref<20x32xbf16, #tpu.memory_space<vmem>>, vector<20x32xbf16>
    %c0_1 = arith.constant 0 : index
    %c0_2 = arith.constant 0 : index
    %1 = vector.load %arg2[%c0_1, %c0_2] : memref<32x128xbf16, #tpu.memory_space<vmem>>, vector<32x128xbf16>
    %cst = arith.constant dense<0.000000e+00> : vector<20x128xf32>
    %2 = tpu.matmul %0, %1, %cst {dimension_numbers = #tpu.dot_dimension_numbers<[1], [0], [0], [1], [0, 0, 1, 1], [], []>} : vector<20x32xbf16>, vector<32x128xbf16>, vector<20x128xf32> -> vector<20x128xf32>
    %c0_3 = arith.constant 0 : index
    %c0_4 = arith.constant 0 : index
    %3 = vector.load %arg3[%c0_3, %c0_4] : memref<20x1xf32, #tpu.memory_space<vmem>>, vector<20x1xf32>
    %4 = vector.broadcast %3 : vector<20x1xf32> to vector<20x128xf32>
    %5 = arith.addf %2, %4 : vector<20x128xf32>
    %c0_5 = arith.constant 0 : index
    %c0_6 = arith.constant 0 : index
    %6 = vector.load %arg4[%c0_5, %c0_6] : memref<20x1xf32, #tpu.memory_space<vmem>>, vector<20x1xf32>
    %7 = vector.broadcast %6 : vector<20x1xf32> to vector<20x128xf32>
    %8 = arith.maximumf %5, %7 : vector<20x128xf32>
    %9 = arith.truncf %8 : vector<20x128xf32> to vector<20x128xbf16>
    %c0_7 = arith.constant 0 : index
    %c0_8 = arith.constant 0 : index
    %10 = vector.load %arg5[%c0_7, %c0_8] : memref<20x128xbf16, #tpu.memory_space<vmem>>, vector<20x128xbf16>
    tpu.vector_store %arg5[%c0_7, %c0_8], %9 {strides = array<i32>} : memref<20x128xbf16, #tpu.memory_space<vmem>>, vector<20x128xbf16>,
    return
  }
  func.func @transform_0(%arg0: i32) -> (i32, i32) {
    %c0_i32 = arith.constant 0 : i32
    %c0_i32_0 = arith.constant 0 : i32
    %c0_i32_1 = arith.constant 0 : i32
    return %c0_i32, %c0_i32_0 : i32, i32
  }
  func.func @transform_1(%arg0: i32) -> (i32, i32) {
    %c0_i32 = arith.constant 0 : i32
    %c0_i32_0 = arith.constant 0 : i32
    return %c0_i32, %arg0 : i32, i32
  }
  func.func @transform_2(%arg0: i32) -> (i32, i32) {
    %c0_i32 = arith.constant 0 : i32
    %c0_i32_0 = arith.constant 0 : i32
    %c0_i32_1 = arith.constant 0 : i32
    return %c0_i32, %c0_i32_0 : i32, i32
  }
  func.func @transform_3(%arg0: i32) -> (i32, i32) {
    %c0_i32 = arith.constant 0 : i32
    %c0_i32_0 = arith.constant 0 : i32
    %c0_i32_1 = arith.constant 0 : i32
    return %c0_i32, %c0_i32_0 : i32, i32
  }
  func.func @transform_4(%arg0: i32) -> (i32, i32) {
    %c0_i32 = arith.constant 0 : i32
    %c0_i32_0 = arith.constant 0 : i32
    return %c0_i32, %arg0 : i32, i32
  }
}

module attributes {stable_mosaic.version = 11 : i64} {
  func.func @_mm_kernel(%arg0: i32, %arg1: memref<5x48xbf16, #tpu.memory_space<vmem>>, %arg2: memref<48x128xbf16, #tpu.memory_space<vmem>>, %arg3: memref<5x1xf32, #tpu.memory_space<vmem>>, %arg4: memref<5x1xf32, #tpu.memory_space<vmem>>, %arg5: memref<5x128xbf16, #tpu.memory_space<vmem>>) attributes {dimension_semantics = [#tpu.dimension_semantics<parallel>], iteration_bounds = array<i64: 1>, scalar_prefetch = 0 : i64, scratch_operands = 0 : i64, tpu.core_type = #tpu.core_type<tc>, window_params = [{pipeline_mode = #tpu.pipeline_mode<synchronous>, transform_indices = @transform_0, window_bounds = array<i64: 5, 48>}, {transform_indices = @transform_1, window_bounds = array<i64: 48, 128>}, {pipeline_mode = #tpu.pipeline_mode<synchronous>, transform_indices = @transform_2, window_bounds = array<i64: 5, 1>}, {pipeline_mode = #tpu.pipeline_mode<synchronous>, transform_indices = @transform_3, window_bounds = array<i64: 5, 1>}, {transform_indices = @transform_4, window_bounds = array<i64: 5, 128>}]} {
    %c0 = arith.constant 0 : index
    %c0_0 = arith.constant 0 : index
    %0 = vector.load %arg1[%c0, %c0_0] : memref<5x48xbf16, #tpu.memory_space<vmem>>, vector<5x48xbf16>
    %c0_1 = arith.constant 0 : index
    %c0_2 = arith.constant 0 : index
    %1 = vector.load %arg2[%c0_1, %c0_2] : memref<48x128xbf16, #tpu.memory_space<vmem>>, vector<48x128xbf16>
    %cst = arith.constant dense<0.000000e+00> : vector<5x128xf32>
    %2 = tpu.matmul %0, %1, %cst {dimension_numbers = #tpu.dot_dimension_numbers<[1], [0], [0], [1], [0, 0, 1, 1], [], []>} : vector<5x48xbf16>, vector<48x128xbf16>, vector<5x128xf32> -> vector<5x128xf32>
    %c0_3 = arith.constant 0 : index
    %c0_4 = arith.constant 0 : index
    %3 = vector.load %arg3[%c0_3, %c0_4] : memref<5x1xf32, #tpu.memory_space<vmem>>, vector<5x1xf32>
    %4 = vector.broadcast %3 : vector<5x1xf32> to vector<5x128xf32>
    %5 = arith.addf %2, %4 : vector<5x128xf32>
    %c0_5 = arith.constant 0 : index
    %c0_6 = arith.constant 0 : index
    %6 = vector.load %arg4[%c0_5, %c0_6] : memref<5x1xf32, #tpu.memory_space<vmem>>, vector<5x1xf32>
    %7 = vector.broadcast %6 : vector<5x1xf32> to vector<5x128xf32>
    %8 = arith.maximumf %5, %7 : vector<5x128xf32>
    %9 = arith.truncf %8 : vector<5x128xf32> to vector<5x128xbf16>
    %c0_7 = arith.constant 0 : index
    %c0_8 = arith.constant 0 : index
    %10 = vector.load %arg5[%c0_7, %c0_8] : memref<5x128xbf16, #tpu.memory_space<vmem>>, vector<5x128xbf16>
    tpu.vector_store %arg5[%c0_7, %c0_8], %9 {strides = array<i32>} : memref<5x128xbf16, #tpu.memory_space<vmem>>, vector<5x128xbf16>,
    return
  }
  func.func @transform_0(%arg0: i32) -> (i32, i32) {
    %c0_i32 = arith.constant 0 : i32
    %c0_i32_0 = arith.constant 0 : i32
    %c0_i32_1 = arith.constant 0 : i32
    return %c0_i32, %c0_i32_0 : i32, i32
  }
  func.func @transform_1(%arg0: i32) -> (i32, i32) {
    %c0_i32 = arith.constant 0 : i32
    %c0_i32_0 = arith.constant 0 : i32
    return %c0_i32, %arg0 : i32, i32
  }
  func.func @transform_2(%arg0: i32) -> (i32, i32) {
    %c0_i32 = arith.constant 0 : i32
    %c0_i32_0 = arith.constant 0 : i32
    %c0_i32_1 = arith.constant 0 : i32
    return %c0_i32, %c0_i32_0 : i32, i32
  }
  func.func @transform_3(%arg0: i32) -> (i32, i32) {
    %c0_i32 = arith.constant 0 : i32
    %c0_i32_0 = arith.constant 0 : i32
    %c0_i32_1 = arith.constant 0 : i32
    return %c0_i32, %c0_i32_0 : i32, i32
  }
  func.func @transform_4(%arg0: i32) -> (i32, i32) {
    %c0_i32 = arith.constant 0 : i32
    %c0_i32_0 = arith.constant 0 : i32
    return %c0_i32, %arg0 : i32, i32
  }
}

module attributes {stable_mosaic.version = 11 : i64} {
  func.func @_mm_kernel(%arg0: i32, %arg1: memref<20x80xbf16, #tpu.memory_space<vmem>>, %arg2: memref<80x256xbf16, #tpu.memory_space<vmem>>, %arg3: memref<20x1xf32, #tpu.memory_space<vmem>>, %arg4: memref<20x1xf32, #tpu.memory_space<vmem>>, %arg5: memref<20x256xbf16, #tpu.memory_space<vmem>>) attributes {dimension_semantics = [#tpu.dimension_semantics<parallel>], iteration_bounds = array<i64: 2>, scalar_prefetch = 0 : i64, scratch_operands = 0 : i64, tpu.core_type = #tpu.core_type<tc>, window_params = [{pipeline_mode = #tpu.pipeline_mode<synchronous>, transform_indices = @transform_0, window_bounds = array<i64: 20, 80>}, {transform_indices = @transform_1, window_bounds = array<i64: 80, 256>}, {pipeline_mode = #tpu.pipeline_mode<synchronous>, transform_indices = @transform_2, window_bounds = array<i64: 20, 1>}, {pipeline_mode = #tpu.pipeline_mode<synchronous>, transform_indices = @transform_3, window_bounds = array<i64: 20, 1>}, {transform_indices = @transform_4, window_bounds = array<i64: 20, 256>}]} {
    %c0 = arith.constant 0 : index
    %c0_0 = arith.constant 0 : index
    %0 = vector.load %arg1[%c0, %c0_0] : memref<20x80xbf16, #tpu.memory_space<vmem>>, vector<20x80xbf16>
    %c0_1 = arith.constant 0 : index
    %c0_2 = arith.constant 0 : index
    %1 = vector.load %arg2[%c0_1, %c0_2] : memref<80x256xbf16, #tpu.memory_space<vmem>>, vector<80x256xbf16>
    %cst = arith.constant dense<0.000000e+00> : vector<20x256xf32>
    %2 = tpu.matmul %0, %1, %cst {dimension_numbers = #tpu.dot_dimension_numbers<[1], [0], [0], [1], [0, 0, 1, 1], [], []>} : vector<20x80xbf16>, vector<80x256xbf16>, vector<20x256xf32> -> vector<20x256xf32>
    %c0_3 = arith.constant 0 : index
    %c0_4 = arith.constant 0 : index
    %3 = vector.load %arg3[%c0_3, %c0_4] : memref<20x1xf32, #tpu.memory_space<vmem>>, vector<20x1xf32>
    %4 = vector.broadcast %3 : vector<20x1xf32> to vector<20x256xf32>
    %5 = arith.addf %2, %4 : vector<20x256xf32>
    %c0_5 = arith.constant 0 : index
    %c0_6 = arith.constant 0 : index
    %6 = vector.load %arg4[%c0_5, %c0_6] : memref<20x1xf32, #tpu.memory_space<vmem>>, vector<20x1xf32>
    %7 = vector.broadcast %6 : vector<20x1xf32> to vector<20x256xf32>
    %8 = arith.maximumf %5, %7 : vector<20x256xf32>
    %9 = arith.truncf %8 : vector<20x256xf32> to vector<20x256xbf16>
    %c0_7 = arith.constant 0 : index
    %c0_8 = arith.constant 0 : index
    %10 = vector.load %arg5[%c0_7, %c0_8] : memref<20x256xbf16, #tpu.memory_space<vmem>>, vector<20x256xbf16>
    tpu.vector_store %arg5[%c0_7, %c0_8], %9 {strides = array<i32>} : memref<20x256xbf16, #tpu.memory_space<vmem>>, vector<20x256xbf16>,
    return
  }
  func.func @transform_0(%arg0: i32) -> (i32, i32) {
    %c0_i32 = arith.constant 0 : i32
    %c0_i32_0 = arith.constant 0 : i32
    %c0_i32_1 = arith.constant 0 : i32
    return %c0_i32, %c0_i32_0 : i32, i32
  }
  func.func @transform_1(%arg0: i32) -> (i32, i32) {
    %c0_i32 = arith.constant 0 : i32
    %c0_i32_0 = arith.constant 0 : i32
    return %c0_i32, %arg0 : i32, i32
  }
  func.func @transform_2(%arg0: i32) -> (i32, i32) {
    %c0_i32 = arith.constant 0 : i32
    %c0_i32_0 = arith.constant 0 : i32
    %c0_i32_1 = arith.constant 0 : i32
    return %c0_i32, %c0_i32_0 : i32, i32
  }
  func.func @transform_3(%arg0: i32) -> (i32, i32) {
    %c0_i32 = arith.constant 0 : i32
    %c0_i32_0 = arith.constant 0 : i32
    %c0_i32_1 = arith.constant 0 : i32
    return %c0_i32, %c0_i32_0 : i32, i32
  }
  func.func @transform_4(%arg0: i32) -> (i32, i32) {
    %c0_i32 = arith.constant 0 : i32
    %c0_i32_0 = arith.constant 0 : i32
    return %c0_i32, %arg0 : i32, i32
  }
}

</mosaic_0001>

<bundles_post_ra>
// kernel: fcn_forward.15
= control target key start
LH: loop header
LB: loop body
LE: loop exit
PB: predicated region body
PF: predicated region fallthrough
CT: control target
= control target key end

     0   :  { %v336_v0 = vmov 0   ;;  %vm144_vm0 = vcmask 261120   ;;  %s458_s1 = inlined_call_operand.vmem [shape: bf16[160,128], index: 1, kind: input, shape index: {}]   ;;  %s459_s0 = inlined_call_operand.vmem [shape: bf16[32,160], index: 0, kind: input, shape index: {}]   ;;  %s460_s2 = inlined_call_operand.vmem [shape: f32[32,1], index: 2, kind: input, shape index: {}]   ;;  %s461_s3 = inlined_call_operand.vmem [shape: f32[32,1], index: 3, kind: input, shape index: {}]   ;;  %s462_s4 = inlined_call_operand.vmem [shape: bf16[32,128], index: 4, kind: output, shape index: {}]  }
   0x1   :  { %151 = vmatprep.subr.bf16.mxu0 %v336_v0  ;;  %287 = vmatprep.subr.bf16.mxu1 %v336_v0  ;;  %v320_v1 = vld [vmem:[%s458_s1] sm:$0xff]   ;;  %v321_v2 = vld [vmem:[%s458_s1 + $0x8] sm:$0xff]   ;;  %v322_v3 = vld [vmem:[%s458_s1 + $0x10] sm:$0xff]  }
   0x2   :  { %309 = vset.pattern.permute.xlu1 %v336_v0  ;;  %308 = vset.pattern.permute.xlu0 %v336_v0  ;;  %v323_v4 = vld [vmem:[%s458_s1 + $0x18] sm:$0xff]   ;;  %v332_v5 = vld [vmem:[%s459_s0 + $0x4] ss:$8 sps:$4 sm:$0xff]   ;;  %v44_v7 = vld [vmem:[%s460_s2 + $0x10] sm:$0xff] }
   0x3   :  { %152 = vmatpush1.bf16.msra.mxu0 %v320_v1  ;;  %297 = vmatpush1.bf16.msra.mxu1 %v320_v1  ;;  %v335_v6 = vld [vmem:[%s459_s0 + $0x14] ss:$8 sps:$4 sm:$0xff]   ;;  %v324_v8 = vld [vmem:[%s458_s1 + $0x20] sm:$0xff]   ;;  %v43_v13 = vld [vmem:[%s460_s2 + $0x8] sm:$0xff] }
   0x4   :  { %153 = vmatprep.subr.bf16.mxu0 %v336_v0  ;;  %288 = vmatprep.subr.bf16.mxu1 %v336_v0  ;;  %v42_v9 = vld [vmem:[%s460_s2] sm:$0xff]  ;;  %v45_v10 = vld [vmem:[%s460_s2 + $0x18] sm:$0xff]  ;;  %v202_v11 = vld [vmem:[%s461_s3 + $0x10] sm:$0xff] }
   0x5   :  { %266 = vmatprep.mubr.msk.bf16.mxu0 %vm144_vm0, %v332_v5  ;;  %58 = vperm.xlu1 %309, %v44_v7   ;;  %v203_v12 = vld [vmem:[%s461_s3 + $0x18] sm:$0xff]  ;;  %v200_v15 = vld [vmem:[%s461_s3] sm:$0xff]  ;;  %v201_v16 = vld [vmem:[%s461_s3 + $0x8] sm:$0xff] }
   0x6   :  { %267 = vmatprep.mubr.msk.bf16.mxu1 %vm144_vm0, %v335_v6  ;;  %48 = vperm.xlu0 %308, %v42_v9   ;;  %v315_v14 = vpack.i.bf16 %v203_v12, %v202_v11  ;;  %v325_v17 = vld [vmem:[%s458_s1 + $0x28] sm:$0xff]   ;;  %v310_v18 = vpack.i.bf16 %v201_v16, %v200_v15  ;;  %v326_v19 = vld [vmem:[%s458_s1 + $0x30] sm:$0xff]   ;;  %v327_v20 = vld [vmem:[%s458_s1 + $0x38] sm:$0xff]  }
   0x7   :  { %154 = vmatpush1.bf16.msra.mxu0 %v321_v2  ;;  %298 = vmatpush1.bf16.msra.mxu1 %v321_v2  ;;  %v328_v21 = vld [vmem:[%s458_s1 + $0x40] sm:$0xff]   ;;  %v329_v22 = vld [vmem:[%s458_s1 + $0x48] sm:$0xff]   ;;  %v333_v24 = vld [vmem:[%s459_s0 + $0x10] ss:$8 sps:$4 sm:$0xff]  }
   0x8   :  { %155 = vmatprep.subr.bf16.mxu0 %v336_v0  ;;  %289 = vmatprep.subr.bf16.mxu1 %v336_v0  ;;  %v330_v23 = vld [vmem:[%s459_s0] ss:$8 sps:$4 sm:$0xff]  }
   0x9   :  { %63 = vperm.xlu1 %309, %v45_v10  }
   0xa   :  { %53 = vperm.xlu0 %308, %v43_v13  }
   0xb   :  { %156 = vmatpush1.bf16.msra.mxu0 %v322_v3  ;;  %299 = vmatpush1.bf16.msra.mxu1 %v322_v3 }
   0xc   :  { %157 = vmatprep.subr.bf16.mxu0 %v336_v0  ;;  %290 = vmatprep.subr.bf16.mxu1 %v336_v0 }
   0xd   :  { %316 = vperm.xlu1 %309, %v315_v14  }
   0xe   :  { %311 = vperm.xlu0 %308, %v310_v18  }
   0xf   :  { %158 = vmatpush1.bf16.msra.mxu0 %v323_v4  ;;  %300 = vmatpush1.bf16.msra.mxu1 %v323_v4 }
  0x10   :  { %159 = vmatprep.subr.bf16.mxu0 %v336_v0  ;;  %291 = vmatprep.subr.bf16.mxu1 %v336_v0 }
  0x13   :  { %160 = vmatpush1.bf16.msra.mxu0 %v324_v8  ;;  %301 = vmatpush1.bf16.msra.mxu1 %v324_v8 }
  0x14   :  { %161 = vmatprep.subr.bf16.mxu0 %v336_v0  ;;  %292 = vmatprep.subr.bf16.mxu1 %v336_v0 }
  0x17   :  { %162 = vmatpush1.bf16.msra.mxu0 %v325_v17  ;;  %302 = vmatpush1.bf16.msra.mxu1 %v325_v17 }
  0x18   :  { %163 = vmatprep.subr.bf16.mxu0 %v336_v0  ;;  %293 = vmatprep.subr.bf16.mxu1 %v336_v0 }
  0x1b   :  { %164 = vmatpush1.bf16.msra.mxu0 %v326_v19  ;;  %303 = vmatpush1.bf16.msra.mxu1 %v326_v19 }
  0x1c   :  { %165 = vmatprep.subr.bf16.mxu0 %v336_v0  ;;  %294 = vmatprep.subr.bf16.mxu1 %v336_v0 }
  0x1f   :  { %166 = vmatpush1.bf16.msra.mxu0 %v327_v20  ;;  %304 = vmatpush1.bf16.msra.mxu1 %v327_v20 }
  0x20   :  { %167 = vmatprep.subr.bf16.mxu0 %v336_v0  ;;  %295 = vmatprep.subr.bf16.mxu1 %v336_v0 }
  0x23   :  { %168 = vmatpush1.bf16.msra.mxu0 %v328_v21  ;;  %305 = vmatpush1.bf16.msra.mxu1 %v328_v21 }
  0x24   :  { %169 = vmatprep.subr.bf16.mxu0 %v336_v0  ;;  %296 = vmatprep.subr.bf16.mxu1 %v336_v0 }
  0x27   :  { %170 = vmatpush1.bf16.msra.mxu0 %v329_v22  ;;  %306 = vmatpush1.bf16.msra.mxu1 %v329_v22 }
  0x2a   :  { %184 = vmatmul.mubr.bf16.vlgmr.msra.gmra.mrb[0].mxu0 %v330_v23  ;;  %192 = vmatmul.mubr.bf16.vlgmr.msra.gmra.mrb[0].mxu1 %v333_v24 }
  0x84   :  { %v59_v25 = vpop.permute.xlu1 %58 }
  0x85   :  { %v49_v26 = vpop.permute.xlu0 %48 }
  0x88   :  { %v64_v27 = vpop.permute.xlu1 %63 }
  0x89   :  { %v54_v28 = vpop.permute.xlu0 %53 }
  0x8c   :  { %v317_v29 = vpop.permute.xlu1 %316 }
  0x8d   :  { %v312_v30 = vpop.permute.xlu0 %311  ;;  %v319_v37 = vunpack.i.h.bf16 %v317_v29  ;;  %v318_v38 = vunpack.i.l.bf16 %v317_v29 }
  0x8e   :  { %v314_v41 = vunpack.i.h.bf16 %v312_v30  ;;  %v313_v42 = vunpack.i.l.bf16 %v312_v30 }
  0xfd   :  { %v185_v31 = vpop.f32.mrb[0].mxu0  ;;  %v193_v32 = vpop.f32.mrb[0].mxu1 }
  0xfe   :  { %v186_v33 = vadd.f32 %v185_v31, %v49_v26  ;;  %v194_v34 = vadd.f32 %v193_v32, %v59_v25  ;;  %v187_v35 = vpop.f32.mrb[1].mxu0  ;;  %v195_v36 = vpop.f32.mrb[1].mxu1 }
  0xff   :  { %v188_v39 = vpop.f32.mrb[2].mxu0  ;;  %v196_v40 = vpop.f32.mrb[2].mxu1 }
 0x100   :  { %v189_v43 = vadd.f32 %v188_v39, %v54_v28  ;;  %v197_v44 = vadd.f32 %v196_v40, %v64_v27  ;;  %v190_v45 = vpop.f32.mrb[3].mxu0  ;;  %v198_v46 = vpop.f32.mrb[3].mxu1  ;;  %v224_v47 = vmax.f32 %v186_v33, %v313_v42  ;;  %v226_v48 = vmax.f32 %v194_v34, %v318_v38 }
 0x102   :  { %v225_v49 = vmax.f32 %v189_v43, %v314_v41  ;;  %v227_v50 = vmax.f32 %v197_v44, %v319_v37 }
 0x104   :  { %v279_v51 = vpack.c.bf16 %v225_v49, %v224_v47  ;;  %v284_v52 = vpack.c.bf16 %v227_v50, %v226_v48 }
 0x106   :  { %280 = vst [vmem:[%s462_s4] sm:$0xff] %v279_v51   ;;  %286 = vst [vmem:[%s462_s4 + $0x8] sm:$0xff] %v284_v52  }

// kernel: fcn_forward.16
= control target key start
LH: loop header
LB: loop body
LE: loop exit
PB: predicated region body
PF: predicated region fallthrough
CT: control target
= control target key end

     0   :  { %v733_v1 = vmov 0   ;;  %vm286_vm0 = vcmask 261120   ;;  %s919_s1 = inlined_call_operand.vmem [shape: bf16[288,128], index: 1, kind: input, shape index: {}]   ;;  %s920_s0 = inlined_call_operand.vmem [shape: bf16[64,288], index: 0, kind: input, shape index: {}]   ;;  %s921_s2 = inlined_call_operand.vmem [shape: f32[64,1], index: 2, kind: input, shape index: {}]   ;;  %s922_s3 = inlined_call_operand.vmem [shape: f32[64,1], index: 3, kind: input, shape index: {}]   ;;  %s923_s4 = inlined_call_operand.vmem [shape: bf16[64,128], index: 4, kind: output, shape index: {}]  }
   0x1   :  { %v699_v0 = vld [vmem:[%s919_s1 + $0x40] sm:$0xff]   ;;  %678 = vset.pattern.permute.xlu1 %v733_v1  ;;  %677 = vset.pattern.permute.xlu0 %v733_v1  ;;  %v701_v3 = vld [vmem:[%s919_s1 + $0x48] sm:$0xff]   ;;  %v703_v5 = vld [vmem:[%s919_s1 + $0x50] sm:$0xff]  }
   0x2   :  { %v700_v2 = vld [vmem:[%s919_s1] sm:$0xff]   ;;  %602 = vmatprep.subr.bf16.mxu0 %v699_v0  ;;  %660 = vmatprep.subr.bf16.mxu1 %v699_v0  ;;  %v702_v4 = vld [vmem:[%s919_s1 + $0x8] sm:$0xff]   ;;  %v704_v6 = vld [vmem:[%s919_s1 + $0x10] sm:$0xff]  }
   0x3   :  { %603 = vmatpush3.bf16.msra.mxu0 %v700_v2  ;;  %668 = vmatpush3.bf16.msra.mxu1 %v700_v2  ;;  %v705_v7 = vld [vmem:[%s919_s1 + $0x58] sm:$0xff]   ;;  %v707_v9 = vld [vmem:[%s919_s1 + $0x60] sm:$0xff]   ;;  %v709_v11 = vld [vmem:[%s919_s1 + $0x68] sm:$0xff]  }
   0x4   :  { %604 = vmatprep.subr.bf16.mxu0 %v701_v3  ;;  %661 = vmatprep.subr.bf16.mxu1 %v701_v3  ;;  %v706_v8 = vld [vmem:[%s919_s1 + $0x18] sm:$0xff]   ;;  %v708_v10 = vld [vmem:[%s919_s1 + $0x20] sm:$0xff]   ;;  %v710_v14 = vld [vmem:[%s919_s1 + $0x28] sm:$0xff]  }
   0x5   :  { %v717_v12 = vld [vmem:[%s920_s0 + $0x4] ss:$12 sps:$4 sm:$0xff]   ;;  %v720_v13 = vld [vmem:[%s920_s0 + $0x4c] ss:$12 sps:$4 sm:$0xff]   ;;  %v718_v23 = vld [vmem:[%s920_s0 + $0x48] ss:$12 sps:$4 sm:$0xff]  }
   0x6   :  { %v711_v15 = vld [vmem:[%s919_s1 + $0x70] sm:$0xff]   ;;  %331 = vmatprep.mubr.bf16.mxu0 %v717_v12  ;;  %355 = vmatprep.mubr.bf16.mxu1 %v720_v13  ;;  %v713_v17 = vld [vmem:[%s919_s1 + $0x78] sm:$0xff]   ;;  %v70_v20 = vld [vmem:[%s921_s2] sm:$0xff] }
   0x7   :  { %605 = vmatpush3.bf16.msra.mxu0 %v702_v4  ;;  %669 = vmatpush3.bf16.msra.mxu1 %v702_v4  ;;  %v712_v16 = vld [vmem:[%s919_s1 + $0x30] sm:$0xff]   ;;  %v714_v18 = vld [vmem:[%s919_s1 + $0x38] sm:$0xff]   ;;  %v721_v21 = vld [vmem:[%s919_s1 + $0x80] sm:$0xff]  }
   0x8   :  { %606 = vmatprep.subr.bf16.mxu0 %v703_v5  ;;  %662 = vmatprep.subr.bf16.mxu1 %v703_v5  ;;  %v72_v19 = vld [vmem:[%s921_s2 + $0x10] sm:$0xff]  ;;  %v715_v22 = vld [vmem:[%s920_s0] ss:$12 sps:$4 sm:$0xff]   ;;  %v73_v24 = vld [vmem:[%s921_s2 + $0x18] sm:$0xff] }
   0x9   :  { %90 = vperm.xlu1 %678, %v72_v19   ;;  %80 = vperm.xlu0 %677, %v70_v20   ;;  %v71_v25 = vld [vmem:[%s921_s2 + $0x8] sm:$0xff]  ;;  %v74_v30 = vld [vmem:[%s921_s2 + $0x20] sm:$0xff]  ;;  %v77_v33 = vld [vmem:[%s921_s2 + $0x38] sm:$0xff] }
   0xa   :  { %v723_v26 = vld [vmem:[%s920_s0 + $0x1c] ss:$12 sps:$4 sm:$0xff]   ;;  %v726_v31 = vld [vmem:[%s920_s0 + $0x18] ss:$12 sps:$4 sm:$0xff]   ;;  %v727_v32 = vld [vmem:[%s920_s0 + $0x20] ss:$12 sps:$4 sm:$0xff]  }
   0xb   :  { %607 = vmatpush3.bf16.msra.mxu0 %v704_v6  ;;  %670 = vmatpush3.bf16.msra.mxu1 %v704_v6  ;;  %v722_v27 = vld [vmem:[%s919_s1 + $0x88] sm:$0xff]   ;;  %v76_v34 = vld [vmem:[%s921_s2 + $0x30] sm:$0xff]  ;;  %v432_v36 = vld [vmem:[%s922_s3 + $0x18] sm:$0xff] }
   0xc   :  { %608 = vmatprep.subr.bf16.mxu0 %v705_v7  ;;  %663 = vmatprep.subr.bf16.mxu1 %v705_v7  ;;  %v725_v28 = vld [vmem:[%s920_s0 + $0x8] ss:$12 sps:$4 sm:$0xff]   ;;  %v429_v37 = vld [vmem:[%s922_s3] sm:$0xff]  ;;  %v436_v44 = vld [vmem:[%s922_s3 + $0x38] sm:$0xff] }
   0xd   :  { %95 = vperm.xlu1 %678, %v73_v24   ;;  %85 = vperm.xlu0 %677, %v71_v25   ;;  %v75_v29 = vld [vmem:[%s921_s2 + $0x28] sm:$0xff]  ;;  %v431_v35 = vld [vmem:[%s922_s3 + $0x10] sm:$0xff]  ;;  %v730_v40 = vld [vmem:[%s920_s0 + $0x38] ss:$12 sps:$4 sm:$0xff]  }
   0xe   :  { %v430_v38 = vld [vmem:[%s922_s3 + $0x8] sm:$0xff]  ;;  %v728_v39 = vld [vmem:[%s920_s0 + $0x34] ss:$12 sps:$4 sm:$0xff]   ;;  %v684_v41 = vpack.i.bf16 %v432_v36, %v431_v35  ;;  %v731_v49 = vld [vmem:[%s920_s0 + $0x30] ss:$12 sps:$4 sm:$0xff]  }
   0xf   :  { %609 = vmatpush3.bf16.msra.mxu0 %v706_v8  ;;  %671 = vmatpush3.bf16.msra.mxu1 %v706_v8  ;;  %v679_v42 = vpack.i.bf16 %v430_v38, %v429_v37  ;;  %v435_v43 = vld [vmem:[%s922_s3 + $0x30] sm:$0xff]  ;;  %v433_v45 = vld [vmem:[%s922_s3 + $0x20] sm:$0xff]  ;;  %v434_v46 = vld [vmem:[%s922_s3 + $0x28] sm:$0xff] }
  0x10   :  { %610 = vmatprep.subr.bf16.mxu0 %v707_v9  ;;  %664 = vmatprep.subr.bf16.mxu1 %v707_v9  ;;  %v694_v47 = vpack.i.bf16 %v436_v44, %v435_v43  ;;  %v689_v48 = vpack.i.bf16 %v434_v46, %v433_v45  ;;  %v732_v50 = vld [vmem:[%s920_s0 + $0x50] ss:$12 sps:$4 sm:$0xff]  }
  0x11   :  { %105 = vperm.xlu1 %678, %v75_v29   ;;  %100 = vperm.xlu0 %677, %v74_v30  }
  0x13   :  { %611 = vmatpush3.bf16.msra.mxu0 %v708_v10  ;;  %672 = vmatpush3.bf16.msra.mxu1 %v708_v10 }
  0x14   :  { %612 = vmatprep.subr.bf16.mxu0 %v709_v11  ;;  %665 = vmatprep.subr.bf16.mxu1 %v709_v11 }
  0x15   :  { %115 = vperm.xlu1 %678, %v77_v33   ;;  %110 = vperm.xlu0 %677, %v76_v34  }
  0x17   :  { %613 = vmatpush3.bf16.msra.mxu0 %v710_v14  ;;  %673 = vmatpush3.bf16.msra.mxu1 %v710_v14 }
  0x18   :  { %614 = vmatprep.subr.bf16.mxu0 %v711_v15  ;;  %666 = vmatprep.subr.bf16.mxu1 %v711_v15 }
  0x19   :  { %685 = vperm.xlu1 %678, %v684_v41   ;;  %680 = vperm.xlu0 %677, %v679_v42  }
  0x1b   :  { %615 = vmatpush3.bf16.msra.mxu0 %v712_v16  ;;  %674 = vmatpush3.bf16.msra.mxu1 %v712_v16 }
  0x1c   :  { %616 = vmatprep.subr.bf16.mxu0 %v713_v17  ;;  %667 = vmatprep.subr.bf16.mxu1 %v713_v17 }
  0x1d   :  { %695 = vperm.xlu1 %678, %v694_v47   ;;  %690 = vperm.xlu0 %677, %v689_v48  }
  0x1f   :  { %617 = vmatpush3.bf16.msra.mxu0 %v714_v18  ;;  %675 = vmatpush3.bf16.msra.mxu1 %v714_v18 }
  0x20   :  { %648 = vmatprep.subr.bf16.mxu1 %v721_v21 }
  0x22   :  { %332 = vmatmul.mubr.bf16.vlgmr.msra.gmra.mrb[0].mxu0 %v715_v22  ;;  %356 = vmatmul.mubr.bf16.vlgmr.msra.gmra.mrb[0].mxu1 %v718_v23 }
  0x23   :  { %649 = vmatpush3.bf16.msra.mxu1 %v721_v21  ;;  %339 = vmatprep.mubr.bf16.mxu0 %v723_v26 }
  0x24   :  { %650 = vmatprep.subr.bf16.mxu1 %v722_v27  ;;  %652 = vmatprep.mubr.msk.bf16.mxu1 %vm286_vm0, %v725_v28 }
  0x27   :  { %651 = vmatpush3.bf16.msra.mxu1 %v722_v27 }
  0x2a   :  { %340 = vmatmul.mubr.bf16.gmra.mrb[4].mxu0 %v726_v31  ;;  %653 = vmatmul.mubr.msk.bf16.vlgmr.msra.gmra.mrb[4].mxu1 %vm286_vm0, %v727_v32 }
  0x2b   :  { %347 = vmatprep.mubr.bf16.mxu0 %v728_v39  ;;  %656 = vmatprep.mubr.msk.bf16.mxu1 %vm286_vm0, %v730_v40 }
  0x32   :  { %348 = vmatmul.mubr.bf16.gmra.mrb[8].mxu0 %v731_v49  ;;  %657 = vmatmul.mubr.msk.bf16.gmra.mrb[8].mxu1 %vm286_vm0, %v732_v50 }
  0x88   :  { %v91_v51 = vpop.permute.xlu1 %90  ;;  %v81_v52 = vpop.permute.xlu0 %80 }
  0x8c   :  { %v96_v53 = vpop.permute.xlu1 %95  ;;  %v86_v54 = vpop.permute.xlu0 %85 }
  0x90   :  { %v901_v55 = vpop.permute.xlu1 %105  ;;  %v903_v56 = vpop.permute.xlu0 %100 }
  0x94   :  { %v116_v57 = vpop.permute.xlu1 %115  ;;  %v111_v58 = vpop.permute.xlu0 %110 }
  0x98   :  { %v686_v7 = vpop.permute.xlu1 %685  ;;  %v681_v8 = vpop.permute.xlu0 %680 }
  0x99   :  { %v683_v19 = vunpack.i.h.bf16 %v681_v8  ;;  %v682_v22 = vunpack.i.l.bf16 %v681_v8  ;;  %v688_v32 = vunpack.i.h.bf16 %v686_v7  ;;  %v687_v33 = vunpack.i.l.bf16 %v686_v7 }
  0x9c   :  { %v696_v30 = vpop.permute.xlu1 %695 }
  0x9d   :  { %v698_v47 = vunpack.i.h.bf16 %v696_v30  ;;  %v697_v48 = vunpack.i.l.bf16 %v696_v30 }
  0xf5   :  { %v618_v59 = vpop.f32.mrb[0].mxu0  ;;  %v636_v60 = vpop.f32.mrb[0].mxu1 }
  0xf6   :  { %v619_v61 = vpop.f32.mrb[1].mxu0  ;;  %v637_v62 = vpop.f32.mrb[1].mxu1 }
  0xf7   :  { %v620_v63 = vadd.f32 %v619_v61, %v618_v59  ;;  %v638_v0 = vadd.f32 %v637_v62, %v636_v60  ;;  %v621_v1 = vpop.f32.mrb[2].mxu0  ;;  %v639_v2 = vpop.f32.mrb[2].mxu1 }
  0xf8   :  { %v622_v3 = vpop.f32.mrb[3].mxu0  ;;  %v640_v4 = vpop.f32.mrb[3].mxu1 }
  0xf9   :  { %v623_v5 = vadd.f32 %v622_v3, %v621_v1  ;;  %v641_v6 = vadd.f32 %v640_v4, %v639_v2  ;;  %v334_v11 = vadd.f32 %v620_v63, %v81_v52  ;;  %v358_v31 = vadd.f32 %v638_v0, %v111_v58  ;;  %v691_v58 = vpop.permute.xlu0 %690 }
  0xfa   :  { %v693_v63 = vunpack.i.h.bf16 %v691_v58  ;;  %v692_v0 = vunpack.i.l.bf16 %v691_v58 }
  0xfb   :  { %v337_v18 = vadd.f32 %v623_v5, %v86_v54  ;;  %v361_v41 = vadd.f32 %v641_v6, %v116_v57 }
  0xfd   :  { %v624_v9 = vpop.f32.mrb[4].mxu0  ;;  %v654_v10 = vpop.f32.mrb[4].mxu1 }
  0xfe   :  { %v625_v12 = vpop.f32.mrb[5].mxu0  ;;  %v398_v13 = vpop.f32.mrb[5].mxu1 }
  0xff   :  { %v626_v14 = vadd.f32 %v625_v12, %v624_v9  ;;  %v399_v15 = vadd.f32 %v398_v13, %v334_v11  ;;  %v627_v16 = vpop.f32.mrb[6].mxu0  ;;  %v655_v17 = vpop.f32.mrb[6].mxu1 }
 0x100   :  { %v628_v20 = vpop.f32.mrb[7].mxu0  ;;  %v401_v21 = vpop.f32.mrb[7].mxu1 }
 0x101   :  { %v342_v23 = vadd.f32 %v626_v14, %v91_v51  ;;  %v629_v24 = vadd.f32 %v628_v20, %v627_v16  ;;  %v402_v25 = vadd.f32 %v401_v21, %v337_v18  ;;  %v477_v27 = vmax.f32 %v399_v15, %v682_v22 }
 0x103   :  { %v407_v26 = vadd.f32 %v654_v10, %v342_v23  ;;  %v345_v28 = vadd.f32 %v629_v24, %v96_v53  ;;  %v478_v29 = vmax.f32 %v402_v25, %v683_v19 }
 0x105   :  { %v410_v34 = vadd.f32 %v655_v17, %v345_v28  ;;  %v582_v35 = vpack.c.bf16 %v478_v29, %v477_v27  ;;  %v630_v36 = vpop.f32.mrb[8].mxu0  ;;  %v658_v37 = vpop.f32.mrb[8].mxu1  ;;  %v479_v42 = vmax.f32 %v407_v26, %v687_v33 }
 0x106   :  { %v423_v38 = vadd.f32 %v658_v37, %v358_v31  ;;  %v631_v39 = vpop.f32.mrb[9].mxu0  ;;  %v414_v40 = vpop.f32.mrb[9].mxu1 }
 0x107   :  { %v480_v43 = vmax.f32 %v410_v34, %v688_v32  ;;  %583 = vst [vmem:[%s923_s4] sm:$0xff] %v582_v35   ;;  %v632_v44 = vadd.f32 %v631_v39, %v630_v36  ;;  %v633_v45 = vpop.f32.mrb[10].mxu0  ;;  %v659_v46 = vpop.f32.mrb[10].mxu1 }
 0x108   :  { %v426_v49 = vadd.f32 %v659_v46, %v361_v41  ;;  %v634_v50 = vpop.f32.mrb[11].mxu0  ;;  %v417_v51 = vpop.f32.mrb[11].mxu1  ;;  %v483_v57 = vmax.f32 %v423_v38, %v697_v48 }
 0x109   :  { %v587_v52 = vpack.c.bf16 %v480_v43, %v479_v42  ;;  %v350_v53 = vadd.f32 %v632_v44, %v903_v56  ;;  %v635_v54 = vadd.f32 %v634_v50, %v633_v45 }
 0x10a   :  { %v484_v59 = vmax.f32 %v426_v49, %v698_v47 }
 0x10b   :  { %599 = vst [vmem:[%s923_s4 + $0x8] sm:$0xff] %v587_v52   ;;  %v415_v60 = vadd.f32 %v414_v40, %v350_v53  ;;  %v353_v61 = vadd.f32 %v635_v54, %v901_v55 }
 0x10c   :  { %v597_v62 = vpack.c.bf16 %v484_v59, %v483_v57 }
 0x10d   :  { %v418_v1 = vadd.f32 %v417_v51, %v353_v61  ;;  %v481_v56 = vmax.f32 %v415_v60, %v692_v0 }
 0x10e   :  { %601 = vst [vmem:[%s923_s4 + $0x18] sm:$0xff] %v597_v62  }
 0x10f   :  { %v482_v2 = vmax.f32 %v418_v1, %v693_v63 }
 0x111   :  { %v592_v3 = vpack.c.bf16 %v482_v2, %v481_v56 }
 0x113   :  { %600 = vst [vmem:[%s923_s4 + $0x10] sm:$0xff] %v592_v3  }

// kernel: fcn_forward.17
= control target key start
LH: loop header
LB: loop body
LE: loop exit
PB: predicated region body
PF: predicated region fallthrough
CT: control target
= control target key end

     0   :  { %v519_v1 = vmov 0   ;;  %vm227_vm0 = vcmask 261120   ;;  %s660_s1 = inlined_call_operand.vmem [shape: bf16[288,128], index: 1, kind: input, shape index: {}]   ;;  %s661_s0 = inlined_call_operand.vmem [shape: bf16[32,288], index: 0, kind: input, shape index: {}]   ;;  %s662_s2 = inlined_call_operand.vmem [shape: f32[32,1], index: 2, kind: input, shape index: {}]   ;;  %s663_s3 = inlined_call_operand.vmem [shape: f32[32,1], index: 3, kind: input, shape index: {}]   ;;  %s664_s4 = inlined_call_operand.vmem [shape: bf16[32,128], index: 4, kind: input, shape index: {}]   ;;  %s665_s5 = inlined_call_operand.vmem [shape: bf16[32,128], index: 5, kind: output, shape index: {}]  }
   0x1   :  { %v493_v0 = vld [vmem:[%s660_s1 + $0x40] sm:$0xff]   ;;  %492 = vset.pattern.permute.xlu1 %v519_v1  ;;  %491 = vset.pattern.permute.xlu0 %v519_v1  ;;  %v495_v3 = vld [vmem:[%s660_s1 + $0x48] sm:$0xff]   ;;  %v497_v5 = vld [vmem:[%s660_s1 + $0x50] sm:$0xff]  }
   0x2   :  { %v494_v2 = vld [vmem:[%s660_s1] sm:$0xff]   ;;  %450 = vmatprep.subr.bf16.mxu0 %v493_v0  ;;  %v496_v4 = vld [vmem:[%s660_s1 + $0x8] sm:$0xff]   ;;  %v498_v6 = vld [vmem:[%s660_s1 + $0x10] sm:$0xff]  }
   0x3   :  { %451 = vmatpush3.bf16.msra.mxu0 %v494_v2  ;;  %v499_v7 = vld [vmem:[%s660_s1 + $0x58] sm:$0xff]   ;;  %v501_v9 = vld [vmem:[%s660_s1 + $0x60] sm:$0xff]   ;;  %v503_v12 = vld [vmem:[%s660_s1 + $0x68] sm:$0xff]  }
   0x4   :  { %452 = vmatprep.subr.bf16.mxu0 %v495_v3  ;;  %v500_v8 = vld [vmem:[%s660_s1 + $0x18] sm:$0xff]   ;;  %v502_v10 = vld [vmem:[%s660_s1 + $0x20] sm:$0xff]   ;;  %v504_v13 = vld [vmem:[%s660_s1 + $0x28] sm:$0xff]  }
   0x5   :  { %v508_v11 = vld [vmem:[%s660_s1 + $0x80] sm:$0xff]   ;;  %v505_v14 = vld [vmem:[%s660_s1 + $0x70] sm:$0xff]   ;;  %v513_v16 = vld [vmem:[%s660_s1 + $0x88] sm:$0xff]  }
   0x6   :  { %482 = vmatprep.subr.bf16.mxu1 %v508_v11  ;;  %v512_v15 = vld [vmem:[%s661_s0 + $0x4] ss:$12 sps:$4 sm:$0xff]   ;;  %v514_v17 = vld [vmem:[%s661_s0 + $0x8] ss:$12 sps:$4 sm:$0xff]   ;;  %v515_v18 = vld [vmem:[%s661_s0 + $0x20] ss:$12 sps:$4 sm:$0xff]  }
   0x7   :  { %453 = vmatpush3.bf16.msra.mxu0 %v496_v4  ;;  %483 = vmatpush3.bf16.msra.mxu1 %v508_v11  ;;  %v67_v19 = vld [vmem:[%s662_s2 + $0x10] sm:$0xff]  ;;  %v65_v21 = vld [vmem:[%s662_s2] sm:$0xff]  ;;  %v507_v22 = vld [vmem:[%s660_s1 + $0x78] sm:$0xff]  }
   0x8   :  { %454 = vmatprep.subr.bf16.mxu0 %v497_v5  ;;  %266 = vmatprep.mubr.bf16.mxu0 %v512_v15  ;;  %v506_v20 = vld [vmem:[%s660_s1 + $0x30] sm:$0xff]   ;;  %v68_v23 = vld [vmem:[%s662_s2 + $0x18] sm:$0xff]  ;;  %v66_v24 = vld [vmem:[%s662_s2 + $0x8] sm:$0xff] }
   0x9   :  { %484 = vmatprep.subr.bf16.mxu1 %v513_v16  ;;  %486 = vmatprep.mubr.msk.bf16.mxu1 %vm227_vm0, %v514_v17  ;;  %v509_v25 = vld [vmem:[%s660_s1 + $0x38] sm:$0xff]   ;;  %v333_v26 = vld [vmem:[%s663_s3 + $0x8] sm:$0xff]  ;;  %v332_v27 = vld [vmem:[%s663_s3] sm:$0xff] }
   0xa   :  { %81 = vperm.xlu1 %492, %v67_v19   ;;  %71 = vperm.xlu0 %491, %v65_v21   ;;  %v510_v28 = vld [vmem:[%s661_s0] ss:$12 sps:$4 sm:$0xff]   ;;  %v516_v29 = vld [vmem:[%s661_s0 + $0x1c] ss:$12 sps:$4 sm:$0xff]   ;;  %v334_v31 = vld [vmem:[%s663_s3 + $0x10] sm:$0xff] }
   0xb   :  { %455 = vmatpush3.bf16.msra.mxu0 %v498_v6  ;;  %485 = vmatpush3.bf16.msra.mxu1 %v513_v16  ;;  %v335_v30 = vld [vmem:[%s663_s3 + $0x18] sm:$0xff]  ;;  %v431_v48 = vld [vmem:[%s664_s4] sm:$0xff]   ;;  %v448_v3 = vld [vmem:[%s664_s4 + $0x8] sm:$0xff]  }
   0xc   :  { %456 = vmatprep.subr.bf16.mxu0 %v499_v7  ;;  %v518_v32 = vld [vmem:[%s661_s0 + $0x18] ss:$12 sps:$4 sm:$0xff]   ;;  %v432_v53 = vunpack.c.l.bf16 %v431_v48  ;;  %v433_v55 = vunpack.c.h.bf16 %v431_v48  ;;  %v437_v11 = vunpack.c.h.bf16 %v448_v3 }
   0xe   :  { %487 = vmatmul.mubr.msk.bf16.vlgmr.msra.gmra.mrb[0].mxu1 %vm227_vm0, %v515_v18  ;;  %86 = vperm.xlu1 %492, %v68_v23  }
   0xf   :  { %457 = vmatpush3.bf16.msra.mxu0 %v500_v8  ;;  %76 = vperm.xlu0 %491, %v66_v24  }
  0x10   :  { %458 = vmatprep.subr.bf16.mxu0 %v501_v9  ;;  %v436_v9 = vunpack.c.l.bf16 %v448_v3 }
  0x12   :  { %343 = vperm.xlu1 %492, %v333_v26  }
  0x13   :  { %459 = vmatpush3.bf16.msra.mxu0 %v502_v10  ;;  %338 = vperm.xlu0 %491, %v332_v27  }
  0x14   :  { %460 = vmatprep.subr.bf16.mxu0 %v503_v12 }
  0x16   :  { %353 = vperm.xlu1 %492, %v335_v30  }
  0x17   :  { %461 = vmatpush3.bf16.msra.mxu0 %v504_v13  ;;  %348 = vperm.xlu0 %491, %v334_v31  }
  0x18   :  { %462 = vmatprep.subr.bf16.mxu0 %v505_v14 }
  0x1b   :  { %463 = vmatpush3.bf16.msra.mxu0 %v506_v20 }
  0x1c   :  { %464 = vmatprep.subr.bf16.mxu0 %v507_v22 }
  0x1f   :  { %465 = vmatpush3.bf16.msra.mxu0 %v509_v25 }
  0x22   :  { %267 = vmatmul.mubr.bf16.vlgmr.msra.gmra.mrb[0].mxu0 %v510_v28 }
  0x23   :  { %274 = vmatprep.mubr.bf16.mxu0 %v516_v29 }
  0x2a   :  { %275 = vmatmul.mubr.bf16.gmra.mrb[4].mxu0 %v518_v32 }
  0x89   :  { %v72_v37 = vpop.permute.xlu0 %71  ;;  %v82_v38 = vpop.permute.xlu1 %81 }
  0x8d   :  { %v87_v44 = vpop.permute.xlu1 %86 }
  0x8e   :  { %v77_v40 = vpop.permute.xlu0 %76 }
  0x91   :  { %v344_v57 = vpop.permute.xlu1 %343 }
  0x92   :  { %v339_v51 = vpop.permute.xlu0 %338 }
  0x95   :  { %v354_v12 = vpop.permute.xlu1 %353 }
  0x96   :  { %v349_v7 = vpop.permute.xlu0 %348 }
  0xe1   :  { %v488_v33 = vpop.f32.mrb[0].mxu1 }
  0xe2   :  { %v317_v34 = vpop.f32.mrb[1].mxu1 }
  0xe3   :  { %v489_v35 = vpop.f32.mrb[2].mxu1 }
  0xe4   :  { %v320_v36 = vpop.f32.mrb[3].mxu1 }
  0xf5   :  { %v466_v39 = vpop.f32.mrb[0].mxu0 }
  0xf6   :  { %v467_v41 = vpop.f32.mrb[1].mxu0 }
  0xf7   :  { %v468_v42 = vadd.f32 %v467_v41, %v466_v39  ;;  %v469_v43 = vpop.f32.mrb[2].mxu0 }
  0xf8   :  { %v470_v45 = vpop.f32.mrb[3].mxu0 }
  0xf9   :  { %v471_v46 = vadd.f32 %v470_v45, %v469_v43  ;;  %v269_v47 = vadd.f32 %v468_v42, %v72_v37 }
  0xfb   :  { %v318_v49 = vadd.f32 %v317_v34, %v269_v47  ;;  %v272_v50 = vadd.f32 %v471_v46, %v77_v40 }
  0xfd   :  { %v356_v52 = vmax.f32 %v318_v49, %v339_v51  ;;  %v321_v54 = vadd.f32 %v320_v36, %v272_v50  ;;  %v472_v56 = vpop.f32.mrb[4].mxu0 }
  0xfe   :  { %v473_v58 = vpop.f32.mrb[5].mxu0 }
  0xff   :  { %v357_v59 = vmax.f32 %v321_v54, %v344_v57  ;;  %v474_v60 = vadd.f32 %v473_v58, %v472_v56  ;;  %v475_v61 = vpop.f32.mrb[6].mxu0  ;;  %v368_v63 = vadd.f32 %v432_v53, %v356_v52 }
 0x100   :  { %v476_v62 = vpop.f32.mrb[7].mxu0 }
 0x101   :  { %v369_v0 = vadd.f32 %v433_v55, %v357_v59  ;;  %v277_v1 = vadd.f32 %v474_v60, %v82_v38  ;;  %v477_v2 = vadd.f32 %v476_v62, %v475_v61 }
 0x103   :  { %v441_v4 = vpack.c.bf16 %v369_v0, %v368_v63  ;;  %v326_v5 = vadd.f32 %v488_v33, %v277_v1  ;;  %v280_v6 = vadd.f32 %v477_v2, %v87_v44 }
 0x105   :  { %442 = vst [vmem:[%s665_s5] sm:$0xff] %v441_v4   ;;  %v358_v8 = vmax.f32 %v326_v5, %v349_v7  ;;  %v329_v10 = vadd.f32 %v489_v35, %v280_v6 }
 0x107   :  { %v359_v13 = vmax.f32 %v329_v10, %v354_v12  ;;  %v370_v14 = vadd.f32 %v436_v9, %v358_v8 }
 0x109   :  { %v371_v15 = vadd.f32 %v437_v11, %v359_v13 }
 0x10b   :  { %v446_v16 = vpack.c.bf16 %v371_v15, %v370_v14 }
 0x10d   :  { %449 = vst [vmem:[%s665_s5 + $0x8] sm:$0xff] %v446_v16  }

// kernel: fcn_forward.18
= control target key start
LH: loop header
LB: loop body
LE: loop exit
PB: predicated region body
PF: predicated region fallthrough
CT: control target
= control target key end

     0   :  { %v1157_v1 = vmov 0   ;;  %vm410_vm0 = vcmask 261120   ;;  %s1489_s1 = inlined_call_operand.vmem [shape: bf16[288,128], index: 1, kind: input, shape index: {}]   ;;  %s1490_s0 = inlined_call_operand.vmem [shape: bf16[128,288], index: 0, kind: input, shape index: {}]   ;;  %s1491_s2 = inlined_call_operand.vmem [shape: f32[128,1], index: 2, kind: input, shape index: {}]   ;;  %s1492_s3 = inlined_call_operand.vmem [shape: f32[128,1], index: 3, kind: input, shape index: {}]   ;;  %s1493_s4 = inlined_call_operand.vmem [shape: bf16[128,128], index: 4, kind: output, shape index: {}]  }
   0x1   :  { %v1107_v0 = vld [vmem:[%s1489_s1 + $0x40] sm:$0xff]   ;;  %1066 = vset.pattern.permute.xlu1 %v1157_v1  ;;  %1065 = vset.pattern.permute.xlu0 %v1157_v1  ;;  %v1109_v3 = vld [vmem:[%s1489_s1 + $0x48] sm:$0xff]   ;;  %v1111_v5 = vld [vmem:[%s1489_s1 + $0x50] sm:$0xff]  }
   0x2   :  { %v1108_v2 = vld [vmem:[%s1489_s1] sm:$0xff]   ;;  %954 = vmatprep.subr.bf16.mxu0 %v1107_v0  ;;  %1048 = vmatprep.subr.bf16.mxu1 %v1107_v0  ;;  %v1110_v4 = vld [vmem:[%s1489_s1 + $0x8] sm:$0xff]   ;;  %v1112_v6 = vld [vmem:[%s1489_s1 + $0x10] sm:$0xff]  }
   0x3   :  { %955 = vmatpush3.bf16.msra.mxu0 %v1108_v2  ;;  %1056 = vmatpush3.bf16.msra.mxu1 %v1108_v2  ;;  %v1113_v7 = vld [vmem:[%s1489_s1 + $0x58] sm:$0xff]   ;;  %v1115_v9 = vld [vmem:[%s1489_s1 + $0x60] sm:$0xff]   ;;  %v1117_v11 = vld [vmem:[%s1489_s1 + $0x68] sm:$0xff]  }
   0x4   :  { %956 = vmatprep.subr.bf16.mxu0 %v1109_v3  ;;  %1049 = vmatprep.subr.bf16.mxu1 %v1109_v3  ;;  %v1114_v8 = vld [vmem:[%s1489_s1 + $0x18] sm:$0xff]   ;;  %v1116_v10 = vld [vmem:[%s1489_s1 + $0x20] sm:$0xff]   ;;  %v1118_v14 = vld [vmem:[%s1489_s1 + $0x28] sm:$0xff]  }
   0x5   :  { %v1125_v12 = vld [vmem:[%s1490_s0 + $0x4] ss:$12 sps:$4 sm:$0xff]   ;;  %v1128_v13 = vld [vmem:[%s1490_s0 + $0x94] ss:$12 sps:$4 sm:$0xff]   ;;  %v1121_v17 = vld [vmem:[%s1489_s1 + $0x78] sm:$0xff]  }
   0x6   :  { %v1119_v15 = vld [vmem:[%s1489_s1 + $0x70] sm:$0xff]   ;;  %467 = vmatprep.mubr.bf16.mxu0 %v1125_v12  ;;  %515 = vmatprep.mubr.bf16.mxu1 %v1128_v13  ;;  %v1122_v18 = vld [vmem:[%s1489_s1 + $0x38] sm:$0xff]   ;;  %v1123_v19 = vld [vmem:[%s1490_s0] ss:$12 sps:$4 sm:$0xff]  }
   0x7   :  { %957 = vmatpush3.bf16.msra.mxu0 %v1110_v4  ;;  %1057 = vmatpush3.bf16.msra.mxu1 %v1110_v4  ;;  %v1120_v16 = vld [vmem:[%s1489_s1 + $0x30] sm:$0xff]   ;;  %v1129_v20 = vld [vmem:[%s1489_s1 + $0x80] sm:$0xff]   ;;  %v1130_v22 = vld [vmem:[%s1490_s0 + $0x1c] ss:$12 sps:$4 sm:$0xff]  }
   0x8   :  { %958 = vmatprep.subr.bf16.mxu0 %v1111_v5  ;;  %1050 = vmatprep.subr.bf16.mxu1 %v1111_v5  ;;  %v1126_v21 = vld [vmem:[%s1490_s0 + $0x90] ss:$12 sps:$4 sm:$0xff]   ;;  %v1132_v23 = vld [vmem:[%s1490_s0 + $0xac] ss:$12 sps:$4 sm:$0xff]   ;;  %v86_v26 = vld [vmem:[%s1491_s2] sm:$0xff] }
   0x9   :  { %v1136_v24 = vld [vmem:[%s1489_s1 + $0x88] sm:$0xff]   ;;  %v88_v25 = vld [vmem:[%s1491_s2 + $0x10] sm:$0xff]  ;;  %v1134_v27 = vld [vmem:[%s1490_s0 + $0x18] ss:$12 sps:$4 sm:$0xff]   ;;  %104 = vperm.xlu0 %1065, %v86_v26  }
   0xa   :  { %114 = vperm.xlu1 %1066, %v88_v25   ;;  %v1135_v28 = vld [vmem:[%s1490_s0 + $0xa8] ss:$12 sps:$4 sm:$0xff]   ;;  %v89_v29 = vld [vmem:[%s1491_s2 + $0x18] sm:$0xff]  ;;  %v90_v34 = vld [vmem:[%s1491_s2 + $0x20] sm:$0xff] }
   0xb   :  { %959 = vmatpush3.bf16.msra.mxu0 %v1112_v6  ;;  %1058 = vmatpush3.bf16.msra.mxu1 %v1112_v6  ;;  %v1137_v30 = vld [vmem:[%s1490_s0 + $0x34] ss:$12 sps:$4 sm:$0xff]   ;;  %v87_v32 = vld [vmem:[%s1491_s2 + $0x8] sm:$0xff]  ;;  %v1140_v35 = vld [vmem:[%s1490_s0 + $0x30] ss:$12 sps:$4 sm:$0xff]  }
   0xc   :  { %960 = vmatprep.subr.bf16.mxu0 %v1113_v7  ;;  %1051 = vmatprep.subr.bf16.mxu1 %v1113_v7  ;;  %v1139_v31 = vld [vmem:[%s1490_s0 + $0x8] ss:$12 sps:$4 sm:$0xff]   ;;  %v1141_v36 = vld [vmem:[%s1490_s0 + $0x20] ss:$12 sps:$4 sm:$0xff]   ;;  %v93_v37 = vld [vmem:[%s1491_s2 + $0x38] sm:$0xff] }
   0xd   :  { %v91_v33 = vld [vmem:[%s1491_s2 + $0x28] sm:$0xff]  ;;  %109 = vperm.xlu0 %1065, %v87_v32   ;;  %v1144_v39 = vld [vmem:[%s1490_s0 + $0x38] ss:$12 sps:$4 sm:$0xff]   ;;  %v92_v40 = vld [vmem:[%s1491_s2 + $0x30] sm:$0xff] }
   0xe   :  { %119 = vperm.xlu1 %1066, %v89_v29   ;;  %v1142_v38 = vld [vmem:[%s1490_s0 + $0x4c] ss:$12 sps:$4 sm:$0xff]   ;;  %v94_v42 = vld [vmem:[%s1491_s2 + $0x40] sm:$0xff]  ;;  %v1145_v43 = vld [vmem:[%s1490_s0 + $0x48] ss:$12 sps:$4 sm:$0xff]  }
   0xf   :  { %961 = vmatpush3.bf16.msra.mxu0 %v1114_v8  ;;  %1059 = vmatpush3.bf16.msra.mxu1 %v1114_v8  ;;  %v95_v41 = vld [vmem:[%s1491_s2 + $0x48] sm:$0xff]  ;;  %v1146_v44 = vld [vmem:[%s1490_s0 + $0x50] ss:$12 sps:$4 sm:$0xff]   ;;  %v98_v52 = vld [vmem:[%s1491_s2 + $0x60] sm:$0xff] }
  0x10   :  { %962 = vmatprep.subr.bf16.mxu0 %v1115_v9  ;;  %1052 = vmatprep.subr.bf16.mxu1 %v1115_v9  ;;  %v97_v45 = vld [vmem:[%s1491_s2 + $0x58] sm:$0xff]  ;;  %v1147_v46 = vld [vmem:[%s1490_s0 + $0x64] ss:$12 sps:$4 sm:$0xff]   ;;  %v1149_v47 = vld [vmem:[%s1490_s0 + $0x68] ss:$12 sps:$4 sm:$0xff]  }
  0x11   :  { %124 = vperm.xlu0 %1065, %v90_v34   ;;  %v96_v48 = vld [vmem:[%s1491_s2 + $0x50] sm:$0xff]  ;;  %v99_v49 = vld [vmem:[%s1491_s2 + $0x68] sm:$0xff]  ;;  %v101_v53 = vld [vmem:[%s1491_s2 + $0x78] sm:$0xff] }
  0x12   :  { %129 = vperm.xlu1 %1066, %v91_v33   ;;  %v1150_v50 = vld [vmem:[%s1490_s0 + $0x60] ss:$12 sps:$4 sm:$0xff]   ;;  %v631_v54 = vld [vmem:[%s1492_s3 + $0x10] sm:$0xff]  ;;  %v632_v55 = vld [vmem:[%s1492_s3 + $0x18] sm:$0xff] }
  0x13   :  { %963 = vmatpush3.bf16.msra.mxu0 %v1116_v10  ;;  %1060 = vmatpush3.bf16.msra.mxu1 %v1116_v10  ;;  %v1151_v51 = vld [vmem:[%s1490_s0 + $0x80] ss:$12 sps:$4 sm:$0xff]   ;;  %v1152_v56 = vld [vmem:[%s1490_s0 + $0x7c] ss:$12 sps:$4 sm:$0xff]   ;;  %v1154_v57 = vld [vmem:[%s1490_s0 + $0x98] ss:$12 sps:$4 sm:$0xff]   ;;  %v1072_v59 = vpack.i.bf16 %v632_v55, %v631_v54 }
  0x14   :  { %964 = vmatprep.subr.bf16.mxu0 %v1117_v11  ;;  %1053 = vmatprep.subr.bf16.mxu1 %v1117_v11  ;;  %v100_v58 = vld [vmem:[%s1491_s2 + $0x70] sm:$0xff]  ;;  %v629_v60 = vld [vmem:[%s1492_s3] sm:$0xff]  ;;  %v630_v61 = vld [vmem:[%s1492_s3 + $0x8] sm:$0xff] }
  0x15   :  { %134 = vperm.xlu0 %1065, %v92_v40   ;;  %v635_v62 = vld [vmem:[%s1492_s3 + $0x30] sm:$0xff]  ;;  %v636_v63 = vld [vmem:[%s1492_s3 + $0x38] sm:$0xff]  ;;  %v1067_v0 = vpack.i.bf16 %v630_v61, %v629_v60  ;;  %v633_v3 = vld [vmem:[%s1492_s3 + $0x20] sm:$0xff] }
  0x16   :  { %139 = vperm.xlu1 %1066, %v93_v37   ;;  %v1155_v1 = vld [vmem:[%s1490_s0 + $0x78] ss:$12 sps:$4 sm:$0xff]   ;;  %v1082_v2 = vpack.i.bf16 %v636_v63, %v635_v62  ;;  %v634_v4 = vld [vmem:[%s1492_s3 + $0x28] sm:$0xff]  ;;  %v1156_v5 = vld [vmem:[%s1490_s0 + $0xb0] ss:$12 sps:$4 sm:$0xff]  }
  0x17   :  { %965 = vmatpush3.bf16.msra.mxu0 %v1118_v14  ;;  %1061 = vmatpush3.bf16.msra.mxu1 %v1118_v14  ;;  %v639_v6 = vld [vmem:[%s1492_s3 + $0x50] sm:$0xff]  ;;  %v640_v7 = vld [vmem:[%s1492_s3 + $0x58] sm:$0xff]  ;;  %v1077_v8 = vpack.i.bf16 %v634_v4, %v633_v3  ;;  %v637_v10 = vld [vmem:[%s1492_s3 + $0x40] sm:$0xff] }
  0x18   :  { %966 = vmatprep.subr.bf16.mxu0 %v1119_v15  ;;  %1054 = vmatprep.subr.bf16.mxu1 %v1119_v15  ;;  %v1092_v9 = vpack.i.bf16 %v640_v7, %v639_v6  ;;  %v638_v11 = vld [vmem:[%s1492_s3 + $0x48] sm:$0xff]  ;;  %v643_v12 = vld [vmem:[%s1492_s3 + $0x70] sm:$0xff]  ;;  %v644_v13 = vld [vmem:[%s1492_s3 + $0x78] sm:$0xff] }
  0x19   :  { %144 = vperm.xlu0 %1065, %v94_v42   ;;  %v1087_v14 = vpack.i.bf16 %v638_v11, %v637_v10  ;;  %v1102_v15 = vpack.i.bf16 %v644_v13, %v643_v12 }
  0x1a   :  { %149 = vperm.xlu1 %1066, %v95_v41  }
  0x1b   :  { %967 = vmatpush3.bf16.msra.mxu0 %v1120_v16  ;;  %1062 = vmatpush3.bf16.msra.mxu1 %v1120_v16  ;;  %v641_v16 = vld [vmem:[%s1492_s3 + $0x60] sm:$0xff] }
  0x1c   :  { %968 = vmatprep.subr.bf16.mxu0 %v1121_v17  ;;  %1055 = vmatprep.subr.bf16.mxu1 %v1121_v17  ;;  %v642_v17 = vld [vmem:[%s1492_s3 + $0x68] sm:$0xff] }
  0x1d   :  { %154 = vperm.xlu0 %1065, %v96_v48  }
  0x1e   :  { %159 = vperm.xlu1 %1066, %v97_v45  }
  0x1f   :  { %969 = vmatpush3.bf16.msra.mxu0 %v1122_v18  ;;  %1063 = vmatpush3.bf16.msra.mxu1 %v1122_v18  ;;  %v1097_v18 = vpack.i.bf16 %v642_v17, %v641_v16 }
  0x20   :  { %1028 = vmatprep.subr.bf16.mxu1 %v1129_v20 }
  0x21   :  { %164 = vperm.xlu0 %1065, %v98_v52  }
  0x22   :  { %468 = vmatmul.mubr.bf16.vlgmr.msra.gmra.mrb[0].mxu0 %v1123_v19  ;;  %516 = vmatmul.mubr.bf16.vlgmr.msra.gmra.mrb[0].mxu1 %v1126_v21 }
  0x23   :  { %1029 = vmatpush3.bf16.msra.mxu1 %v1129_v20  ;;  %475 = vmatprep.mubr.bf16.mxu0 %v1130_v22 }
  0x24   :  { %523 = vmatprep.mubr.bf16.mxu1 %v1132_v23  ;;  %1030 = vmatprep.subr.bf16.mxu1 %v1136_v24 }
  0x25   :  { %169 = vperm.xlu1 %1066, %v99_v49   ;;  %174 = vperm.xlu0 %1065, %v100_v58  }
  0x27   :  { %1031 = vmatpush3.bf16.msra.mxu1 %v1136_v24 }
  0x29   :  { %179 = vperm.xlu1 %1066, %v101_v53   ;;  %1068 = vperm.xlu0 %1065, %v1067_v0  }
  0x2a   :  { %476 = vmatmul.mubr.bf16.gmra.mrb[4].mxu0 %v1134_v27  ;;  %524 = vmatmul.mubr.bf16.gmra.mrb[4].mxu1 %v1135_v28 }
  0x2b   :  { %483 = vmatprep.mubr.bf16.mxu0 %v1137_v30  ;;  %1032 = vmatprep.mubr.msk.bf16.mxu1 %vm410_vm0, %v1139_v31 }
  0x2d   :  { %1073 = vperm.xlu1 %1066, %v1072_v59   ;;  %1078 = vperm.xlu0 %1065, %v1077_v8  }
  0x31   :  { %1083 = vperm.xlu1 %1066, %v1082_v2   ;;  %1088 = vperm.xlu0 %1065, %v1087_v14  }
  0x32   :  { %484 = vmatmul.mubr.bf16.gmra.mrb[8].mxu0 %v1140_v35  ;;  %1033 = vmatmul.mubr.msk.bf16.vlgmr.msra.gmra.mrb[8].mxu1 %vm410_vm0, %v1141_v36 }
  0x33   :  { %491 = vmatprep.mubr.bf16.mxu0 %v1142_v38  ;;  %1036 = vmatprep.mubr.msk.bf16.mxu1 %vm410_vm0, %v1144_v39 }
  0x35   :  { %1093 = vperm.xlu1 %1066, %v1092_v9   ;;  %1098 = vperm.xlu0 %1065, %v1097_v18  }
  0x39   :  { %1103 = vperm.xlu1 %1066, %v1102_v15  }
  0x3a   :  { %492 = vmatmul.mubr.bf16.gmra.mrb[12].mxu0 %v1145_v43  ;;  %1037 = vmatmul.mubr.msk.bf16.gmra.mrb[12].mxu1 %vm410_vm0, %v1146_v44 }
  0x3b   :  { %499 = vmatprep.mubr.bf16.mxu0 %v1147_v46  ;;  %1040 = vmatprep.mubr.msk.bf16.mxu1 %vm410_vm0, %v1149_v47 }
  0x42   :  { %500 = vmatmul.mubr.bf16.gmra.mrb[16].mxu0 %v1150_v50  ;;  %1041 = vmatmul.mubr.msk.bf16.gmra.mrb[16].mxu1 %vm410_vm0, %v1151_v51 }
  0x43   :  { %507 = vmatprep.mubr.bf16.mxu0 %v1152_v56  ;;  %1044 = vmatprep.mubr.msk.bf16.mxu1 %vm410_vm0, %v1154_v57 }
  0x4a   :  { %508 = vmatmul.mubr.bf16.gmra.mrb[20].mxu0 %v1155_v1  ;;  %1045 = vmatmul.mubr.msk.bf16.gmra.mrb[20].mxu1 %vm410_vm0, %v1156_v5 }
  0x88   :  { %v105_v20 = vpop.permute.xlu0 %104 }
  0x89   :  { %v115_v19 = vpop.permute.xlu1 %114 }
  0x8c   :  { %v110_v22 = vpop.permute.xlu0 %109 }
  0x8d   :  { %v120_v21 = vpop.permute.xlu1 %119 }
  0x90   :  { %v1415_v24 = vpop.permute.xlu0 %124 }
  0x91   :  { %v1413_v23 = vpop.permute.xlu1 %129 }
  0x94   :  { %v1419_v26 = vpop.permute.xlu0 %134 }
  0x95   :  { %v1417_v25 = vpop.permute.xlu1 %139 }
  0x98   :  { %v1423_v28 = vpop.permute.xlu0 %144 }
  0x99   :  { %v1421_v27 = vpop.permute.xlu1 %149 }
  0x9c   :  { %v1427_v30 = vpop.permute.xlu0 %154 }
  0x9d   :  { %v1425_v29 = vpop.permute.xlu1 %159 }
  0xa0   :  { %v1431_v32 = vpop.permute.xlu0 %164 }
  0xa4   :  { %v1429_v31 = vpop.permute.xlu1 %169  ;;  %v1439_v46 = vpop.permute.xlu0 %174 }
  0xa8   :  { %v1437_v45 = vpop.permute.xlu1 %179  ;;  %v1069_v60 = vpop.permute.xlu0 %1068 }
  0xa9   :  { %v1071_v15 = vunpack.i.h.bf16 %v1069_v60  ;;  %v1070_v16 = vunpack.i.l.bf16 %v1069_v60 }
  0xac   :  { %v1074_v59 = vpop.permute.xlu1 %1073 }
  0xad   :  { %v1076_v10 = vunpack.i.h.bf16 %v1074_v59  ;;  %v1075_v11 = vunpack.i.l.bf16 %v1074_v59 }
  0xf5   :  { %v970_v33 = vpop.f32.mrb[0].mxu0  ;;  %v1006_v34 = vpop.f32.mrb[0].mxu1 }
  0xf6   :  { %v971_v35 = vpop.f32.mrb[1].mxu0  ;;  %v1007_v36 = vpop.f32.mrb[1].mxu1 }
  0xf7   :  { %v972_v37 = vadd.f32 %v971_v35, %v970_v33  ;;  %v1433_v38 = vadd.f32 %v1007_v36, %v1006_v34  ;;  %v973_v39 = vpop.f32.mrb[2].mxu0  ;;  %v1009_v40 = vpop.f32.mrb[2].mxu1 }
  0xf8   :  { %v974_v41 = vpop.f32.mrb[3].mxu0  ;;  %v1010_v42 = vpop.f32.mrb[3].mxu1 }
  0xf9   :  { %v975_v43 = vadd.f32 %v974_v41, %v973_v39  ;;  %v1435_v44 = vadd.f32 %v1010_v42, %v1009_v40  ;;  %v470_v0 = vadd.f32 %v972_v37, %v105_v20  ;;  %v1084_v35 = vpop.permute.xlu1 %1083 }
  0xfb   :  { %v473_v9 = vadd.f32 %v975_v43, %v110_v22 }
  0xfd   :  { %v976_v47 = vpop.f32.mrb[4].mxu0  ;;  %v1012_v48 = vpop.f32.mrb[4].mxu1 }
  0xfe   :  { %v977_v49 = vpop.f32.mrb[5].mxu0  ;;  %v1013_v50 = vpop.f32.mrb[5].mxu1 }
  0xff   :  { %v978_v51 = vadd.f32 %v977_v49, %v976_v47  ;;  %v1441_v52 = vadd.f32 %v1013_v50, %v1012_v48  ;;  %v979_v53 = vpop.f32.mrb[6].mxu0  ;;  %v1015_v54 = vpop.f32.mrb[6].mxu1 }
 0x100   :  { %v980_v55 = vpop.f32.mrb[7].mxu0  ;;  %v1016_v56 = vpop.f32.mrb[7].mxu1 }
 0x101   :  { %v981_v57 = vadd.f32 %v980_v55, %v979_v53  ;;  %v1443_v58 = vadd.f32 %v1016_v56, %v1015_v54  ;;  %v478_v61 = vadd.f32 %v978_v51, %v115_v19 }
 0x103   :  { %v481_v4 = vadd.f32 %v981_v57, %v120_v21  ;;  %v1079_v21 = vpop.permute.xlu0 %1078 }
 0x104   :  { %v1081_v51 = vunpack.i.h.bf16 %v1079_v21 }
 0x105   :  { %v982_v62 = vpop.f32.mrb[8].mxu0  ;;  %v1034_v63 = vpop.f32.mrb[8].mxu1 }
 0x106   :  { %v575_v1 = vadd.f32 %v1034_v63, %v478_v61  ;;  %v983_v2 = vpop.f32.mrb[9].mxu0  ;;  %v566_v3 = vpop.f32.mrb[9].mxu1 }
 0x107   :  { %v984_v5 = vadd.f32 %v983_v2, %v982_v62  ;;  %v567_v6 = vadd.f32 %v566_v3, %v470_v0  ;;  %v985_v7 = vpop.f32.mrb[10].mxu0  ;;  %v1035_v8 = vpop.f32.mrb[10].mxu1  ;;  %v1085_v2 = vunpack.i.l.bf16 %v1084_v35 }
 0x108   :  { %v578_v12 = vadd.f32 %v1035_v8, %v481_v4  ;;  %v986_v13 = vpop.f32.mrb[11].mxu0  ;;  %v569_v14 = vpop.f32.mrb[11].mxu1  ;;  %v727_v19 = vmax.f32 %v575_v1, %v1075_v11  ;;  %v1086_v1 = vunpack.i.h.bf16 %v1084_v35 }
 0x109   :  { %v987_v17 = vadd.f32 %v986_v13, %v985_v7  ;;  %v570_v18 = vadd.f32 %v569_v14, %v473_v9  ;;  %v725_v33 = vmax.f32 %v567_v6, %v1070_v16  ;;  %v486_v22 = vadd.f32 %v984_v5, %v1415_v24  ;;  %v1455_v63 = vpop.permute.xlu1 %1093  ;;  %v1089_v0 = vpop.permute.xlu0 %1088 }
 0x10a   :  { %v728_v20 = vmax.f32 %v578_v12, %v1076_v10  ;;  %v1080_v24 = vunpack.i.l.bf16 %v1079_v21 }
 0x10b   :  { %v726_v34 = vmax.f32 %v570_v18, %v1071_v15  ;;  %v489_v50 = vadd.f32 %v987_v17, %v1413_v23 }
 0x10c   :  { %v915_v36 = vpack.c.bf16 %v728_v20, %v727_v19  ;;  %v526_v20 = vadd.f32 %v1441_v52, %v1439_v46 }
 0x10d   :  { %v910_v37 = vpack.c.bf16 %v726_v34, %v725_v33  ;;  %v988_v39 = vpop.f32.mrb[12].mxu0  ;;  %v1038_v40 = vpop.f32.mrb[12].mxu1  ;;  %v1091_v33 = vunpack.i.h.bf16 %v1089_v0  ;;  %v1090_v34 = vunpack.i.l.bf16 %v1089_v0 }
 0x10e   :  { %947 = vst [vmem:[%s1493_s4 + $0x8] sm:$0xff] %v915_v36   ;;  %v989_v41 = vpop.f32.mrb[13].mxu0  ;;  %v582_v42 = vpop.f32.mrb[13].mxu1 }
 0x10f   :  { %911 = vst [vmem:[%s1493_s4] sm:$0xff] %v910_v37   ;;  %v990_v43 = vadd.f32 %v989_v41, %v988_v39  ;;  %v583_v47 = vadd.f32 %v582_v42, %v486_v22  ;;  %v991_v48 = vpop.f32.mrb[14].mxu0  ;;  %v1039_v49 = vpop.f32.mrb[14].mxu1  ;;  %v529_v22 = vadd.f32 %v1443_v58, %v1437_v45 }
 0x110   :  { %v992_v53 = vpop.f32.mrb[15].mxu0  ;;  %v585_v54 = vpop.f32.mrb[15].mxu1 }
 0x111   :  { %v494_v55 = vadd.f32 %v990_v43, %v1419_v26  ;;  %v993_v56 = vadd.f32 %v992_v53, %v991_v48  ;;  %v586_v57 = vadd.f32 %v585_v54, %v489_v50  ;;  %v729_v60 = vmax.f32 %v583_v47, %v1080_v24  ;;  %v1104_v18 = vpop.permute.xlu1 %1103  ;;  %v1099_v19 = vpop.permute.xlu0 %1098 }
 0x112   :  { %v1106_v52 = vunpack.i.h.bf16 %v1104_v18  ;;  %v1105_v48 = vunpack.i.l.bf16 %v1104_v18  ;;  %v1100_v45 = vunpack.i.l.bf16 %v1099_v19 }
 0x113   :  { %v591_v59 = vadd.f32 %v1038_v40, %v494_v55  ;;  %v497_v61 = vadd.f32 %v993_v56, %v1417_v25  ;;  %v730_v62 = vmax.f32 %v586_v57, %v1081_v51  ;;  %v521_v51 = vadd.f32 %v1435_v44, %v1429_v31 }
 0x114   :  { %v1096_v44 = vunpack.i.h.bf16 %v1455_v63 }
 0x115   :  { %v594_v3 = vadd.f32 %v1039_v49, %v497_v61  ;;  %v920_v23 = vpack.c.bf16 %v730_v62, %v729_v60  ;;  %v994_v4 = vpop.f32.mrb[16].mxu0  ;;  %v1042_v5 = vpop.f32.mrb[16].mxu1  ;;  %v731_v8 = vmax.f32 %v591_v59, %v1085_v2  ;;  %v1095_v62 = vunpack.i.l.bf16 %v1455_v63 }
 0x116   :  { %v995_v6 = vpop.f32.mrb[17].mxu0  ;;  %v598_v7 = vpop.f32.mrb[17].mxu1 }
 0x117   :  { %v732_v26 = vmax.f32 %v594_v3, %v1086_v1  ;;  %948 = vst [vmem:[%s1493_s4 + $0x10] sm:$0xff] %v920_v23   ;;  %v996_v9 = vadd.f32 %v995_v6, %v994_v4  ;;  %v997_v25 = vpop.f32.mrb[18].mxu0  ;;  %v1043_v10 = vpop.f32.mrb[18].mxu1 }
 0x118   :  { %v998_v11 = vpop.f32.mrb[19].mxu0  ;;  %v601_v12 = vpop.f32.mrb[19].mxu1 }
 0x119   :  { %v925_v13 = vpack.c.bf16 %v732_v26, %v731_v8  ;;  %v502_v14 = vadd.f32 %v996_v9, %v1423_v28  ;;  %v999_v15 = vadd.f32 %v998_v11, %v997_v25  ;;  %v518_v28 = vadd.f32 %v1433_v38, %v1431_v32 }
 0x11a   :  { %v1101_v38 = vunpack.i.h.bf16 %v1099_v19 }
 0x11b   :  { %949 = vst [vmem:[%s1493_s4 + $0x18] sm:$0xff] %v925_v13   ;;  %v599_v16 = vadd.f32 %v598_v7, %v502_v14  ;;  %v505_v17 = vadd.f32 %v999_v15, %v1421_v27 }
 0x11d   :  { %v602_v35 = vadd.f32 %v601_v12, %v505_v17  ;;  %v1000_v21 = vpop.f32.mrb[20].mxu0  ;;  %v1046_v36 = vpop.f32.mrb[20].mxu1  ;;  %v733_v27 = vmax.f32 %v599_v16, %v1090_v34 }
 0x11e   :  { %v623_v37 = vadd.f32 %v1046_v36, %v526_v20  ;;  %v1001_v39 = vpop.f32.mrb[21].mxu0  ;;  %v614_v40 = vpop.f32.mrb[21].mxu1 }
 0x11f   :  { %v734_v41 = vmax.f32 %v602_v35, %v1091_v33  ;;  %v1002_v42 = vadd.f32 %v1001_v39, %v1000_v21  ;;  %v615_v43 = vadd.f32 %v614_v40, %v518_v28  ;;  %v1003_v47 = vpop.f32.mrb[22].mxu0  ;;  %v1047_v46 = vpop.f32.mrb[22].mxu1 }
 0x120   :  { %v626_v49 = vadd.f32 %v1047_v46, %v529_v22  ;;  %v1004_v50 = vpop.f32.mrb[23].mxu0  ;;  %v617_v32 = vpop.f32.mrb[23].mxu1  ;;  %v739_v58 = vmax.f32 %v623_v37, %v1105_v48 }
 0x121   :  { %v930_v53 = vpack.c.bf16 %v734_v41, %v733_v27  ;;  %v510_v54 = vadd.f32 %v1002_v42, %v1427_v30  ;;  %v1005_v24 = vadd.f32 %v1004_v50, %v1003_v47  ;;  %v618_v56 = vadd.f32 %v617_v32, %v521_v51 }
 0x122   :  { %v740_v55 = vmax.f32 %v626_v49, %v1106_v52  ;;  %v737_v60 = vmax.f32 %v615_v43, %v1100_v45 }
 0x123   :  { %950 = vst [vmem:[%s1493_s4 + $0x20] sm:$0xff] %v930_v53   ;;  %v607_v57 = vadd.f32 %v1042_v5, %v510_v54  ;;  %v513_v59 = vadd.f32 %v1005_v24, %v1425_v29  ;;  %v738_v31 = vmax.f32 %v618_v56, %v1101_v38 }
 0x124   :  { %v945_v61 = vpack.c.bf16 %v740_v55, %v739_v58 }
 0x125   :  { %v610_v30 = vadd.f32 %v1043_v10, %v513_v59  ;;  %v940_v0 = vpack.c.bf16 %v738_v31, %v737_v60  ;;  %v735_v1 = vmax.f32 %v607_v57, %v1095_v62 }
 0x126   :  { %953 = vst [vmem:[%s1493_s4 + $0x38] sm:$0xff] %v945_v61  }
 0x127   :  { %v736_v2 = vmax.f32 %v610_v30, %v1096_v44  ;;  %952 = vst [vmem:[%s1493_s4 + $0x30] sm:$0xff] %v940_v0  }
 0x129   :  { %v935_v29 = vpack.c.bf16 %v736_v2, %v735_v1 }
 0x12b   :  { %951 = vst [vmem:[%s1493_s4 + $0x28] sm:$0xff] %v935_v29  }

// kernel: fcn_forward.19
= control target key start
LH: loop header
LB: loop body
LE: loop exit
PB: predicated region body
PF: predicated region fallthrough
CT: control target
= control target key end

     0   :  { %v1110_v1 = vmov 0   ;;  %vm481_vm0 = vcmask 523264   ;;  %s1406_s1 = inlined_call_operand.vmem [shape: bf16[576,128], index: 1, kind: input, shape index: {}]   ;;  %s1407_s0 = inlined_call_operand.vmem [shape: bf16[64,576], index: 0, kind: input, shape index: {}]   ;;  %s1408_s2 = inlined_call_operand.vmem [shape: f32[64,1], index: 2, kind: input, shape index: {}]   ;;  %s1409_s3 = inlined_call_operand.vmem [shape: f32[64,1], index: 3, kind: input, shape index: {}]   ;;  %s1410_s4 = inlined_call_operand.vmem [shape: bf16[64,128], index: 4, kind: input, shape index: {}]   ;;  %s1411_s5 = inlined_call_operand.vmem [shape: bf16[64,128], index: 5, kind: output, shape index: {}]  }
   0x1   :  { %v1046_v0 = vld [vmem:[%s1406_s1 + $0x40] sm:$0xff]   ;;  %1045 = vset.pattern.permute.xlu1 %v1110_v1  ;;  %1044 = vset.pattern.permute.xlu0 %v1110_v1  ;;  %v1050_v5 = vld [vmem:[%s1406_s1 + $0x48] sm:$0xff]   ;;  %v1054_v9 = vld [vmem:[%s1406_s1 + $0x50] sm:$0xff]  }
   0x2   :  { %v1047_v2 = vld [vmem:[%s1406_s1 + $0xc0] sm:$0xff]   ;;  %931 = vmatprep.subr.bf16.mxu0 %v1046_v0  ;;  %v1051_v6 = vld [vmem:[%s1406_s1 + $0xc8] sm:$0xff]   ;;  %v1055_v10 = vld [vmem:[%s1406_s1 + $0xd0] sm:$0xff]  }
   0x3   :  { %v1048_v3 = vld [vmem:[%s1406_s1] sm:$0xff]   ;;  %971 = vmatprep.subr.bf16.mxu1 %v1047_v2  ;;  %v1052_v7 = vld [vmem:[%s1406_s1 + $0x8] sm:$0xff]   ;;  %v1056_v11 = vld [vmem:[%s1406_s1 + $0x10] sm:$0xff]  }
   0x4   :  { %v1049_v4 = vld [vmem:[%s1406_s1 + $0x80] sm:$0xff]   ;;  %932 = vmatpush3.bf16.msra.mxu0 %v1048_v3  ;;  %v1053_v8 = vld [vmem:[%s1406_s1 + $0x88] sm:$0xff]   ;;  %v1057_v12 = vld [vmem:[%s1406_s1 + $0x90] sm:$0xff]  }
   0x5   :  { %972 = vmatpush3.bf16.msra.mxu1 %v1049_v4  ;;  %933 = vmatprep.subr.bf16.mxu0 %v1050_v5  ;;  %v1058_v13 = vld [vmem:[%s1406_s1 + $0x58] sm:$0xff]   ;;  %v1062_v17 = vld [vmem:[%s1406_s1 + $0x60] sm:$0xff]   ;;  %v1066_v21 = vld [vmem:[%s1406_s1 + $0x68] sm:$0xff]  }
   0x6   :  { %973 = vmatprep.subr.bf16.mxu1 %v1051_v6  ;;  %v1059_v14 = vld [vmem:[%s1406_s1 + $0xd8] sm:$0xff]   ;;  %v1063_v18 = vld [vmem:[%s1406_s1 + $0xe0] sm:$0xff]   ;;  %v1067_v22 = vld [vmem:[%s1406_s1 + $0xe8] sm:$0xff]  }
   0x7   :  { %v1060_v15 = vld [vmem:[%s1406_s1 + $0x18] sm:$0xff]   ;;  %v1064_v19 = vld [vmem:[%s1406_s1 + $0x20] sm:$0xff]   ;;  %v1068_v23 = vld [vmem:[%s1406_s1 + $0x28] sm:$0xff]  }
   0x8   :  { %934 = vmatpush3.bf16.msra.mxu0 %v1052_v7  ;;  %v1061_v16 = vld [vmem:[%s1406_s1 + $0x98] sm:$0xff]   ;;  %v1065_v20 = vld [vmem:[%s1406_s1 + $0xa0] sm:$0xff]   ;;  %v1069_v24 = vld [vmem:[%s1406_s1 + $0xa8] sm:$0xff]  }
   0x9   :  { %974 = vmatpush3.bf16.msra.mxu1 %v1053_v8  ;;  %935 = vmatprep.subr.bf16.mxu0 %v1054_v9  ;;  %v1070_v25 = vld [vmem:[%s1406_s1 + $0x70] sm:$0xff]   ;;  %v1074_v29 = vld [vmem:[%s1406_s1 + $0x78] sm:$0xff]   ;;  %v1083_v36 = vld [vmem:[%s1407_s0 + $0xc] ss:$20 sps:$4 sm:$0xff]  }
   0xa   :  { %975 = vmatprep.subr.bf16.mxu1 %v1055_v10  ;;  %v1071_v26 = vld [vmem:[%s1406_s1 + $0xf0] sm:$0xff]   ;;  %v1075_v30 = vld [vmem:[%s1406_s1 + $0xf8] sm:$0xff]   ;;  %v1084_v37 = vld [vmem:[%s1406_s1 + $0x100] sm:$0xff]   ;;  %591 = vmatprep.mubr.bf16.mxu1 %v1083_v36 }
   0xb   :  { %v1072_v27 = vld [vmem:[%s1406_s1 + $0x30] sm:$0xff]   ;;  %v1076_v31 = vld [vmem:[%s1406_s1 + $0x38] sm:$0xff]   ;;  %v1085_v38 = vld [vmem:[%s1407_s0 + $0x2c] ss:$20 sps:$4 sm:$0xff]  }
   0xc   :  { %936 = vmatpush3.bf16.msra.mxu0 %v1056_v11  ;;  %v1073_v28 = vld [vmem:[%s1406_s1 + $0xb0] sm:$0xff]   ;;  %v1077_v32 = vld [vmem:[%s1406_s1 + $0xb8] sm:$0xff]   ;;  %v1091_v40 = vld [vmem:[%s1406_s1 + $0x108] sm:$0xff]  }
   0xd   :  { %976 = vmatpush3.bf16.msra.mxu1 %v1057_v12  ;;  %937 = vmatprep.subr.bf16.mxu0 %v1058_v13  ;;  %v1078_v33 = vld [vmem:[%s1407_s0] ss:$20 sps:$4 sm:$0xff]   ;;  %v1080_v34 = vld [vmem:[%s1407_s0 + $0x4] ss:$20 sps:$4 sm:$0xff]   ;;  %v1081_v35 = vld [vmem:[%s1407_s0 + $0x8] ss:$20 sps:$4 sm:$0xff]  }
   0xe   :  { %977 = vmatprep.subr.bf16.mxu1 %v1059_v14  ;;  %526 = vmatprep.mubr.bf16.mxu0 %v1080_v34  ;;  %v1087_v39 = vld [vmem:[%s1407_s0 + $0x34] ss:$20 sps:$4 sm:$0xff]   ;;  %v1090_v42 = vld [vmem:[%s1407_s0 + $0x30] ss:$20 sps:$4 sm:$0xff]   ;;  %v1105_v46 = vld [vmem:[%s1406_s1 + $0x118] sm:$0xff]  }
   0xf   :  { %v1089_v41 = vld [vmem:[%s1407_s0 + $0x28] ss:$20 sps:$4 sm:$0xff]   ;;  %v1098_v45 = vld [vmem:[%s1406_s1 + $0x110] sm:$0xff]   ;;  %v1097_v48 = vld [vmem:[%s1407_s0 + $0x58] ss:$20 sps:$4 sm:$0xff]  }
  0x10   :  { %938 = vmatpush3.bf16.msra.mxu0 %v1060_v15  ;;  %v1092_v43 = vld [vmem:[%s1407_s0 + $0x54] ss:$20 sps:$4 sm:$0xff]   ;;  %v1094_v44 = vld [vmem:[%s1407_s0 + $0x5c] ss:$20 sps:$4 sm:$0xff]   ;;  %v1101_v50 = vld [vmem:[%s1407_s0 + $0x84] ss:$20 sps:$4 sm:$0xff]  }
  0x11   :  { %978 = vmatpush3.bf16.msra.mxu1 %v1061_v16  ;;  %939 = vmatprep.subr.bf16.mxu0 %v1062_v17  ;;  %v1096_v47 = vld [vmem:[%s1407_s0 + $0x50] ss:$20 sps:$4 sm:$0xff]   ;;  %v120_v53 = vld [vmem:[%s1408_s2 + $0x18] sm:$0xff]  ;;  %v118_v54 = vld [vmem:[%s1408_s2 + $0x8] sm:$0xff] }
  0x12   :  { %979 = vmatprep.subr.bf16.mxu1 %v1063_v18  ;;  %v1099_v49 = vld [vmem:[%s1407_s0 + $0x7c] ss:$20 sps:$4 sm:$0xff]   ;;  %v117_v52 = vld [vmem:[%s1408_s2] sm:$0xff]  ;;  %v1103_v55 = vld [vmem:[%s1407_s0 + $0x78] ss:$20 sps:$4 sm:$0xff]  }
  0x13   :  { %v119_v51 = vld [vmem:[%s1408_s2 + $0x10] sm:$0xff]  ;;  %127 = vperm.xlu0 %1044, %v117_v52   ;;  %v122_v58 = vld [vmem:[%s1408_s2 + $0x28] sm:$0xff]  ;;  %v121_v60 = vld [vmem:[%s1408_s2 + $0x20] sm:$0xff] }
  0x14   :  { %940 = vmatpush3.bf16.msra.mxu0 %v1064_v19  ;;  %137 = vperm.xlu1 %1045, %v119_v51   ;;  %v1104_v56 = vld [vmem:[%s1407_s0 + $0x80] ss:$20 sps:$4 sm:$0xff]   ;;  %v1106_v57 = vld [vmem:[%s1407_s0 + $0x10] ss:$20 sps:$4 sm:$0xff]   ;;  %v124_v61 = vld [vmem:[%s1408_s2 + $0x38] sm:$0xff] }
  0x15   :  { %980 = vmatpush3.bf16.msra.mxu1 %v1065_v20  ;;  %941 = vmatprep.subr.bf16.mxu0 %v1066_v21  ;;  %v1107_v59 = vld [vmem:[%s1407_s0 + $0x60] ss:$20 sps:$4 sm:$0xff]   ;;  %v1108_v63 = vld [vmem:[%s1407_s0 + $0x38] ss:$20 sps:$4 sm:$0xff]   ;;  %v1109_v0 = vld [vmem:[%s1407_s0 + $0x88] ss:$20 sps:$4 sm:$0xff]  }
  0x16   :  { %981 = vmatprep.subr.bf16.mxu1 %v1067_v22  ;;  %v123_v62 = vld [vmem:[%s1408_s2 + $0x30] sm:$0xff]  ;;  %v690_v1 = vld [vmem:[%s1409_s3 + $0x8] sm:$0xff]  ;;  %v689_v2 = vld [vmem:[%s1409_s3] sm:$0xff] }
  0x17   :  { %132 = vperm.xlu0 %1044, %v118_v54   ;;  %v692_v3 = vld [vmem:[%s1409_s3 + $0x18] sm:$0xff]  ;;  %v691_v4 = vld [vmem:[%s1409_s3 + $0x10] sm:$0xff]  ;;  %v694_v5 = vld [vmem:[%s1409_s3 + $0x28] sm:$0xff] }
  0x18   :  { %942 = vmatpush3.bf16.msra.mxu0 %v1068_v23  ;;  %142 = vperm.xlu1 %1045, %v120_v53   ;;  %v693_v6 = vld [vmem:[%s1409_s3 + $0x20] sm:$0xff]  ;;  %v696_v7 = vld [vmem:[%s1409_s3 + $0x38] sm:$0xff]  ;;  %v695_v8 = vld [vmem:[%s1409_s3 + $0x30] sm:$0xff] }
  0x19   :  { %982 = vmatpush3.bf16.msra.mxu1 %v1069_v24  ;;  %943 = vmatprep.subr.bf16.mxu0 %v1070_v25 }
  0x1a   :  { %983 = vmatprep.subr.bf16.mxu1 %v1071_v26 }
  0x1b   :  { %147 = vperm.xlu0 %1044, %v121_v60  }
  0x1c   :  { %944 = vmatpush3.bf16.msra.mxu0 %v1072_v27  ;;  %152 = vperm.xlu1 %1045, %v122_v58  }
  0x1d   :  { %984 = vmatpush3.bf16.msra.mxu1 %v1073_v28  ;;  %945 = vmatprep.subr.bf16.mxu0 %v1074_v29 }
  0x1e   :  { %985 = vmatprep.subr.bf16.mxu1 %v1075_v30 }
  0x1f   :  { %157 = vperm.xlu0 %1044, %v123_v62  }
  0x20   :  { %946 = vmatpush3.bf16.msra.mxu0 %v1076_v31  ;;  %162 = vperm.xlu1 %1045, %v124_v61  }
  0x21   :  { %986 = vmatpush3.bf16.msra.mxu1 %v1077_v32  ;;  %1019 = vmatprep.subr.bf16.mxu0 %v1084_v37 }
  0x22   :  { %1035 = vmatprep.subr.bf16.mxu1 %v1084_v37 }
  0x23   :  { %527 = vmatmul.mubr.bf16.vlgmr.msra.gmra.mrb[0].mxu0 %v1078_v33  ;;  %699 = vperm.xlu0 %1044, %v689_v2  }
  0x24   :  { %592 = vmatmul.mubr.bf16.vlgmr.msra.gmra.mrb[0].mxu1 %v1081_v35  ;;  %1020 = vmatpush3.bf16.msra.mxu0 %v1084_v37 }
  0x25   :  { %1039 = vmatpush3.bf16.msra.mxu1 %v1084_v37  ;;  %534 = vmatprep.mubr.bf16.mxu0 %v1085_v38 }
  0x26   :  { %599 = vmatprep.mubr.bf16.mxu1 %v1087_v39  ;;  %1021 = vmatprep.subr.bf16.mxu0 %v1091_v40 }
  0x27   :  { %1036 = vmatprep.subr.bf16.mxu1 %v1091_v40  ;;  %704 = vperm.xlu1 %1045, %v690_v1  }
  0x28   :  { %1022 = vmatpush3.bf16.msra.mxu0 %v1091_v40  ;;  %709 = vperm.xlu0 %1044, %v691_v4  }
  0x29   :  { %1040 = vmatpush3.bf16.msra.mxu1 %v1091_v40  ;;  %1023 = vmatprep.subr.bf16.mxu0 %v1098_v45 }
  0x2a   :  { %1037 = vmatprep.subr.bf16.mxu1 %v1098_v45 }
  0x2b   :  { %535 = vmatmul.mubr.bf16.gmra.mrb[4].mxu0 %v1089_v41  ;;  %714 = vperm.xlu1 %1045, %v692_v3  }
  0x2c   :  { %600 = vmatmul.mubr.bf16.gmra.mrb[4].mxu1 %v1090_v42  ;;  %542 = vmatprep.mubr.bf16.mxu0 %v1092_v43 }
  0x2d   :  { %607 = vmatprep.mubr.bf16.mxu1 %v1094_v44  ;;  %1024 = vmatpush3.bf16.msra.mxu0 %v1098_v45 }
  0x2e   :  { %1041 = vmatpush3.bf16.msra.mxu1 %v1098_v45  ;;  %1025 = vmatprep.subr.bf16.mxu0 %v1105_v46 }
  0x2f   :  { %1038 = vmatprep.subr.bf16.mxu1 %v1105_v46  ;;  %724 = vperm.xlu1 %1045, %v694_v5  }
  0x30   :  { %719 = vperm.xlu0 %1044, %v693_v6  }
  0x31   :  { %1026 = vmatpush3.bf16.msra.mxu0 %v1105_v46 }
  0x32   :  { %1042 = vmatpush3.bf16.msra.mxu1 %v1105_v46 }
  0x33   :  { %543 = vmatmul.mubr.bf16.gmra.mrb[8].mxu0 %v1096_v47  ;;  %734 = vperm.xlu1 %1045, %v696_v7  }
  0x34   :  { %608 = vmatmul.mubr.bf16.gmra.mrb[8].mxu1 %v1097_v48  ;;  %550 = vmatprep.mubr.bf16.mxu0 %v1099_v49 }
  0x35   :  { %615 = vmatprep.mubr.bf16.mxu1 %v1101_v50  ;;  %729 = vperm.xlu0 %1044, %v695_v8  }
  0x3b   :  { %551 = vmatmul.mubr.bf16.gmra.mrb[12].mxu0 %v1103_v55 }
  0x3c   :  { %616 = vmatmul.mubr.bf16.gmra.mrb[12].mxu1 %v1104_v56  ;;  %1027 = vmatprep.mubr.msk.bf16.mxu0 %vm481_vm0, %v1106_v57 }
  0x3d   :  { %1031 = vmatprep.mubr.msk.bf16.mxu1 %vm481_vm0, %v1107_v59 }
  0x43   :  { %1028 = vmatmul.mubr.msk.bf16.vlgmr.msra.gmra.mrb[16].mxu0 %vm481_vm0, %v1108_v63 }
  0x44   :  { %1032 = vmatmul.mubr.msk.bf16.vlgmr.msra.gmra.mrb[16].mxu1 %vm481_vm0, %v1109_v0 }
  0x92   :  { %v128_v9 = vpop.permute.xlu0 %127 }
  0x93   :  { %v138_v10 = vpop.permute.xlu1 %137 }
  0x96   :  { %v133_v11 = vpop.permute.xlu0 %132 }
  0x97   :  { %v143_v12 = vpop.permute.xlu1 %142 }
  0x9a   :  { %v148_v13 = vpop.permute.xlu0 %147 }
  0x9b   :  { %v153_v14 = vpop.permute.xlu1 %152 }
  0x9e   :  { %v1361_v15 = vpop.permute.xlu0 %157 }
  0x9f   :  { %v163_v31 = vpop.permute.xlu1 %162 }
  0xa2   :  { %v1365_v32 = vpop.permute.xlu0 %699 }
  0xa6   :  { %v1369_v49 = vpop.permute.xlu1 %704 }
  0xa7   :  { %v1371_v50 = vpop.permute.xlu0 %709 }
  0xaa   :  { %v715_v3 = vpop.permute.xlu1 %714 }
  0xaf   :  { %v1373_v4 = vpop.permute.xlu0 %719 }
  0xf6   :  { %v947_v16 = vpop.f32.mrb[0].mxu0 }
  0xf7   :  { %v987_v17 = vpop.f32.mrb[0].mxu1  ;;  %v948_v18 = vpop.f32.mrb[1].mxu0 }
  0xf8   :  { %v949_v19 = vadd.f32 %v948_v18, %v947_v16  ;;  %v988_v20 = vpop.f32.mrb[1].mxu1  ;;  %v950_v21 = vpop.f32.mrb[2].mxu0 }
  0xf9   :  { %v989_v22 = vadd.f32 %v988_v20, %v987_v17  ;;  %v990_v23 = vpop.f32.mrb[2].mxu1  ;;  %v951_v24 = vpop.f32.mrb[3].mxu0 }
  0xfa   :  { %v529_v25 = vadd.f32 %v949_v19, %v128_v9  ;;  %v952_v26 = vadd.f32 %v951_v24, %v950_v21  ;;  %v991_v27 = vpop.f32.mrb[3].mxu1  ;;  %v890_v24 = vld [vmem:[%s1410_s4] sm:$0xff]  }
  0xfb   :  { %v992_v28 = vadd.f32 %v991_v27, %v990_v23  ;;  %v927_v23 = vld [vmem:[%s1410_s4 + $0x18] sm:$0xff]  }
  0xfc   :  { %v532_v29 = vadd.f32 %v952_v26, %v133_v11  ;;  %v1363_v30 = vadd.f32 %v989_v22, %v529_v25  ;;  %v725_v25 = vpop.permute.xlu1 %724  ;;  %v730_v26 = vpop.permute.xlu0 %729 }
  0xfe   :  { %v953_v33 = vpop.f32.mrb[4].mxu0  ;;  %v1367_v34 = vadd.f32 %v992_v28, %v532_v29 }
  0xff   :  { %v993_v35 = vpop.f32.mrb[4].mxu1  ;;  %v954_v36 = vpop.f32.mrb[5].mxu0 }
 0x100   :  { %v955_v37 = vadd.f32 %v954_v36, %v953_v33  ;;  %v994_v38 = vpop.f32.mrb[5].mxu1  ;;  %v956_v39 = vpop.f32.mrb[6].mxu0 }
 0x101   :  { %v995_v40 = vadd.f32 %v994_v38, %v993_v35  ;;  %v996_v41 = vpop.f32.mrb[6].mxu1  ;;  %v957_v42 = vpop.f32.mrb[7].mxu0  ;;  %v903_v35 = vunpack.c.l.bf16 %v927_v23 }
 0x102   :  { %v537_v43 = vadd.f32 %v955_v37, %v138_v10  ;;  %v958_v44 = vadd.f32 %v957_v42, %v956_v39  ;;  %v997_v45 = vpop.f32.mrb[7].mxu1  ;;  %v891_v37 = vunpack.c.l.bf16 %v890_v24 }
 0x103   :  { %v998_v46 = vadd.f32 %v997_v45, %v996_v41 }
 0x104   :  { %v540_v47 = vadd.f32 %v958_v44, %v143_v12  ;;  %v602_v48 = vadd.f32 %v995_v40, %v537_v43  ;;  %v904_v44 = vunpack.c.h.bf16 %v927_v23 }
 0x106   :  { %v959_v51 = vpop.f32.mrb[8].mxu0  ;;  %v605_v52 = vadd.f32 %v998_v46, %v540_v47 }
 0x107   :  { %v999_v53 = vpop.f32.mrb[8].mxu1  ;;  %v960_v54 = vpop.f32.mrb[9].mxu0 }
 0x108   :  { %v961_v55 = vadd.f32 %v960_v54, %v959_v51  ;;  %v1000_v56 = vpop.f32.mrb[9].mxu1  ;;  %v962_v57 = vpop.f32.mrb[10].mxu0  ;;  %v892_v54 = vunpack.c.h.bf16 %v890_v24 }
 0x109   :  { %v1001_v58 = vadd.f32 %v1000_v56, %v999_v53  ;;  %v1002_v59 = vpop.f32.mrb[10].mxu1  ;;  %v963_v60 = vpop.f32.mrb[11].mxu0 }
 0x10a   :  { %v545_v61 = vadd.f32 %v961_v55, %v148_v13  ;;  %v964_v62 = vadd.f32 %v963_v60, %v962_v57  ;;  %v1003_v63 = vpop.f32.mrb[11].mxu1 }
 0x10b   :  { %v1004_v0 = vadd.f32 %v1003_v63, %v1002_v59  ;;  %v735_v59 = vpop.permute.xlu1 %734 }
 0x10c   :  { %v548_v1 = vadd.f32 %v964_v62, %v153_v14  ;;  %v610_v2 = vadd.f32 %v1001_v58, %v545_v61  ;;  %v925_v14 = vld [vmem:[%s1410_s4 + $0x8] sm:$0xff]  }
 0x10d   :  { %v895_v28 = vunpack.c.l.bf16 %v925_v14  ;;  %v896_v43 = vunpack.c.h.bf16 %v925_v14 }
 0x10e   :  { %v965_v5 = vpop.f32.mrb[12].mxu0  ;;  %v613_v6 = vadd.f32 %v1004_v0, %v548_v1 }
 0x10f   :  { %v1005_v7 = vpop.f32.mrb[12].mxu1  ;;  %v966_v8 = vpop.f32.mrb[13].mxu0 }
 0x110   :  { %v967_v9 = vadd.f32 %v966_v8, %v965_v5  ;;  %v1006_v10 = vpop.f32.mrb[13].mxu1  ;;  %v968_v11 = vpop.f32.mrb[14].mxu0 }
 0x111   :  { %v1007_v12 = vadd.f32 %v1006_v10, %v1005_v7  ;;  %v1008_v16 = vpop.f32.mrb[14].mxu1  ;;  %v969_v17 = vpop.f32.mrb[15].mxu0 }
 0x112   :  { %v553_v13 = vadd.f32 %v967_v9, %v1361_v15  ;;  %v970_v18 = vadd.f32 %v969_v17, %v968_v11  ;;  %v1009_v19 = vpop.f32.mrb[15].mxu1  ;;  %v926_v15 = vld [vmem:[%s1410_s4 + $0x10] sm:$0xff]  }
 0x113   :  { %v1010_v20 = vadd.f32 %v1009_v19, %v1008_v16  ;;  %v899_v38 = vunpack.c.l.bf16 %v926_v15  ;;  %v900_v62 = vunpack.c.h.bf16 %v926_v15 }
 0x114   :  { %v556_v21 = vadd.f32 %v970_v18, %v163_v31  ;;  %v618_v22 = vadd.f32 %v1007_v12, %v553_v13 }
 0x116   :  { %v1029_v27 = vpop.f32.mrb[16].mxu0  ;;  %v621_v29 = vadd.f32 %v1010_v20, %v556_v21 }
 0x117   :  { %v667_v33 = vadd.f32 %v1029_v27, %v602_v48  ;;  %v1033_v31 = vpop.f32.mrb[16].mxu1  ;;  %v658_v36 = vpop.f32.mrb[17].mxu0 }
 0x118   :  { %v683_v39 = vadd.f32 %v1033_v31, %v618_v22  ;;  %v659_v40 = vadd.f32 %v658_v36, %v1363_v30  ;;  %v674_v41 = vpop.f32.mrb[17].mxu1  ;;  %v1030_v42 = vpop.f32.mrb[18].mxu0 }
 0x119   :  { %v739_v45 = vmax.f32 %v667_v33, %v1371_v50  ;;  %v675_v46 = vadd.f32 %v674_v41, %v610_v2  ;;  %v670_v47 = vadd.f32 %v1030_v42, %v605_v52  ;;  %v1034_v51 = vpop.f32.mrb[18].mxu1  ;;  %v661_v53 = vpop.f32.mrb[19].mxu0 }
 0x11a   :  { %v743_v48 = vmax.f32 %v683_v39, %v730_v26  ;;  %v737_v55 = vmax.f32 %v659_v40, %v1365_v32  ;;  %v686_v56 = vadd.f32 %v1034_v51, %v621_v29  ;;  %v662_v57 = vadd.f32 %v661_v53, %v1367_v34  ;;  %v677_v58 = vpop.f32.mrb[19].mxu1 }
 0x11b   :  { %v741_v30 = vmax.f32 %v675_v46, %v1373_v4  ;;  %v740_v60 = vmax.f32 %v670_v47, %v715_v3  ;;  %v678_v61 = vadd.f32 %v677_v58, %v613_v6  ;;  %v763_v52 = vadd.f32 %v895_v28, %v739_v45 }
 0x11c   :  { %v744_v63 = vmax.f32 %v686_v56, %v735_v59  ;;  %v738_v50 = vmax.f32 %v662_v57, %v1369_v49  ;;  %v767_v2 = vadd.f32 %v903_v35, %v743_v48  ;;  %v761_v5 = vadd.f32 %v891_v37, %v737_v55 }
 0x11d   :  { %v764_v0 = vadd.f32 %v896_v43, %v740_v60  ;;  %v742_v1 = vmax.f32 %v678_v61, %v725_v25  ;;  %v765_v8 = vadd.f32 %v899_v38, %v741_v30 }
 0x11e   :  { %v768_v7 = vadd.f32 %v904_v44, %v744_v63  ;;  %v762_v32 = vadd.f32 %v892_v54, %v738_v50 }
 0x11f   :  { %v913_v9 = vpack.c.bf16 %v764_v0, %v763_v52  ;;  %v766_v34 = vadd.f32 %v900_v62, %v742_v1 }
 0x120   :  { %v923_v10 = vpack.c.bf16 %v768_v7, %v767_v2  ;;  %v908_v11 = vpack.c.bf16 %v762_v32, %v761_v5 }
 0x121   :  { %928 = vst [vmem:[%s1411_s5 + $0x8] sm:$0xff] %v913_v9   ;;  %v918_v3 = vpack.c.bf16 %v766_v34, %v765_v8 }
 0x122   :  { %930 = vst [vmem:[%s1411_s5 + $0x18] sm:$0xff] %v923_v10   ;;  %909 = vst [vmem:[%s1411_s5] sm:$0xff] %v908_v11  }
 0x123   :  { %929 = vst [vmem:[%s1411_s5 + $0x10] sm:$0xff] %v918_v3  }

// kernel: fcn_forward.20
= control target key start
LH: loop header
LB: loop body
LE: loop exit
PB: predicated region body
PF: predicated region fallthrough
CT: control target
= control target key end

     0   :  { %v2736_v1 = vmov 0   ;;  %vm994_vm0 = vcmask 523264   ;;  %s3609_s1 = inlined_call_operand.vmem [shape: bf16[576,128], index: 1, kind: input, shape index: {}]   ;;  %s3610_s0 = inlined_call_operand.vmem [shape: bf16[256,576], index: 0, kind: input, shape index: {}]   ;;  %s3611_s2 = inlined_call_operand.vmem [shape: f32[256,1], index: 2, kind: input, shape index: {}]   ;;  %s3612_s3 = inlined_call_operand.vmem [shape: f32[256,1], index: 3, kind: input, shape index: {}]   ;;  %s3613_s4 = inlined_call_operand.vmem [shape: bf16[256,128], index: 4, kind: output, shape index: {}]  }
   0x1   :  { %v2588_v0 = vld [vmem:[%s3609_s1 + $0x40] sm:$0xff]   ;;  %2506 = vset.pattern.permute.xlu0 %v2736_v1  ;;  %2507 = vset.pattern.permute.xlu1 %v2736_v1  ;;  %v2590_v3 = vld [vmem:[%s3609_s1 + $0x48] sm:$0xff]   ;;  %v2592_v5 = vld [vmem:[%s3609_s1 + $0x50] sm:$0xff]  }
   0x2   :  { %v2589_v2 = vld [vmem:[%s3609_s1] sm:$0xff]   ;;  %2205 = vmatprep.subr.bf16.mxu0 %v2588_v0  ;;  %2489 = vmatprep.subr.bf16.mxu1 %v2588_v0  ;;  %v2591_v4 = vld [vmem:[%s3609_s1 + $0x8] sm:$0xff]   ;;  %v2593_v6 = vld [vmem:[%s3609_s1 + $0x10] sm:$0xff]  }
   0x3   :  { %2206 = vmatpush3.bf16.msra.mxu0 %v2589_v2  ;;  %2497 = vmatpush3.bf16.msra.mxu1 %v2589_v2  ;;  %v2594_v7 = vld [vmem:[%s3609_s1 + $0x58] sm:$0xff]   ;;  %v2596_v9 = vld [vmem:[%s3609_s1 + $0x60] sm:$0xff]   ;;  %v2598_v11 = vld [vmem:[%s3609_s1 + $0x68] sm:$0xff]  }
   0x4   :  { %2207 = vmatprep.subr.bf16.mxu0 %v2590_v3  ;;  %2490 = vmatprep.subr.bf16.mxu1 %v2590_v3  ;;  %v2595_v8 = vld [vmem:[%s3609_s1 + $0x18] sm:$0xff]   ;;  %v2597_v10 = vld [vmem:[%s3609_s1 + $0x20] sm:$0xff]   ;;  %v2599_v14 = vld [vmem:[%s3609_s1 + $0x28] sm:$0xff]  }
   0x5   :  { %v2606_v12 = vld [vmem:[%s3610_s0 + $0x4] ss:$20 sps:$4 sm:$0xff]   ;;  %v2600_v15 = vld [vmem:[%s3609_s1 + $0x70] sm:$0xff]   ;;  %v2612_v24 = vld [vmem:[%s3609_s1 + $0xc8] sm:$0xff]  }
   0x6   :  { %v2609_v13 = vld [vmem:[%s3610_s0 + $0x1e4] ss:$20 sps:$4 sm:$0xff]   ;;  %1075 = vmatprep.mubr.bf16.mxu0 %v2606_v12  ;;  %v2601_v16 = vld [vmem:[%s3609_s1 + $0x30] sm:$0xff]   ;;  %v2615_v25 = vld [vmem:[%s3610_s0 + $0x2c] ss:$20 sps:$4 sm:$0xff]  }
   0x7   :  { %2208 = vmatpush3.bf16.msra.mxu0 %v2591_v4  ;;  %2498 = vmatpush3.bf16.msra.mxu1 %v2591_v4  ;;  %v2602_v17 = vld [vmem:[%s3609_s1 + $0x78] sm:$0xff]   ;;  %v2610_v19 = vld [vmem:[%s3609_s1 + $0xc0] sm:$0xff]   ;;  %v2614_v27 = vld [vmem:[%s3609_s1 + $0x88] sm:$0xff]  }
   0x8   :  { %2209 = vmatprep.subr.bf16.mxu0 %v2592_v5  ;;  %2491 = vmatprep.subr.bf16.mxu1 %v2592_v5  ;;  %v2603_v18 = vld [vmem:[%s3609_s1 + $0x38] sm:$0xff]   ;;  %v2613_v20 = vld [vmem:[%s3609_s1 + $0x100] sm:$0xff]   ;;  %v2621_v29 = vld [vmem:[%s3609_s1 + $0xd0] sm:$0xff]  }
   0x9   :  { %1171 = vmatprep.mubr.bf16.mxu1 %v2609_v13  ;;  %v2604_v21 = vld [vmem:[%s3610_s0] ss:$20 sps:$4 sm:$0xff]   ;;  %v2619_v28 = vld [vmem:[%s3610_s0 + $0x28] ss:$20 sps:$4 sm:$0xff]   ;;  %v2629_v37 = vld [vmem:[%s3610_s0 + $0x50] ss:$20 sps:$4 sm:$0xff]  }
   0xa   :  { %v2607_v22 = vld [vmem:[%s3610_s0 + $0x1e0] ss:$20 sps:$4 sm:$0xff]   ;;  %v2620_v30 = vld [vmem:[%s3610_s0 + $0x208] ss:$20 sps:$4 sm:$0xff]   ;;  %v2630_v39 = vld [vmem:[%s3610_s0 + $0x230] ss:$20 sps:$4 sm:$0xff]  }
   0xb   :  { %2210 = vmatpush3.bf16.msra.mxu0 %v2593_v6  ;;  %2499 = vmatpush3.bf16.msra.mxu1 %v2593_v6  ;;  %v2611_v23 = vld [vmem:[%s3609_s1 + $0x80] sm:$0xff]   ;;  %v2622_v31 = vld [vmem:[%s3609_s1 + $0x90] sm:$0xff]   ;;  %v2623_v32 = vld [vmem:[%s3609_s1 + $0xd8] sm:$0xff]  }
   0xc   :  { %2211 = vmatprep.subr.bf16.mxu0 %v2594_v7  ;;  %2492 = vmatprep.subr.bf16.mxu1 %v2594_v7  ;;  %v2617_v26 = vld [vmem:[%s3610_s0 + $0x20c] ss:$20 sps:$4 sm:$0xff]   ;;  %v2625_v33 = vld [vmem:[%s3610_s0 + $0x54] ss:$20 sps:$4 sm:$0xff]   ;;  %v2624_v35 = vld [vmem:[%s3609_s1 + $0x98] sm:$0xff]  }
   0xd   :  { %v2627_v34 = vld [vmem:[%s3610_s0 + $0x234] ss:$20 sps:$4 sm:$0xff]   ;;  %v2631_v38 = vld [vmem:[%s3609_s1 + $0xe0] sm:$0xff]   ;;  %v2635_v42 = vld [vmem:[%s3610_s0 + $0x7c] ss:$20 sps:$4 sm:$0xff]  }
   0xe   :  { %v2644_v36 = vld [vmem:[%s3609_s1 + $0x108] sm:$0xff]   ;;  %v2632_v40 = vld [vmem:[%s3609_s1 + $0xa0] sm:$0xff]   ;;  %v2637_v44 = vld [vmem:[%s3610_s0 + $0x25c] ss:$20 sps:$4 sm:$0xff]  }
   0xf   :  { %2212 = vmatpush3.bf16.msra.mxu0 %v2595_v8  ;;  %2500 = vmatpush3.bf16.msra.mxu1 %v2595_v8  ;;  %v2633_v41 = vld [vmem:[%s3609_s1 + $0xe8] sm:$0xff]   ;;  %v186_v43 = vld [vmem:[%s3611_s2] sm:$0xff]  ;;  %v188_v45 = vld [vmem:[%s3611_s2 + $0x10] sm:$0xff] }
  0x10   :  { %2213 = vmatprep.subr.bf16.mxu0 %v2596_v9  ;;  %2493 = vmatprep.subr.bf16.mxu1 %v2596_v9  ;;  %v187_v46 = vld [vmem:[%s3611_s2 + $0x8] sm:$0xff]  ;;  %v2641_v48 = vld [vmem:[%s3609_s1 + $0xf0] sm:$0xff]   ;;  %v189_v52 = vld [vmem:[%s3611_s2 + $0x18] sm:$0xff] }
  0x11   :  { %220 = vperm.xlu0 %2506, %v186_v43   ;;  %v2634_v47 = vld [vmem:[%s3609_s1 + $0xa8] sm:$0xff]   ;;  %230 = vperm.xlu1 %2507, %v188_v45   ;;  %v2642_v51 = vld [vmem:[%s3609_s1 + $0xb0] sm:$0xff]   ;;  %v190_v53 = vld [vmem:[%s3611_s2 + $0x20] sm:$0xff] }
  0x12   :  { %v2639_v49 = vld [vmem:[%s3610_s0 + $0x78] ss:$20 sps:$4 sm:$0xff]   ;;  %v192_v58 = vld [vmem:[%s3611_s2 + $0x30] sm:$0xff]  ;;  %v2648_v61 = vld [vmem:[%s3610_s0 + $0x8] ss:$20 sps:$4 sm:$0xff]  }
  0x13   :  { %2214 = vmatpush3.bf16.msra.mxu0 %v2597_v10  ;;  %2501 = vmatpush3.bf16.msra.mxu1 %v2597_v10  ;;  %v2640_v50 = vld [vmem:[%s3610_s0 + $0x258] ss:$20 sps:$4 sm:$0xff]   ;;  %v2664_v59 = vld [vmem:[%s3609_s1 + $0x110] sm:$0xff]   ;;  %v194_v0 = vld [vmem:[%s3611_s2 + $0x40] sm:$0xff] }
  0x14   :  { %2215 = vmatprep.subr.bf16.mxu0 %v2598_v11  ;;  %2494 = vmatprep.subr.bf16.mxu1 %v2598_v11  ;;  %v2646_v54 = vld [vmem:[%s3610_s0 + $0xa4] ss:$20 sps:$4 sm:$0xff]   ;;  %v2650_v56 = vld [vmem:[%s3610_s0 + $0xc] ss:$20 sps:$4 sm:$0xff]   ;;  %v2654_v2 = vld [vmem:[%s3610_s0 + $0x34] ss:$20 sps:$4 sm:$0xff]  }
  0x15   :  { %225 = vperm.xlu0 %2506, %v187_v46   ;;  %v2643_v55 = vld [vmem:[%s3609_s1 + $0xf8] sm:$0xff]   ;;  %235 = vperm.xlu1 %2507, %v189_v52   ;;  %v191_v57 = vld [vmem:[%s3611_s2 + $0x28] sm:$0xff]  ;;  %v2651_v62 = vld [vmem:[%s3610_s0 + $0xa0] ss:$20 sps:$4 sm:$0xff]  }
  0x16   :  { %v2645_v60 = vld [vmem:[%s3609_s1 + $0xb8] sm:$0xff]   ;;  %v2652_v1 = vld [vmem:[%s3610_s0 + $0xcc] ss:$20 sps:$4 sm:$0xff]   ;;  %v196_v4 = vld [vmem:[%s3611_s2 + $0x50] sm:$0xff] }
  0x17   :  { %2216 = vmatpush3.bf16.msra.mxu0 %v2599_v14  ;;  %2502 = vmatpush3.bf16.msra.mxu1 %v2599_v14  ;;  %v193_v63 = vld [vmem:[%s3611_s2 + $0x38] sm:$0xff]  ;;  %v195_v3 = vld [vmem:[%s3611_s2 + $0x48] sm:$0xff]  ;;  %v2657_v7 = vld [vmem:[%s3610_s0 + $0x30] ss:$20 sps:$4 sm:$0xff]  }
  0x18   :  { %2217 = vmatprep.subr.bf16.mxu0 %v2600_v15  ;;  %2495 = vmatprep.subr.bf16.mxu1 %v2600_v15  ;;  %v2656_v5 = vld [vmem:[%s3610_s0 + $0xc8] ss:$20 sps:$4 sm:$0xff]   ;;  %v198_v9 = vld [vmem:[%s3611_s2 + $0x60] sm:$0xff]  ;;  %v200_v13 = vld [vmem:[%s3611_s2 + $0x70] sm:$0xff] }
  0x19   :  { %240 = vperm.xlu0 %2506, %v190_v53   ;;  %245 = vperm.xlu1 %2507, %v191_v57   ;;  %v2683_v6 = vld [vmem:[%s3609_s1 + $0x118] sm:$0xff]   ;;  %v2658_v10 = vld [vmem:[%s3610_s0 + $0xf4] ss:$20 sps:$4 sm:$0xff]   ;;  %v2662_v14 = vld [vmem:[%s3610_s0 + $0xf0] ss:$20 sps:$4 sm:$0xff]  }
  0x1a   :  { %v197_v8 = vld [vmem:[%s3611_s2 + $0x58] sm:$0xff]  ;;  %v199_v12 = vld [vmem:[%s3611_s2 + $0x68] sm:$0xff]  ;;  %v216_v45 = vld [vmem:[%s3611_s2 + $0xf0] sm:$0xff] }
  0x1b   :  { %2218 = vmatpush3.bf16.msra.mxu0 %v2601_v16  ;;  %2503 = vmatpush3.bf16.msra.mxu1 %v2601_v16  ;;  %v2660_v11 = vld [vmem:[%s3610_s0 + $0x5c] ss:$20 sps:$4 sm:$0xff]   ;;  %v2663_v15 = vld [vmem:[%s3610_s0 + $0x58] ss:$20 sps:$4 sm:$0xff]   ;;  %v1526_v46 = vld [vmem:[%s3612_s3] sm:$0xff] }
  0x1c   :  { %2219 = vmatprep.subr.bf16.mxu0 %v2602_v17  ;;  %2496 = vmatprep.subr.bf16.mxu1 %v2602_v17  ;;  %v2665_v16 = vld [vmem:[%s3610_s0 + $0x11c] ss:$20 sps:$4 sm:$0xff]   ;;  %v2692_v57 = vld [vmem:[%s3610_s0 + $0x124] ss:$20 sps:$4 sm:$0xff]  }
  0x1d   :  { %250 = vperm.xlu0 %2506, %v192_v58   ;;  %255 = vperm.xlu1 %2507, %v193_v63   ;;  %v201_v17 = vld [vmem:[%s3611_s2 + $0x78] sm:$0xff]  ;;  %v1528_v52 = vld [vmem:[%s3612_s3 + $0x10] sm:$0xff]  ;;  %v1535_v63 = vld [vmem:[%s3612_s3 + $0x48] sm:$0xff] }
  0x1e   :  { %v2686_v43 = vld [vmem:[%s3610_s0 + $0xfc] ss:$20 sps:$4 sm:$0xff]  }
  0x1f   :  { %2220 = vmatpush3.bf16.msra.mxu0 %v2603_v18  ;;  %2504 = vmatpush3.bf16.msra.mxu1 %v2603_v18  ;;  %v202_v18 = vld [vmem:[%s3611_s2 + $0x80] sm:$0xff] }
  0x20   :  { %2317 = vmatprep.subr.bf16.mxu1 %v2610_v19  ;;  %2449 = vmatprep.subr.bf16.mxu0 %v2613_v20  ;;  %v2667_v19 = vld [vmem:[%s3610_s0 + $0x84] ss:$20 sps:$4 sm:$0xff]  }
  0x21   :  { %260 = vperm.xlu0 %2506, %v194_v0   ;;  %265 = vperm.xlu1 %2507, %v195_v3   ;;  %v2694_v0 = vld [vmem:[%s3610_s0 + $0x1b8] ss:$20 sps:$4 sm:$0xff]   ;;  %v1536_v3 = vld [vmem:[%s3612_s3 + $0x50] sm:$0xff] }
  0x22   :  { %1076 = vmatmul.mubr.bf16.vlgmr.msra.gmra.mrb[0].mxu0 %v2604_v21  ;;  %1172 = vmatmul.mubr.bf16.vlgmr.msra.gmra.mrb[0].mxu1 %v2607_v22  ;;  %v204_v21 = vld [vmem:[%s3611_s2 + $0x90] sm:$0xff]  ;;  %v2669_v22 = vld [vmem:[%s3610_s0 + $0x118] ss:$20 sps:$4 sm:$0xff]  }
  0x23   :  { %2318 = vmatpush3.bf16.msra.mxu1 %v2611_v23  ;;  %2450 = vmatpush3.bf16.msra.mxu0 %v2613_v20  ;;  %v203_v20 = vld [vmem:[%s3611_s2 + $0x88] sm:$0xff]  ;;  %v2670_v23 = vld [vmem:[%s3610_s0 + $0x80] ss:$20 sps:$4 sm:$0xff]  }
  0x24   :  { %2319 = vmatprep.subr.bf16.mxu1 %v2612_v24  ;;  %1083 = vmatprep.mubr.bf16.mxu0 %v2615_v25  ;;  %v2671_v24 = vld [vmem:[%s3610_s0 + $0x144] ss:$20 sps:$4 sm:$0xff]  }
  0x25   :  { %1179 = vmatprep.mubr.bf16.mxu1 %v2617_v26  ;;  %2451 = vmatprep.subr.bf16.mxu0 %v2644_v36  ;;  %v205_v25 = vld [vmem:[%s3611_s2 + $0x98] sm:$0xff]  ;;  %v206_v26 = vld [vmem:[%s3611_s2 + $0xa0] sm:$0xff] }
  0x26   :  { %270 = vperm.xlu0 %2506, %v196_v4   ;;  %275 = vperm.xlu1 %2507, %v197_v8   ;;  %v2696_v8 = vld [vmem:[%s3610_s0 + $0x14c] ss:$20 sps:$4 sm:$0xff]  }
  0x27   :  { %2320 = vmatpush3.bf16.msra.mxu1 %v2614_v27  ;;  %2452 = vmatpush3.bf16.msra.mxu0 %v2644_v36  ;;  %v2673_v27 = vld [vmem:[%s3610_s0 + $0xac] ss:$20 sps:$4 sm:$0xff]  }
  0x28   :  { %2321 = vmatprep.subr.bf16.mxu1 %v2621_v29  ;;  %2453 = vmatprep.subr.bf16.mxu0 %v2664_v59  ;;  %v208_v29 = vld [vmem:[%s3611_s2 + $0xb0] sm:$0xff]  ;;  %v211_v36 = vld [vmem:[%s3611_s2 + $0xc8] sm:$0xff] }
  0x2a   :  { %1084 = vmatmul.mubr.bf16.gmra.mrb[4].mxu0 %v2619_v28  ;;  %1180 = vmatmul.mubr.bf16.gmra.mrb[4].mxu1 %v2620_v30  ;;  %v207_v28 = vld [vmem:[%s3611_s2 + $0xa8] sm:$0xff]  ;;  %v2675_v30 = vld [vmem:[%s3610_s0 + $0x140] ss:$20 sps:$4 sm:$0xff]  }
  0x2b   :  { %2322 = vmatpush3.bf16.msra.mxu1 %v2622_v31  ;;  %1091 = vmatprep.mubr.bf16.mxu0 %v2625_v33  ;;  %v2676_v31 = vld [vmem:[%s3610_s0 + $0xa8] ss:$20 sps:$4 sm:$0xff]   ;;  %v210_v33 = vld [vmem:[%s3611_s2 + $0xc0] sm:$0xff] }
  0x2c   :  { %2323 = vmatprep.subr.bf16.mxu1 %v2623_v32  ;;  %1187 = vmatprep.mubr.bf16.mxu1 %v2627_v34  ;;  %v209_v32 = vld [vmem:[%s3611_s2 + $0xb8] sm:$0xff]  ;;  %v2677_v34 = vld [vmem:[%s3610_s0 + $0x16c] ss:$20 sps:$4 sm:$0xff]  }
  0x2d   :  { %2454 = vmatpush3.bf16.msra.mxu0 %v2664_v59  ;;  %280 = vperm.xlu0 %2506, %v198_v9   ;;  %v1532_v59 = vld [vmem:[%s3612_s3 + $0x30] sm:$0xff] }
  0x2e   :  { %2455 = vmatprep.subr.bf16.mxu0 %v2683_v6  ;;  %285 = vperm.xlu1 %2507, %v199_v12   ;;  %v2698_v9 = vld [vmem:[%s3610_s0 + $0x10] ss:$20 sps:$4 sm:$0xff]  }
  0x2f   :  { %2324 = vmatpush3.bf16.msra.mxu1 %v2624_v35  ;;  %v2679_v35 = vld [vmem:[%s3610_s0 + $0xd4] ss:$20 sps:$4 sm:$0xff]  }
  0x30   :  { %2325 = vmatprep.subr.bf16.mxu1 %v2631_v38  ;;  %v2681_v38 = vld [vmem:[%s3610_s0 + $0x168] ss:$20 sps:$4 sm:$0xff]  }
  0x31   :  { %2456 = vmatpush3.bf16.msra.mxu0 %v2683_v6  ;;  %290 = vperm.xlu0 %2506, %v200_v13   ;;  %v1538_v6 = vld [vmem:[%s3612_s3 + $0x60] sm:$0xff]  ;;  %v1541_v13 = vld [vmem:[%s3612_s3 + $0x78] sm:$0xff] }
  0x32   :  { %1092 = vmatmul.mubr.bf16.gmra.mrb[8].mxu0 %v2629_v37  ;;  %1188 = vmatmul.mubr.bf16.gmra.mrb[8].mxu1 %v2630_v39  ;;  %v212_v37 = vld [vmem:[%s3611_s2 + $0xd0] sm:$0xff] }
  0x33   :  { %2326 = vmatpush3.bf16.msra.mxu1 %v2632_v40  ;;  %1099 = vmatprep.mubr.bf16.mxu0 %v2635_v42  ;;  %v2682_v39 = vld [vmem:[%s3610_s0 + $0xd0] ss:$20 sps:$4 sm:$0xff]   ;;  %v2684_v40 = vld [vmem:[%s3610_s0 + $0x194] ss:$20 sps:$4 sm:$0xff]  }
  0x34   :  { %2327 = vmatprep.subr.bf16.mxu1 %v2633_v41  ;;  %1195 = vmatprep.mubr.bf16.mxu1 %v2637_v44  ;;  %v213_v41 = vld [vmem:[%s3611_s2 + $0xd8] sm:$0xff]  ;;  %v214_v42 = vld [vmem:[%s3611_s2 + $0xe0] sm:$0xff]  ;;  %v215_v44 = vld [vmem:[%s3611_s2 + $0xe8] sm:$0xff] }
  0x35   :  { %295 = vperm.xlu1 %2507, %v201_v17   ;;  %300 = vperm.xlu0 %2506, %v202_v18   ;;  %v2700_v17 = vld [vmem:[%s3610_s0 + $0x38] ss:$20 sps:$4 sm:$0xff]  }
  0x37   :  { %2328 = vmatpush3.bf16.msra.mxu1 %v2634_v47  ;;  %v1527_v47 = vld [vmem:[%s3612_s3 + $0x8] sm:$0xff] }
  0x38   :  { %2329 = vmatprep.subr.bf16.mxu1 %v2641_v48  ;;  %v2688_v48 = vld [vmem:[%s3610_s0 + $0x190] ss:$20 sps:$4 sm:$0xff]   ;;  %v2508_v53 = vpack.i.bf16 %v1527_v47, %v1526_v46  ;;  %v2709_v47 = vld [vmem:[%s3610_s0 + $0x198] ss:$20 sps:$4 sm:$0xff]  }
  0x39   :  { %305 = vperm.xlu1 %2507, %v203_v20   ;;  %310 = vperm.xlu0 %2506, %v204_v21   ;;  %v1545_v21 = vld [vmem:[%s3612_s3 + $0x98] sm:$0xff] }
  0x3a   :  { %1100 = vmatmul.mubr.bf16.gmra.mrb[12].mxu0 %v2639_v49  ;;  %1196 = vmatmul.mubr.bf16.gmra.mrb[12].mxu1 %v2640_v50  ;;  %v2689_v49 = vld [vmem:[%s3610_s0 + $0xf8] ss:$20 sps:$4 sm:$0xff]  }
  0x3b   :  { %2330 = vmatpush3.bf16.msra.mxu1 %v2642_v51  ;;  %1107 = vmatprep.mubr.bf16.mxu0 %v2646_v54  ;;  %v217_v50 = vld [vmem:[%s3611_s2 + $0xf8] sm:$0xff] }
  0x3c   :  { %2331 = vmatprep.subr.bf16.mxu1 %v2643_v55  ;;  %1236 = vmatprep.mubr.bf16.mxu1 %v2650_v56  ;;  %v2690_v51 = vld [vmem:[%s3610_s0 + $0x1bc] ss:$20 sps:$4 sm:$0xff]   ;;  %v1530_v55 = vld [vmem:[%s3612_s3 + $0x20] sm:$0xff]  ;;  %v1531_v56 = vld [vmem:[%s3612_s3 + $0x28] sm:$0xff] }
  0x3d   :  { %315 = vperm.xlu1 %2507, %v205_v25   ;;  %320 = vperm.xlu0 %2506, %v206_v26   ;;  %v1529_v54 = vld [vmem:[%s3612_s3 + $0x18] sm:$0xff]  ;;  %v2703_v25 = vld [vmem:[%s3610_s0 + $0x60] ss:$20 sps:$4 sm:$0xff]  }
  0x3e   :  { %v2513_v58 = vpack.i.bf16 %v1529_v54, %v1528_v52  ;;  %v2715_v52 = vld [vmem:[%s3610_s0 + $0x128] ss:$20 sps:$4 sm:$0xff]   ;;  %v2718_v54 = vld [vmem:[%s3610_s0 + $0x150] ss:$20 sps:$4 sm:$0xff]  }
  0x3f   :  { %2332 = vmatpush3.bf16.msra.mxu1 %v2645_v60  ;;  %v2518_v60 = vpack.i.bf16 %v1531_v56, %v1530_v55  ;;  %v2719_v55 = vld [vmem:[%s3610_s0 + $0x1e8] ss:$20 sps:$4 sm:$0xff]   ;;  %v2720_v56 = vld [vmem:[%s3610_s0 + $0x178] ss:$20 sps:$4 sm:$0xff]  }
  0x41   :  { %325 = vperm.xlu1 %2507, %v207_v28   ;;  %330 = vperm.xlu0 %2506, %v208_v29   ;;  %v1549_v29 = vld [vmem:[%s3612_s3 + $0xb8] sm:$0xff] }
  0x42   :  { %1108 = vmatmul.mubr.bf16.gmra.mrb[16].mxu0 %v2651_v62  ;;  %1237 = vmatmul.mubr.bf16.vlgmr.msra.gmra.mrb[16].mxu1 %v2648_v61  ;;  %v1533_v61 = vld [vmem:[%s3612_s3 + $0x38] sm:$0xff]  ;;  %v1534_v62 = vld [vmem:[%s3612_s3 + $0x40] sm:$0xff] }
  0x43   :  { %1115 = vmatprep.mubr.bf16.mxu0 %v2652_v1  ;;  %1244 = vmatprep.mubr.bf16.mxu1 %v2654_v2  ;;  %v2695_v1 = vld [vmem:[%s3610_s0 + $0x120] ss:$20 sps:$4 sm:$0xff]   ;;  %v2523_v2 = vpack.i.bf16 %v1533_v61, %v1532_v59  ;;  %v2528_v4 = vpack.i.bf16 %v1535_v63, %v1534_v62  ;;  %v2724_v59 = vld [vmem:[%s3610_s0 + $0x210] ss:$20 sps:$4 sm:$0xff]   ;;  %v2729_v63 = vld [vmem:[%s3610_s0 + $0x238] ss:$20 sps:$4 sm:$0xff]  }
  0x44   :  { %v2726_v61 = vld [vmem:[%s3610_s0 + $0x23c] ss:$20 sps:$4 sm:$0xff]  }
  0x45   :  { %335 = vperm.xlu1 %2507, %v209_v32   ;;  %340 = vperm.xlu0 %2506, %v210_v33   ;;  %v2704_v32 = vld [vmem:[%s3610_s0 + $0x170] ss:$20 sps:$4 sm:$0xff]   ;;  %v2705_v33 = vld [vmem:[%s3610_s0 + $0x88] ss:$20 sps:$4 sm:$0xff]  }
  0x46   :  { %v2728_v62 = vld [vmem:[%s3610_s0 + $0x1f0] ss:$20 sps:$4 sm:$0xff]  }
  0x49   :  { %345 = vperm.xlu1 %2507, %v211_v36   ;;  %350 = vperm.xlu0 %2506, %v212_v37   ;;  %v1553_v37 = vld [vmem:[%s3612_s3 + $0xd8] sm:$0xff] }
  0x4a   :  { %1116 = vmatmul.mubr.bf16.gmra.mrb[20].mxu0 %v2656_v5  ;;  %1245 = vmatmul.mubr.bf16.gmra.mrb[20].mxu1 %v2657_v7  ;;  %v1537_v5 = vld [vmem:[%s3612_s3 + $0x58] sm:$0xff]  ;;  %v1539_v7 = vld [vmem:[%s3612_s3 + $0x68] sm:$0xff] }
  0x4b   :  { %1123 = vmatprep.mubr.bf16.mxu0 %v2658_v10  ;;  %1252 = vmatprep.mubr.bf16.mxu1 %v2660_v11  ;;  %v2533_v10 = vpack.i.bf16 %v1537_v5, %v1536_v3  ;;  %v1540_v11 = vld [vmem:[%s3612_s3 + $0x70] sm:$0xff]  ;;  %v2538_v12 = vpack.i.bf16 %v1539_v7, %v1538_v6 }
  0x4c   :  { %v2543_v18 = vpack.i.bf16 %v1541_v13, %v1540_v11  ;;  %v2734_v3 = vld [vmem:[%s3610_s0 + $0x260] ss:$20 sps:$4 sm:$0xff]  }
  0x4d   :  { %355 = vperm.xlu1 %2507, %v213_v41   ;;  %360 = vperm.xlu0 %2506, %v214_v42   ;;  %v2708_v41 = vld [vmem:[%s3610_s0 + $0xb0] ss:$20 sps:$4 sm:$0xff]  }
  0x51   :  { %365 = vperm.xlu1 %2507, %v215_v44   ;;  %370 = vperm.xlu0 %2506, %v216_v45   ;;  %v1556_v44 = vld [vmem:[%s3612_s3 + $0xf0] sm:$0xff]  ;;  %v1557_v45 = vld [vmem:[%s3612_s3 + $0xf8] sm:$0xff] }
  0x52   :  { %1124 = vmatmul.mubr.bf16.gmra.mrb[24].mxu0 %v2662_v14  ;;  %1253 = vmatmul.mubr.bf16.gmra.mrb[24].mxu1 %v2663_v15  ;;  %v1542_v14 = vld [vmem:[%s3612_s3 + $0x80] sm:$0xff]  ;;  %v1543_v15 = vld [vmem:[%s3612_s3 + $0x88] sm:$0xff]  ;;  %v2583_v46 = vpack.i.bf16 %v1557_v45, %v1556_v44 }
  0x53   :  { %1131 = vmatprep.mubr.bf16.mxu0 %v2665_v16  ;;  %1260 = vmatprep.mubr.bf16.mxu1 %v2667_v19  ;;  %v2699_v16 = vld [vmem:[%s3610_s0 + $0x148] ss:$20 sps:$4 sm:$0xff]   ;;  %v1544_v19 = vld [vmem:[%s3612_s3 + $0x90] sm:$0xff]  ;;  %v2548_v20 = vpack.i.bf16 %v1543_v15, %v1542_v14 }
  0x54   :  { %v2553_v26 = vpack.i.bf16 %v1545_v21, %v1544_v19 }
  0x55   :  { %375 = vperm.xlu1 %2507, %v217_v50   ;;  %2509 = vperm.xlu0 %2506, %v2508_v53   ;;  %v2713_v50 = vld [vmem:[%s3610_s0 + $0x100] ss:$20 sps:$4 sm:$0xff]  }
  0x56   :  { %v2716_v53 = vld [vmem:[%s3610_s0 + $0x1ec] ss:$20 sps:$4 sm:$0xff]  }
  0x59   :  { %2514 = vperm.xlu1 %2507, %v2513_v58   ;;  %2519 = vperm.xlu0 %2506, %v2518_v60   ;;  %v2723_v58 = vld [vmem:[%s3610_s0 + $0x1a0] ss:$20 sps:$4 sm:$0xff]   ;;  %v2725_v60 = vld [vmem:[%s3610_s0 + $0x1c8] ss:$20 sps:$4 sm:$0xff]  }
  0x5a   :  { %1132 = vmatmul.mubr.bf16.gmra.mrb[28].mxu0 %v2669_v22  ;;  %1261 = vmatmul.mubr.bf16.gmra.mrb[28].mxu1 %v2670_v23  ;;  %v1546_v22 = vld [vmem:[%s3612_s3 + $0xa0] sm:$0xff]  ;;  %v1547_v23 = vld [vmem:[%s3612_s3 + $0xa8] sm:$0xff] }
  0x5b   :  { %1139 = vmatprep.mubr.bf16.mxu0 %v2671_v24  ;;  %1268 = vmatprep.mubr.bf16.mxu1 %v2673_v27  ;;  %v2701_v24 = vld [vmem:[%s3610_s0 + $0x174] ss:$20 sps:$4 sm:$0xff]   ;;  %v2558_v28 = vpack.i.bf16 %v1547_v23, %v1546_v22 }
  0x5c   :  { %v1548_v27 = vld [vmem:[%s3612_s3 + $0xb0] sm:$0xff] }
  0x5d   :  { %2524 = vperm.xlu1 %2507, %v2523_v2   ;;  %2529 = vperm.xlu0 %2506, %v2528_v4   ;;  %v2733_v2 = vld [vmem:[%s3610_s0 + $0x240] ss:$20 sps:$4 sm:$0xff]   ;;  %v2735_v4 = vld [vmem:[%s3610_s0 + $0x268] ss:$20 sps:$4 sm:$0xff]  }
  0x61   :  { %2534 = vperm.xlu1 %2507, %v2533_v10   ;;  %2539 = vperm.xlu0 %2506, %v2538_v12  }
  0x62   :  { %1140 = vmatmul.mubr.bf16.gmra.mrb[32].mxu0 %v2675_v30  ;;  %1269 = vmatmul.mubr.bf16.gmra.mrb[32].mxu1 %v2676_v31  ;;  %v1550_v30 = vld [vmem:[%s3612_s3 + $0xc0] sm:$0xff]  ;;  %v1551_v31 = vld [vmem:[%s3612_s3 + $0xc8] sm:$0xff] }
  0x63   :  { %1147 = vmatprep.mubr.bf16.mxu0 %v2677_v34  ;;  %1276 = vmatprep.mubr.bf16.mxu1 %v2679_v35  ;;  %v2563_v34 = vpack.i.bf16 %v1549_v29, %v1548_v27  ;;  %v1552_v35 = vld [vmem:[%s3612_s3 + $0xd0] sm:$0xff]  ;;  %v2568_v36 = vpack.i.bf16 %v1551_v31, %v1550_v30 }
  0x64   :  { %v2573_v42 = vpack.i.bf16 %v1553_v37, %v1552_v35 }
  0x65   :  { %2544 = vperm.xlu1 %2507, %v2543_v18   ;;  %2549 = vperm.xlu0 %2506, %v2548_v20  }
  0x69   :  { %2554 = vperm.xlu1 %2507, %v2553_v26   ;;  %2559 = vperm.xlu0 %2506, %v2558_v28  }
  0x6a   :  { %1148 = vmatmul.mubr.bf16.gmra.mrb[36].mxu0 %v2681_v38  ;;  %1277 = vmatmul.mubr.bf16.gmra.mrb[36].mxu1 %v2682_v39  ;;  %v1554_v38 = vld [vmem:[%s3612_s3 + $0xe0] sm:$0xff]  ;;  %v1555_v39 = vld [vmem:[%s3612_s3 + $0xe8] sm:$0xff] }
  0x6b   :  { %1155 = vmatprep.mubr.bf16.mxu0 %v2684_v40  ;;  %1284 = vmatprep.mubr.bf16.mxu1 %v2686_v43  ;;  %v2706_v40 = vld [vmem:[%s3610_s0 + $0x19c] ss:$20 sps:$4 sm:$0xff]   ;;  %v2578_v43 = vpack.i.bf16 %v1555_v39, %v1554_v38 }
  0x6d   :  { %2564 = vperm.xlu1 %2507, %v2563_v34   ;;  %2569 = vperm.xlu0 %2506, %v2568_v36  }
  0x71   :  { %2574 = vperm.xlu1 %2507, %v2573_v42   ;;  %2579 = vperm.xlu0 %2506, %v2578_v43  }
  0x72   :  { %1156 = vmatmul.mubr.bf16.gmra.mrb[40].mxu0 %v2688_v48  ;;  %1285 = vmatmul.mubr.bf16.gmra.mrb[40].mxu1 %v2689_v49  ;;  %v2710_v48 = vld [vmem:[%s3610_s0 + $0xd8] ss:$20 sps:$4 sm:$0xff]  }
  0x73   :  { %1163 = vmatprep.mubr.bf16.mxu0 %v2690_v51  ;;  %1292 = vmatprep.mubr.bf16.mxu1 %v2692_v57  ;;  %v2711_v49 = vld [vmem:[%s3610_s0 + $0x1c4] ss:$20 sps:$4 sm:$0xff]   ;;  %v2714_v51 = vld [vmem:[%s3610_s0 + $0x1c0] ss:$20 sps:$4 sm:$0xff]  }
  0x74   :  { %v2721_v57 = vld [vmem:[%s3610_s0 + $0x214] ss:$20 sps:$4 sm:$0xff]  }
  0x75   :  { %2584 = vperm.xlu1 %2507, %v2583_v46  }
  0x7a   :  { %1164 = vmatmul.mubr.bf16.gmra.mrb[44].mxu0 %v2694_v0  ;;  %1293 = vmatmul.mubr.bf16.gmra.mrb[44].mxu1 %v2695_v1  ;;  %v2730_v0 = vld [vmem:[%s3610_s0 + $0x218] ss:$20 sps:$4 sm:$0xff]  }
  0x7b   :  { %1300 = vmatprep.mubr.bf16.mxu1 %v2696_v8  ;;  %2457 = vmatprep.mubr.msk.bf16.mxu0 %vm994_vm0, %v2698_v9  ;;  %v2731_v1 = vld [vmem:[%s3610_s0 + $0x264] ss:$20 sps:$4 sm:$0xff]  }
  0x82   :  { %1301 = vmatmul.mubr.bf16.gmra.mrb[48].mxu1 %v2699_v16  ;;  %2458 = vmatmul.mubr.msk.bf16.vlgmr.msra.gmra.mrb[48].mxu0 %vm994_vm0, %v2700_v17 }
  0x83   :  { %1308 = vmatprep.mubr.bf16.mxu1 %v2701_v24  ;;  %2461 = vmatprep.mubr.msk.bf16.mxu0 %vm994_vm0, %v2703_v25 }
  0x8a   :  { %1309 = vmatmul.mubr.bf16.gmra.mrb[52].mxu1 %v2704_v32  ;;  %2462 = vmatmul.mubr.msk.bf16.gmra.mrb[52].mxu0 %vm994_vm0, %v2705_v33 }
  0x8b   :  { %1316 = vmatprep.mubr.bf16.mxu1 %v2706_v40  ;;  %2465 = vmatprep.mubr.msk.bf16.mxu0 %vm994_vm0, %v2708_v41 }
  0x90   :  { %v3318_v5 = vpop.permute.xlu0 %220  ;;  %v3320_v6 = vpop.permute.xlu1 %230 }
  0x92   :  { %1317 = vmatmul.mubr.bf16.gmra.mrb[56].mxu1 %v2709_v47  ;;  %2466 = vmatmul.mubr.msk.bf16.gmra.mrb[56].mxu0 %vm994_vm0, %v2710_v48 }
  0x93   :  { %1324 = vmatprep.mubr.bf16.mxu1 %v2711_v49  ;;  %2469 = vmatprep.mubr.msk.bf16.mxu0 %vm994_vm0, %v2713_v50 }
  0x94   :  { %v3322_v7 = vpop.permute.xlu0 %225  ;;  %v3324_v8 = vpop.permute.xlu1 %235 }
  0x98   :  { %v3326_v9 = vpop.permute.xlu0 %240  ;;  %v3328_v10 = vpop.permute.xlu1 %245 }
  0x9a   :  { %1325 = vmatmul.mubr.bf16.gmra.mrb[60].mxu1 %v2714_v51  ;;  %2470 = vmatmul.mubr.msk.bf16.gmra.mrb[60].mxu0 %vm994_vm0, %v2715_v52 }
  0x9b   :  { %1332 = vmatprep.mubr.bf16.mxu1 %v2716_v53  ;;  %2473 = vmatprep.mubr.msk.bf16.mxu0 %vm994_vm0, %v2718_v54 }
  0x9c   :  { %v3330_v11 = vpop.permute.xlu0 %250  ;;  %v3332_v12 = vpop.permute.xlu1 %255 }
  0xa0   :  { %v3334_v13 = vpop.permute.xlu0 %260  ;;  %v3336_v14 = vpop.permute.xlu1 %265 }
  0xa2   :  { %1333 = vmatmul.mubr.bf16.gmra.mrb[64].mxu1 %v2719_v55  ;;  %2474 = vmatmul.mubr.msk.bf16.gmra.mrb[64].mxu0 %vm994_vm0, %v2720_v56 }
  0xa3   :  { %1340 = vmatprep.mubr.bf16.mxu1 %v2721_v57  ;;  %2477 = vmatprep.mubr.msk.bf16.mxu0 %vm994_vm0, %v2723_v58 }
  0xa5   :  { %v3342_v27 = vpop.permute.xlu0 %270  ;;  %v3344_v28 = vpop.permute.xlu1 %275 }
  0xaa   :  { %1341 = vmatmul.mubr.bf16.gmra.mrb[68].mxu1 %v2724_v59  ;;  %2478 = vmatmul.mubr.msk.bf16.gmra.mrb[68].mxu0 %vm994_vm0, %v2725_v60 }
  0xab   :  { %1348 = vmatprep.mubr.bf16.mxu1 %v2726_v61  ;;  %2481 = vmatprep.mubr.msk.bf16.mxu0 %vm994_vm0, %v2728_v62 }
  0xac   :  { %v3350_v41 = vpop.permute.xlu0 %280 }
  0xad   :  { %v3352_v42 = vpop.permute.xlu1 %285 }
  0xb0   :  { %v3360_v55 = vpop.permute.xlu0 %290 }
  0xb2   :  { %1349 = vmatmul.mubr.bf16.gmra.mrb[72].mxu1 %v2729_v63  ;;  %2482 = vmatmul.mubr.msk.bf16.gmra.mrb[72].mxu0 %vm994_vm0, %v2730_v0 }
  0xb3   :  { %1356 = vmatprep.mubr.bf16.mxu1 %v2731_v1  ;;  %2485 = vmatprep.mubr.msk.bf16.mxu0 %vm994_vm0, %v2733_v2 }
  0xb4   :  { %v3362_v56 = vpop.permute.xlu1 %295 }
  0xba   :  { %1357 = vmatmul.mubr.bf16.gmra.mrb[76].mxu1 %v2734_v3  ;;  %2486 = vmatmul.mubr.msk.bf16.gmra.mrb[76].mxu0 %vm994_vm0, %v2735_v4 }
  0xf5   :  { %v2293_v15 = vpop.f32.mrb[0].mxu1  ;;  %v2221_v16 = vpop.f32.mrb[0].mxu0 }
  0xf6   :  { %v2294_v17 = vpop.f32.mrb[1].mxu1  ;;  %v2222_v18 = vpop.f32.mrb[1].mxu0 }
  0xf7   :  { %v3338_v19 = vadd.f32 %v2294_v17, %v2293_v15  ;;  %v2296_v20 = vpop.f32.mrb[2].mxu1  ;;  %v2223_v21 = vadd.f32 %v2222_v18, %v2221_v16  ;;  %v2224_v22 = vpop.f32.mrb[2].mxu0 }
  0xf8   :  { %v2297_v23 = vpop.f32.mrb[3].mxu1  ;;  %v2225_v24 = vpop.f32.mrb[3].mxu0 }
  0xf9   :  { %v3340_v25 = vadd.f32 %v2297_v23, %v2296_v20  ;;  %v2226_v26 = vadd.f32 %v2225_v24, %v2224_v22  ;;  %v3372_v15 = vpop.permute.xlu0 %300  ;;  %v3374_v16 = vpop.permute.xlu1 %305  ;;  %v1078_v23 = vadd.f32 %v2223_v21, %v3318_v5 }
  0xfd   :  { %v2299_v29 = vpop.f32.mrb[4].mxu1  ;;  %v2227_v30 = vpop.f32.mrb[4].mxu0 }
  0xfe   :  { %v2300_v31 = vpop.f32.mrb[5].mxu1  ;;  %v2228_v32 = vpop.f32.mrb[5].mxu0 }
  0xff   :  { %v3346_v33 = vadd.f32 %v2300_v31, %v2299_v29  ;;  %v2302_v34 = vpop.f32.mrb[6].mxu1  ;;  %v2229_v35 = vadd.f32 %v2228_v32, %v2227_v30  ;;  %v2230_v36 = vpop.f32.mrb[6].mxu0 }
 0x100   :  { %v2303_v37 = vpop.f32.mrb[7].mxu1  ;;  %v2231_v38 = vpop.f32.mrb[7].mxu0 }
 0x101   :  { %v3348_v39 = vadd.f32 %v2303_v37, %v2302_v34  ;;  %v2232_v40 = vadd.f32 %v2231_v38, %v2230_v36  ;;  %v1081_v36 = vadd.f32 %v2226_v26, %v3322_v7 }
 0x105   :  { %v2305_v43 = vpop.f32.mrb[8].mxu1  ;;  %v2233_v44 = vpop.f32.mrb[8].mxu0 }
 0x106   :  { %v2306_v45 = vpop.f32.mrb[9].mxu1  ;;  %v2234_v46 = vpop.f32.mrb[9].mxu0 }
 0x107   :  { %v3354_v47 = vadd.f32 %v2306_v45, %v2305_v43  ;;  %v2308_v48 = vpop.f32.mrb[10].mxu1  ;;  %v2235_v49 = vadd.f32 %v2234_v46, %v2233_v44  ;;  %v2236_v50 = vpop.f32.mrb[10].mxu0 }
 0x108   :  { %v2309_v51 = vpop.f32.mrb[11].mxu1  ;;  %v2237_v52 = vpop.f32.mrb[11].mxu0 }
 0x109   :  { %v3356_v53 = vadd.f32 %v2309_v51, %v2308_v48  ;;  %v3358_v54 = vadd.f32 %v2237_v52, %v2236_v50  ;;  %v3386_v45 = vpop.permute.xlu0 %310  ;;  %v3388_v46 = vpop.permute.xlu1 %315  ;;  %v1086_v51 = vadd.f32 %v2229_v35, %v3320_v6 }
 0x10b   :  { %3614 = vst [vmem:[#allocation2_spill] sm:$0xff] %v3356_v53 }
 0x10d   :  { %v2311_v57 = vpop.f32.mrb[12].mxu1  ;;  %v2239_v58 = vpop.f32.mrb[12].mxu0 }
 0x10e   :  { %v2312_v59 = vpop.f32.mrb[13].mxu1  ;;  %v2240_v60 = vpop.f32.mrb[13].mxu0 }
 0x10f   :  { %v3364_v61 = vadd.f32 %v2312_v59, %v2311_v57  ;;  %v2314_v62 = vpop.f32.mrb[14].mxu1  ;;  %v3366_v63 = vadd.f32 %v2240_v60, %v2239_v58  ;;  %v2242_v0 = vpop.f32.mrb[14].mxu0  ;;  %v1089_v60 = vadd.f32 %v2232_v40, %v3324_v8 }
 0x110   :  { %v2315_v1 = vpop.f32.mrb[15].mxu1  ;;  %v2243_v2 = vpop.f32.mrb[15].mxu0 }
 0x111   :  { %3615 = vst [vmem:[#allocation3_spill] sm:$0xff] %v3364_v61  ;;  %v3368_v3 = vadd.f32 %v2315_v1, %v2314_v62  ;;  %v3370_v4 = vadd.f32 %v2243_v2, %v2242_v0 }
 0x113   :  { %3616 = vst [vmem:[#allocation4_spill] sm:$0xff] %v3368_v3 }
 0x115   :  { %v2333_v17 = vpop.f32.mrb[16].mxu1  ;;  %v2245_v18 = vpop.f32.mrb[16].mxu0 }
 0x116   :  { %v2334_v20 = vpop.f32.mrb[17].mxu1  ;;  %v2246_v22 = vpop.f32.mrb[17].mxu0 }
 0x117   :  { %v2335_v24 = vadd.f32 %v2334_v20, %v2333_v17  ;;  %v2336_v29 = vpop.f32.mrb[18].mxu1  ;;  %v3377_v30 = vadd.f32 %v2246_v22, %v2245_v18  ;;  %v2248_v31 = vpop.f32.mrb[18].mxu0 }
 0x118   :  { %v2337_v32 = vpop.f32.mrb[19].mxu1  ;;  %v2249_v34 = vpop.f32.mrb[19].mxu0 }
 0x119   :  { %v2338_v37 = vadd.f32 %v2337_v32, %v2336_v29  ;;  %v3380_v38 = vadd.f32 %v2249_v34, %v2248_v31  ;;  %v3382_v43 = vadd.f32 %v2335_v24, %v1078_v23  ;;  %v3400_v17 = vpop.permute.xlu0 %320  ;;  %v3402_v18 = vpop.permute.xlu1 %325  ;;  %v1094_v23 = vadd.f32 %v2235_v49, %v3326_v9 }
 0x11a   :  { %v1097_v34 = vadd.f32 %v3358_v54, %v3328_v10 }
 0x11b   :  { %v3384_v44 = vadd.f32 %v2338_v37, %v1081_v36 }
 0x11d   :  { %v2339_v5 = vpop.f32.mrb[20].mxu1  ;;  %v2251_v21 = vpop.f32.mrb[20].mxu0 }
 0x11e   :  { %v2340_v48 = vpop.f32.mrb[21].mxu1  ;;  %v2252_v50 = vpop.f32.mrb[21].mxu0 }
 0x11f   :  { %v2341_v52 = vadd.f32 %v2340_v48, %v2339_v5  ;;  %v2342_v57 = vpop.f32.mrb[22].mxu1  ;;  %v3391_v7 = vadd.f32 %v2252_v50, %v2251_v21  ;;  %v2254_v26 = vpop.f32.mrb[22].mxu0 }
 0x120   :  { %v2343_v58 = vpop.f32.mrb[23].mxu1  ;;  %v2255_v59 = vpop.f32.mrb[23].mxu0 }
 0x121   :  { %v2344_v62 = vadd.f32 %v2343_v58, %v2342_v57  ;;  %v3394_v0 = vadd.f32 %v2255_v59, %v2254_v26  ;;  %v3396_v1 = vadd.f32 %v2341_v52, %v1086_v51  ;;  %v3415_v48 = vpop.permute.xlu0 %330  ;;  %v3417_v9 = vpop.permute.xlu1 %335  ;;  %v1102_v57 = vadd.f32 %v3366_v63, %v3330_v11 }
 0x123   :  { %v3398_v2 = vadd.f32 %v2344_v62, %v1089_v60  ;;  %v1105_v62 = vadd.f32 %v3370_v4, %v3332_v12 }
 0x125   :  { %v2345_v6 = vpop.f32.mrb[24].mxu1  ;;  %v2257_v35 = vpop.f32.mrb[24].mxu0 }
 0x126   :  { %v2346_v20 = vpop.f32.mrb[25].mxu1  ;;  %v2258_v22 = vpop.f32.mrb[25].mxu0 }
 0x127   :  { %v2347_v24 = vadd.f32 %v2346_v20, %v2345_v6  ;;  %v2348_v29 = vpop.f32.mrb[26].mxu1  ;;  %v3405_v8 = vadd.f32 %v2258_v22, %v2257_v35  ;;  %v2260_v40 = vpop.f32.mrb[26].mxu0 }
 0x128   :  { %v2349_v31 = vpop.f32.mrb[27].mxu1  ;;  %v2261_v32 = vpop.f32.mrb[27].mxu0 }
 0x129   :  { %v2350_v36 = vadd.f32 %v2349_v31, %v2348_v29  ;;  %v3409_v37 = vadd.f32 %v2261_v32, %v2260_v40  ;;  %v3411_v5 = vadd.f32 %v2347_v24, %v1094_v23  ;;  %v3431_v23 = vpop.permute.xlu0 %340  ;;  %v3433_v11 = vpop.permute.xlu1 %345  ;;  %v1110_v31 = vadd.f32 %v3377_v30, %v3334_v13 }
 0x12b   :  { %v3413_v21 = vadd.f32 %v2350_v36, %v1097_v34 }
 0x12d   :  { %v2351_v49 = vpop.f32.mrb[28].mxu1  ;;  %v2263_v50 = vpop.f32.mrb[28].mxu0 }
 0x12e   :  { %v2352_v51 = vpop.f32.mrb[29].mxu1  ;;  %v2264_v52 = vpop.f32.mrb[29].mxu0 }
 0x12f   :  { %v2353_v26 = vadd.f32 %v2352_v51, %v2351_v49  ;;  %v2354_v10 = vpop.f32.mrb[30].mxu1  ;;  %v3421_v54 = vadd.f32 %v2264_v52, %v2263_v50  ;;  %v2266_v58 = vpop.f32.mrb[30].mxu0  ;;  %v1113_v50 = vadd.f32 %v3380_v38, %v3336_v14 }
 0x130   :  { %v2355_v59 = vpop.f32.mrb[31].mxu1  ;;  %v2267_v60 = vpop.f32.mrb[31].mxu0 }
 0x131   :  { %v2356_v6 = vadd.f32 %v2355_v59, %v2354_v10  ;;  %v3425_v35 = vadd.f32 %v2267_v60, %v2266_v58  ;;  %v3427_v20 = vadd.f32 %v2353_v26, %v1102_v57  ;;  %v3447_v10 = vpop.permute.xlu0 %350  ;;  %v3449_v13 = vpop.permute.xlu1 %355 }
 0x133   :  { %v3429_v22 = vadd.f32 %v2356_v6, %v1105_v62  ;;  %v1118_v62 = vadd.f32 %v3391_v7, %v3342_v27 }
 0x135   :  { %v2269_v63 = vpop.f32.mrb[32].mxu0  ;;  %v2357_v24 = vpop.f32.mrb[32].mxu1 }
 0x136   :  { %v2270_v29 = vpop.f32.mrb[33].mxu0  ;;  %v2358_v40 = vpop.f32.mrb[33].mxu1 }
 0x137   :  { %v3437_v32 = vadd.f32 %v2270_v29, %v2269_v63  ;;  %v2359_v12 = vadd.f32 %v2358_v40, %v2357_v24  ;;  %v2272_v4 = vpop.f32.mrb[34].mxu0  ;;  %v2360_v34 = vpop.f32.mrb[34].mxu1  ;;  %v1121_v40 = vadd.f32 %v3394_v0, %v3344_v28 }
 0x138   :  { %v2273_v36 = vpop.f32.mrb[35].mxu0  ;;  %v2361_v49 = vpop.f32.mrb[35].mxu1 }
 0x139   :  { %v3441_v51 = vadd.f32 %v2273_v36, %v2272_v4  ;;  %v2362_v52 = vadd.f32 %v2361_v49, %v2360_v34  ;;  %v3443_v57 = vadd.f32 %v2359_v12, %v1110_v31  ;;  %v3463_v36 = vpop.permute.xlu0 %360  ;;  %v3465_v27 = vpop.permute.xlu1 %365  ;;  %v1142_v61 = vadd.f32 %v3437_v32, %v3372_v15 }
 0x13a   :  { %3617 = vst [vmem:[#allocation5_spill] sm:$0xff] %v3465_v27 }
 0x13b   :  { %v3445_v26 = vadd.f32 %v2362_v52, %v1113_v50 }
 0x13d   :  { %v2275_v30 = vpop.f32.mrb[36].mxu0  ;;  %v2363_v58 = vpop.f32.mrb[36].mxu1 }
 0x13e   :  { %v2276_v59 = vpop.f32.mrb[37].mxu0  ;;  %v2364_v60 = vpop.f32.mrb[37].mxu1 }
 0x13f   :  { %v3453_v6 = vadd.f32 %v2276_v59, %v2275_v30  ;;  %v2365_v14 = vadd.f32 %v2364_v60, %v2363_v58  ;;  %v2278_v38 = vpop.f32.mrb[38].mxu0  ;;  %v2366_v63 = vpop.f32.mrb[38].mxu1  ;;  %v1126_v30 = vadd.f32 %v3405_v8, %v3350_v41 }
 0x140   :  { %v2279_v24 = vpop.f32.mrb[39].mxu0  ;;  %v2367_v29 = vpop.f32.mrb[39].mxu1 }
 0x141   :  { %v3457_v31 = vadd.f32 %v2279_v24, %v2278_v38  ;;  %v2368_v12 = vadd.f32 %v2367_v29, %v2366_v63  ;;  %v3459_v4 = vadd.f32 %v2365_v14, %v1118_v62  ;;  %v1129_v14 = vadd.f32 %v3409_v37, %v3352_v42  ;;  %v3481_v41 = vpop.permute.xlu1 %375 }
 0x142   :  { %3619 = vst [vmem:[#allocation7_spill] sm:$0xff] %v3481_v41 }
 0x143   :  { %v3461_v34 = vadd.f32 %v2368_v12, %v1121_v40  ;;  %v3479_v40 = vpop.permute.xlu0 %370 }
 0x144   :  { %3618 = vst [vmem:[#allocation6_spill] sm:$0xff] %v3479_v40 }
 0x145   :  { %v2281_v7 = vpop.f32.mrb[40].mxu0  ;;  %v2369_v49 = vpop.f32.mrb[40].mxu1 }
 0x146   :  { %v2282_v50 = vpop.f32.mrb[41].mxu0  ;;  %v2370_v52 = vpop.f32.mrb[41].mxu1 }
 0x147   :  { %v3469_v58 = vadd.f32 %v2282_v50, %v2281_v7  ;;  %v2371_v28 = vadd.f32 %v2370_v52, %v2369_v49  ;;  %v2284_v0 = vpop.f32.mrb[42].mxu0  ;;  %v2372_v59 = vpop.f32.mrb[42].mxu1  ;;  %v1134_v50 = vadd.f32 %v3421_v54, %v3360_v55 }
 0x148   :  { %v2285_v60 = vpop.f32.mrb[43].mxu0  ;;  %v2373_v62 = vpop.f32.mrb[43].mxu1 }
 0x149   :  { %v3473_v38 = vadd.f32 %v2285_v60, %v2284_v0  ;;  %v2374_v63 = vadd.f32 %v2373_v62, %v2372_v59  ;;  %v3475_v24 = vadd.f32 %v2371_v28, %v1126_v30  ;;  %v1137_v59 = vadd.f32 %v3425_v35, %v3362_v56  ;;  %v2515_v3 = vpop.permute.xlu1 %2514  ;;  %v2510_v41 = vpop.permute.xlu0 %2509 }
 0x14b   :  { %v3477_v29 = vadd.f32 %v2374_v63, %v1129_v14 }
 0x14d   :  { %v2287_v8 = vpop.f32.mrb[44].mxu0  ;;  %v2375_v12 = vpop.f32.mrb[44].mxu1 }
 0x14e   :  { %v2288_v7 = vpop.f32.mrb[45].mxu0  ;;  %v2376_v49 = vpop.f32.mrb[45].mxu1 }
 0x14f   :  { %v3485_v52 = vadd.f32 %v2288_v7, %v2287_v8  ;;  %v2377_v42 = vadd.f32 %v2376_v49, %v2375_v12  ;;  %v2290_v37 = vpop.f32.mrb[46].mxu0  ;;  %v2378_v0 = vpop.f32.mrb[46].mxu1  ;;  %v2512_v49 = vunpack.i.h.bf16 %v2510_v41 }
 0x150   :  { %v2291_v30 = vpop.f32.mrb[47].mxu0  ;;  %v2379_v28 = vpop.f32.mrb[47].mxu1 }
 0x151   :  { %v3489_v60 = vadd.f32 %v2291_v30, %v2290_v37  ;;  %v2380_v62 = vadd.f32 %v2379_v28, %v2378_v0  ;;  %v3491_v14 = vadd.f32 %v2377_v42, %v1134_v50  ;;  %v2517_v42 = vunpack.i.h.bf16 %v2515_v3 }
 0x152   :  { %v2516_v0 = vunpack.i.l.bf16 %v2515_v3  ;;  %v2511_v30 = vunpack.i.l.bf16 %v2510_v41  ;;  %v2525_v3 = vpop.permute.xlu1 %2524  ;;  %v2520_v41 = vpop.permute.xlu0 %2519 }
 0x153   :  { %v3493_v63 = vadd.f32 %v2380_v62, %v1137_v59 }
 0x155   :  { %v2381_v55 = vpop.f32.mrb[48].mxu1  ;;  %v2459_v54 = vpop.f32.mrb[48].mxu0 }
 0x156   :  { %v1408_v8 = vadd.f32 %v2459_v54, %v3396_v1  ;;  %v2382_v12 = vpop.f32.mrb[49].mxu1  ;;  %v1399_v7 = vpop.f32.mrb[49].mxu0  ;;  %v1145_v1 = vadd.f32 %v3441_v51, %v3374_v16  ;;  %v2522_v51 = vunpack.i.h.bf16 %v2520_v41 }
 0x157   :  { %v2383_v56 = vadd.f32 %v2382_v12, %v2381_v55  ;;  %v1400_v35 = vadd.f32 %v1399_v7, %v3382_v43  ;;  %v2384_v37 = vpop.f32.mrb[50].mxu1  ;;  %v2460_v50 = vpop.f32.mrb[50].mxu0 }
 0x158   :  { %v1411_v28 = vadd.f32 %v2460_v50, %v3398_v2  ;;  %v2385_v59 = vpop.f32.mrb[51].mxu1  ;;  %v1402_v62 = vpop.f32.mrb[51].mxu0  ;;  %v1720_v15 = vmax.f32 %v1408_v8, %v2516_v0  ;;  %v2521_v0 = vunpack.i.l.bf16 %v2520_v41 }
 0x159   :  { %v2386_v54 = vadd.f32 %v2385_v59, %v2384_v37  ;;  %v1403_v40 = vadd.f32 %v1402_v62, %v3384_v44  ;;  %v3503_v53 = vadd.f32 %v2383_v56, %v1142_v61  ;;  %v1718_v43 = vmax.f32 %v1400_v35, %v2511_v30 }
 0x15a   :  { %v1721_v32 = vmax.f32 %v1411_v28, %v2517_v42  ;;  %v2527_v37 = vunpack.i.h.bf16 %v2525_v3  ;;  %v2526_v42 = vunpack.i.l.bf16 %v2525_v3  ;;  %v1153_v28 = vadd.f32 %v3457_v31, %v3388_v46 }
 0x15b   :  { %v1719_v55 = vmax.f32 %v1403_v40, %v2512_v49  ;;  %v3505_v12 = vadd.f32 %v2386_v54, %v1145_v1  ;;  %v1150_v40 = vadd.f32 %v3453_v6, %v3386_v45 }
 0x15c   :  { %v2118_v7 = vpack.c.bf16 %v1721_v32, %v1720_v15  ;;  %v2535_v32 = vpop.permute.xlu1 %2534 }
 0x15d   :  { %v2113_v2 = vpack.c.bf16 %v1719_v55, %v1718_v43  ;;  %v2387_v50 = vpop.f32.mrb[52].mxu1  ;;  %v2463_v27 = vpop.f32.mrb[52].mxu0 }
 0x15e   :  { %2190 = vst [vmem:[%s3613_s4 + $0x8] sm:$0xff] %v2118_v7   ;;  %v1424_v16 = vadd.f32 %v2463_v27, %v3427_v20  ;;  %v2388_v61 = vpop.f32.mrb[53].mxu1  ;;  %v1415_v44 = vpop.f32.mrb[53].mxu0 }
 0x15f   :  { %2114 = vst [vmem:[%s3613_s4] sm:$0xff] %v2113_v2   ;;  %v2389_v8 = vadd.f32 %v2388_v61, %v2387_v50  ;;  %v1416_v49 = vadd.f32 %v1415_v44, %v3411_v5  ;;  %v2390_v56 = vpop.f32.mrb[54].mxu1  ;;  %v2464_v35 = vpop.f32.mrb[54].mxu0  ;;  %v1158_v2 = vadd.f32 %v3469_v58, %v3400_v17 }
 0x160   :  { %v1427_v20 = vadd.f32 %v2464_v35, %v3429_v22  ;;  %v2391_v27 = vpop.f32.mrb[55].mxu1  ;;  %v1418_v30 = vpop.f32.mrb[55].mxu0  ;;  %v1724_v62 = vmax.f32 %v1424_v16, %v2526_v42  ;;  %v1161_v35 = vadd.f32 %v3473_v38, %v3402_v18 }
 0x161   :  { %v2392_v45 = vadd.f32 %v2391_v27, %v2390_v56  ;;  %v1419_v6 = vadd.f32 %v1418_v30, %v3413_v21  ;;  %v3521_v59 = vadd.f32 %v2389_v8, %v1150_v40  ;;  %v1722_v5 = vmax.f32 %v1416_v49, %v2521_v0  ;;  %v2530_v43 = vpop.permute.xlu0 %2529  ;;  %v2545_v30 = vpop.permute.xlu1 %2544 }
 0x162   :  { %v1725_v1 = vmax.f32 %v1427_v20, %v2527_v37  ;;  %v2532_v7 = vunpack.i.h.bf16 %v2530_v43  ;;  %v2536_v40 = vunpack.i.l.bf16 %v2535_v32  ;;  %v2531_v8 = vunpack.i.l.bf16 %v2530_v43 }
 0x163   :  { %v1723_v54 = vmax.f32 %v1419_v6, %v2522_v51  ;;  %v3523_v15 = vadd.f32 %v2392_v45, %v1153_v28  ;;  %v2537_v51 = vunpack.i.h.bf16 %v2535_v32 }
 0x164   :  { %v2128_v55 = vpack.c.bf16 %v1725_v1, %v1724_v62 }
 0x165   :  { %v2123_v22 = vpack.c.bf16 %v1723_v54, %v1722_v5  ;;  %v2393_v3 = vpop.f32.mrb[56].mxu1  ;;  %v2467_v41 = vpop.f32.mrb[56].mxu0  ;;  %v1166_v5 = vadd.f32 %v3485_v52, %v3415_v48 }
 0x166   :  { %2192 = vst [vmem:[%s3613_s4 + $0x18] sm:$0xff] %v2128_v55   ;;  %v1440_v46 = vadd.f32 %v2467_v41, %v3459_v4  ;;  %v2394_v21 = vpop.f32.mrb[57].mxu1  ;;  %v1431_v31 = vpop.f32.mrb[57].mxu0 }
 0x167   :  { %2191 = vst [vmem:[%s3613_s4 + $0x10] sm:$0xff] %v2123_v22   ;;  %v2395_v50 = vadd.f32 %v2394_v21, %v2393_v3  ;;  %v1432_v16 = vadd.f32 %v1431_v31, %v3443_v57  ;;  %v2396_v61 = vpop.f32.mrb[58].mxu1  ;;  %v2468_v44 = vpop.f32.mrb[58].mxu0  ;;  %v2547_v22 = vunpack.i.h.bf16 %v2545_v30  ;;  %v2546_v3 = vunpack.i.l.bf16 %v2545_v30 }
 0x168   :  { %v1443_v4 = vadd.f32 %v2468_v44, %v3461_v34  ;;  %v2397_v49 = vpop.f32.mrb[59].mxu1  ;;  %v1434_v56 = vpop.f32.mrb[59].mxu0  ;;  %v1728_v42 = vmax.f32 %v1440_v46, %v2536_v40  ;;  %v1169_v31 = vadd.f32 %v3489_v60, %v3417_v9 }
 0x169   :  { %v2398_v17 = vadd.f32 %v2397_v49, %v2396_v61  ;;  %v1435_v58 = vadd.f32 %v1434_v56, %v3445_v26  ;;  %v3539_v37 = vadd.f32 %v2395_v50, %v1158_v2  ;;  %v1726_v57 = vmax.f32 %v1432_v16, %v2531_v8  ;;  %v2540_v28 = vpop.permute.xlu0 %2539  ;;  %v2555_v44 = vpop.permute.xlu1 %2554 }
 0x16a   :  { %v1729_v0 = vmax.f32 %v1443_v4, %v2537_v51  ;;  %v2542_v1 = vunpack.i.h.bf16 %v2540_v28  ;;  %v2541_v41 = vunpack.i.l.bf16 %v2540_v28  ;;  %v1174_v49 = vadd.f32 %v3338_v19, %v3431_v23 }
 0x16b   :  { %v1727_v20 = vmax.f32 %v1435_v58, %v2532_v7  ;;  %v3541_v27 = vadd.f32 %v2398_v17, %v1161_v35  ;;  %v1177_v56 = vadd.f32 %v3340_v25, %v3433_v11 }
 0x16c   :  { %v2138_v45 = vpack.c.bf16 %v1729_v0, %v1728_v42  ;;  %v2557_v0 = vunpack.i.h.bf16 %v2555_v44 }
 0x16d   :  { %v2133_v34 = vpack.c.bf16 %v1727_v20, %v1726_v57  ;;  %v2399_v6 = vpop.f32.mrb[60].mxu1  ;;  %v2471_v62 = vpop.f32.mrb[60].mxu0  ;;  %v2556_v57 = vunpack.i.l.bf16 %v2555_v44 }
 0x16e   :  { %2194 = vst [vmem:[%s3613_s4 + $0x28] sm:$0xff] %v2138_v45   ;;  %v1456_v18 = vadd.f32 %v2471_v62, %v3491_v14  ;;  %v2400_v26 = vpop.f32.mrb[61].mxu1  ;;  %v1447_v38 = vpop.f32.mrb[61].mxu0 }
 0x16f   :  { %2193 = vst [vmem:[%s3613_s4 + $0x20] sm:$0xff] %v2133_v34   ;;  %v2401_v54 = vadd.f32 %v2400_v26, %v2399_v6  ;;  %v1448_v32 = vadd.f32 %v1447_v38, %v3475_v24  ;;  %v2402_v43 = vpop.f32.mrb[62].mxu1  ;;  %v2472_v55 = vpop.f32.mrb[62].mxu0 }
 0x170   :  { %v1459_v14 = vadd.f32 %v2472_v55, %v3493_v63  ;;  %v2403_v46 = vpop.f32.mrb[63].mxu1  ;;  %v1450_v21 = vpop.f32.mrb[63].mxu0  ;;  %v1732_v2 = vmax.f32 %v1456_v18, %v2546_v3  ;;  %v1185_v55 = vadd.f32 %v3348_v39, %v3449_v13 }
 0x171   :  { %v2404_v48 = vadd.f32 %v2403_v46, %v2402_v43  ;;  %v1451_v52 = vadd.f32 %v1450_v21, %v3477_v29  ;;  %v1327_v7 = vadd.f32 %v2401_v54, %v1166_v5  ;;  %v1730_v16 = vmax.f32 %v1448_v32, %v2541_v41  ;;  %v2550_v51 = vpop.permute.xlu0 %2549 }
 0x172   :  { %v1733_v50 = vmax.f32 %v1459_v14, %v2547_v22  ;;  %v2551_v19 = vunpack.i.l.bf16 %v2550_v51 }
 0x173   :  { %v1731_v24 = vmax.f32 %v1451_v52, %v2542_v1  ;;  %v1330_v61 = vadd.f32 %v2404_v48, %v1169_v31 }
 0x174   :  { %v2148_v40 = vpack.c.bf16 %v1733_v50, %v1732_v2 }
 0x175   :  { %v2143_v8 = vpack.c.bf16 %v1731_v24, %v1730_v16  ;;  %v2405_v4 = vpop.f32.mrb[64].mxu1  ;;  %v2475_v63 = vpop.f32.mrb[64].mxu0 }
 0x176   :  { %2196 = vst [vmem:[%s3613_s4 + $0x38] sm:$0xff] %v2148_v40   ;;  %v1472_v9 = vadd.f32 %v2475_v63, %v3521_v59  ;;  %v2406_v60 = vpop.f32.mrb[65].mxu1  ;;  %v1463_v29 = vpop.f32.mrb[65].mxu0  ;;  %v2552_v59 = vunpack.i.h.bf16 %v2550_v51 }
 0x177   :  { %2195 = vst [vmem:[%s3613_s4 + $0x30] sm:$0xff] %v2143_v8   ;;  %v2407_v35 = vadd.f32 %v2406_v60, %v2405_v4  ;;  %v1464_v17 = vadd.f32 %v1463_v29, %v3503_v53  ;;  %v2408_v58 = vpop.f32.mrb[66].mxu1  ;;  %v2476_v42 = vpop.f32.mrb[66].mxu0  ;;  %v3620_v29 = vld [vmem:[#allocation5_spill] sm:$0xff] }
 0x178   :  { %v1475_v20 = vadd.f32 %v2476_v42, %v3523_v15  ;;  %v2409_v30 = vpop.f32.mrb[67].mxu1  ;;  %v1466_v28 = vpop.f32.mrb[67].mxu0  ;;  %v1736_v45 = vmax.f32 %v1472_v9, %v2556_v57 }
 0x179   :  { %v2410_v23 = vadd.f32 %v2409_v30, %v2408_v58  ;;  %v1467_v25 = vadd.f32 %v1466_v28, %v3505_v12  ;;  %v1335_v11 = vadd.f32 %v2407_v35, %v1174_v49  ;;  %v1734_v6 = vmax.f32 %v1464_v17, %v2551_v19  ;;  %v2565_v53 = vpop.permute.xlu1 %2564  ;;  %v2560_v26 = vpop.permute.xlu0 %2559  ;;  %v3621_v49 = vld [vmem:[#allocation2_spill] sm:$0xff] }
 0x17a   :  { %v1737_v34 = vmax.f32 %v1475_v20, %v2557_v0  ;;  %v1182_v12 = vadd.f32 %v3346_v33, %v3447_v10  ;;  %v2567_v46 = vunpack.i.h.bf16 %v2565_v53  ;;  %v2566_v21 = vunpack.i.l.bf16 %v2565_v53 }
 0x17b   :  { %v1735_v62 = vmax.f32 %v1467_v25, %v2552_v59  ;;  %v1338_v18 = vadd.f32 %v2410_v23, %v1177_v56  ;;  %v2562_v31 = vunpack.i.h.bf16 %v2560_v26  ;;  %v2561_v2 = vunpack.i.l.bf16 %v2560_v26 }
 0x17c   :  { %v2158_v38 = vpack.c.bf16 %v1737_v34, %v1736_v45  ;;  %v1193_v56 = vadd.f32 %v3621_v49, %v3620_v29 }
 0x17d   :  { %v2153_v1 = vpack.c.bf16 %v1735_v62, %v1734_v6  ;;  %v2411_v5 = vpop.f32.mrb[68].mxu1  ;;  %v2479_v54 = vpop.f32.mrb[68].mxu0 }
 0x17e   :  { %2198 = vst [vmem:[%s3613_s4 + $0x48] sm:$0xff] %v2158_v38   ;;  %v1488_v15 = vadd.f32 %v2479_v54, %v1327_v7  ;;  %v2412_v32 = vpop.f32.mrb[69].mxu1  ;;  %v1479_v43 = vpop.f32.mrb[69].mxu0 }
 0x17f   :  { %2197 = vst [vmem:[%s3613_s4 + $0x40] sm:$0xff] %v2153_v1   ;;  %v2413_v22 = vadd.f32 %v2412_v32, %v2411_v5  ;;  %v1480_v3 = vadd.f32 %v1479_v43, %v3539_v37  ;;  %v2414_v41 = vpop.f32.mrb[70].mxu1  ;;  %v2480_v14 = vpop.f32.mrb[70].mxu0  ;;  %v3623_v32 = vld [vmem:[#allocation3_spill] sm:$0xff] }
 0x180   :  { %v1491_v48 = vadd.f32 %v2480_v14, %v1330_v61  ;;  %v2415_v52 = vpop.f32.mrb[71].mxu1  ;;  %v1482_v7 = vpop.f32.mrb[71].mxu0  ;;  %v1740_v13 = vmax.f32 %v1488_v15, %v2566_v21  ;;  %v3622_v15 = vld [vmem:[#allocation6_spill] sm:$0xff] }
 0x181   :  { %v2416_v33 = vadd.f32 %v2415_v52, %v2414_v41  ;;  %v1483_v10 = vadd.f32 %v1482_v7, %v3541_v27  ;;  %v1343_v39 = vadd.f32 %v2413_v22, %v1182_v12  ;;  %v1738_v16 = vmax.f32 %v1480_v3, %v2561_v2  ;;  %v2575_v51 = vpop.permute.xlu1 %2574  ;;  %v2570_v37 = vpop.permute.xlu0 %2569  ;;  %v3624_v3 = vld [vmem:[#allocation7_spill] sm:$0xff]  ;;  %v3625_v41 = vld [vmem:[#allocation4_spill] sm:$0xff] }
 0x182   :  { %v1741_v50 = vmax.f32 %v1491_v48, %v2567_v46  ;;  %v1190_v27 = vadd.f32 %v3354_v47, %v3463_v36  ;;  %v2577_v0 = vunpack.i.h.bf16 %v2575_v51  ;;  %v2576_v57 = vunpack.i.l.bf16 %v2575_v51 }
 0x183   :  { %v1739_v24 = vmax.f32 %v1483_v10, %v2562_v31  ;;  %v1346_v44 = vadd.f32 %v2416_v33, %v1185_v55  ;;  %v2572_v59 = vunpack.i.h.bf16 %v2570_v37  ;;  %v2571_v19 = vunpack.i.l.bf16 %v2570_v37 }
 0x184   :  { %v2168_v40 = vpack.c.bf16 %v1741_v50, %v1740_v13  ;;  %v1201_v14 = vadd.f32 %v3625_v41, %v3624_v3 }
 0x185   :  { %v2163_v8 = vpack.c.bf16 %v1739_v24, %v1738_v16  ;;  %v2417_v4 = vpop.f32.mrb[72].mxu1  ;;  %v2483_v63 = vpop.f32.mrb[72].mxu0 }
 0x186   :  { %2200 = vst [vmem:[%s3613_s4 + $0x58] sm:$0xff] %v2168_v40   ;;  %v1504_v61 = vadd.f32 %v2483_v63, %v1343_v39  ;;  %v2418_v9 = vpop.f32.mrb[73].mxu1  ;;  %v1495_v60 = vpop.f32.mrb[73].mxu0 }
 0x187   :  { %2199 = vst [vmem:[%s3613_s4 + $0x50] sm:$0xff] %v2163_v8   ;;  %v2419_v35 = vadd.f32 %v2418_v9, %v2417_v4  ;;  %v1496_v17 = vadd.f32 %v1495_v60, %v1335_v11  ;;  %v2420_v58 = vpop.f32.mrb[74].mxu1  ;;  %v2484_v42 = vpop.f32.mrb[74].mxu0 }
 0x188   :  { %v1507_v20 = vadd.f32 %v2484_v42, %v1346_v44  ;;  %v2421_v30 = vpop.f32.mrb[75].mxu1  ;;  %v1498_v28 = vpop.f32.mrb[75].mxu0  ;;  %v1744_v25 = vmax.f32 %v1504_v61, %v2576_v57 }
 0x189   :  { %v2422_v23 = vadd.f32 %v2421_v30, %v2420_v58  ;;  %v1499_v47 = vadd.f32 %v1498_v28, %v1338_v18  ;;  %v1351_v36 = vadd.f32 %v2419_v35, %v1190_v27  ;;  %v1742_v34 = vmax.f32 %v1496_v17, %v2571_v19  ;;  %v2580_v53 = vpop.permute.xlu0 %2579  ;;  %v2585_v33 = vpop.permute.xlu1 %2584 }
 0x18a   :  { %v1745_v45 = vmax.f32 %v1507_v20, %v2577_v0  ;;  %v1198_v18 = vadd.f32 %v3623_v32, %v3622_v15  ;;  %v2582_v46 = vunpack.i.h.bf16 %v2580_v53  ;;  %v2581_v48 = vunpack.i.l.bf16 %v2580_v53 }
 0x18b   :  { %v1743_v6 = vmax.f32 %v1499_v47, %v2572_v59  ;;  %v1354_v62 = vadd.f32 %v2422_v23, %v1193_v56  ;;  %v2587_v16 = vunpack.i.h.bf16 %v2585_v33  ;;  %v2586_v24 = vunpack.i.l.bf16 %v2585_v33 }
 0x18c   :  { %v2178_v26 = vpack.c.bf16 %v1745_v45, %v1744_v25 }
 0x18d   :  { %v2173_v11 = vpack.c.bf16 %v1743_v6, %v1742_v34  ;;  %v2423_v38 = vpop.f32.mrb[76].mxu1  ;;  %v2487_v1 = vpop.f32.mrb[76].mxu0 }
 0x18e   :  { %2202 = vst [vmem:[%s3613_s4 + $0x68] sm:$0xff] %v2178_v26   ;;  %v2424_v5 = vpop.f32.mrb[77].mxu1  ;;  %v1511_v54 = vpop.f32.mrb[77].mxu0 }
 0x18f   :  { %2201 = vst [vmem:[%s3613_s4 + $0x60] sm:$0xff] %v2173_v11   ;;  %v2425_v43 = vadd.f32 %v2424_v5, %v2423_v38  ;;  %v1512_v12 = vadd.f32 %v1511_v54, %v1351_v36  ;;  %v2426_v55 = vpop.f32.mrb[78].mxu1  ;;  %v2488_v22 = vpop.f32.mrb[78].mxu0 }
 0x190   :  { %v2427_v21 = vpop.f32.mrb[79].mxu1  ;;  %v1514_v31 = vpop.f32.mrb[79].mxu0 }
 0x191   :  { %v1359_v52 = vadd.f32 %v2425_v43, %v1198_v18  ;;  %v2428_v7 = vadd.f32 %v2427_v21, %v2426_v55  ;;  %v1515_v2 = vadd.f32 %v1514_v31, %v1354_v62  ;;  %v1746_v39 = vmax.f32 %v1512_v12, %v2581_v48 }
 0x193   :  { %v1520_v10 = vadd.f32 %v2487_v1, %v1359_v52  ;;  %v1362_v13 = vadd.f32 %v2428_v7, %v1201_v14  ;;  %v1747_v50 = vmax.f32 %v1515_v2, %v2582_v46 }
 0x195   :  { %v1523_v44 = vadd.f32 %v2488_v22, %v1362_v13  ;;  %v2183_v51 = vpack.c.bf16 %v1747_v50, %v1746_v39  ;;  %v1748_v37 = vmax.f32 %v1520_v10, %v2586_v24 }
 0x197   :  { %v1749_v40 = vmax.f32 %v1523_v44, %v2587_v16  ;;  %2203 = vst [vmem:[%s3613_s4 + $0x70] sm:$0xff] %v2183_v51  }
 0x199   :  { %v2188_v8 = vpack.c.bf16 %v1749_v40, %v1748_v37 }
 0x19b   :  { %2204 = vst [vmem:[%s3613_s4 + $0x78] sm:$0xff] %v2188_v8  }

// kernel: fcn_forward.22
= control target key start
LH: loop header
LB: loop body
LE: loop exit
PB: predicated region body
PF: predicated region fallthrough
CT: control target
= control target key end

     0   :  { %v1138_v1 = vmov 0   ;;  %vm1140_vm0 = vmmov 0   ;;  %vm845_vm1 = vcmask 1042432   ;;  %vm846_vm2 = vsmask.f32 2304  ;;  %s1409_s1 = inlined_call_operand.vmem [shape: bf16[1152,128], index: 1, kind: input, shape index: {}]   ;;  %s1410_s0 = inlined_call_operand.vmem [shape: bf16[5,1152], index: 0, kind: input, shape index: {}]   ;;  %s1411_s2 = inlined_call_operand.vmem [shape: f32[5,1], index: 2, kind: input, shape index: {}]   ;;  %s1412_s3 = inlined_call_operand.vmem [shape: f32[5,1], index: 3, kind: input, shape index: {}]   ;;  %s1413_s4 = inlined_call_operand.vmem [shape: bf16[5,128], index: 4, kind: output, shape index: {}]  }
   0x1   :  { %v1057_v0 = vld [vmem:[%s1409_s1 + $0x40] sm:$0xff]   ;;  %1056 = vset.pattern.permute.xlu0 %v1138_v1  ;;  %v1061_v5 = vld [vmem:[%s1409_s1 + $0x48] sm:$0xff]   ;;  %v1065_v9 = vld [vmem:[%s1409_s1 + $0x50] sm:$0xff]  }
   0x2   :  { %v1058_v2 = vld [vmem:[%s1409_s1] sm:$0xff]   ;;  %936 = vmatprep.subr.bf16.mxu0 %v1057_v0  ;;  %v1062_v6 = vld [vmem:[%s1409_s1 + $0x8] sm:$0xff]   ;;  %v1066_v10 = vld [vmem:[%s1409_s1 + $0x10] sm:$0xff]  }
   0x3   :  { %v1059_v3 = vld [vmem:[%s1409_s1 + $0xc0] sm:$0xff]   ;;  %937 = vmatpush3.bf16.msra.mxu0 %v1058_v2  ;;  %v1063_v7 = vld [vmem:[%s1409_s1 + $0xc8] sm:$0xff]   ;;  %v1067_v11 = vld [vmem:[%s1409_s1 + $0xd0] sm:$0xff]  }
   0x4   :  { %v1060_v4 = vld [vmem:[%s1409_s1 + $0x80] sm:$0xff]   ;;  %958 = vmatprep.subr.bf16.mxu1 %v1059_v3  ;;  %938 = vmatprep.subr.bf16.mxu0 %v1061_v5  ;;  %v1064_v8 = vld [vmem:[%s1409_s1 + $0x88] sm:$0xff]   ;;  %v1068_v12 = vld [vmem:[%s1409_s1 + $0x90] sm:$0xff]  }
   0x5   :  { %959 = vmatpush3.bf16.msra.mxu1 %v1060_v4  ;;  %v1069_v13 = vld [vmem:[%s1409_s1 + $0x58] sm:$0xff]   ;;  %v1073_v17 = vld [vmem:[%s1409_s1 + $0x60] sm:$0xff]   ;;  %v1077_v21 = vld [vmem:[%s1409_s1 + $0x68] sm:$0xff]  }
   0x6   :  { %960 = vmatprep.subr.bf16.mxu1 %v1063_v7  ;;  %v1070_v14 = vld [vmem:[%s1409_s1 + $0x18] sm:$0xff]   ;;  %v1074_v18 = vld [vmem:[%s1409_s1 + $0x20] sm:$0xff]   ;;  %v1078_v22 = vld [vmem:[%s1409_s1 + $0x28] sm:$0xff]  }
   0x7   :  { %939 = vmatpush3.bf16.msra.mxu0 %v1062_v6  ;;  %v1071_v15 = vld [vmem:[%s1409_s1 + $0xd8] sm:$0xff]   ;;  %v1075_v19 = vld [vmem:[%s1409_s1 + $0xe0] sm:$0xff]   ;;  %v1079_v23 = vld [vmem:[%s1409_s1 + $0xe8] sm:$0xff]  }
   0x8   :  { %940 = vmatprep.subr.bf16.mxu0 %v1065_v9  ;;  %v1072_v16 = vld [vmem:[%s1409_s1 + $0x98] sm:$0xff]   ;;  %v1076_v20 = vld [vmem:[%s1409_s1 + $0xa0] sm:$0xff]   ;;  %v1080_v24 = vld [vmem:[%s1409_s1 + $0xa8] sm:$0xff]  }
   0x9   :  { %961 = vmatpush3.bf16.msra.mxu1 %v1064_v8  ;;  %v1081_v25 = vld [vmem:[%s1409_s1 + $0x70] sm:$0xff]   ;;  %v1085_v29 = vld [vmem:[%s1409_s1 + $0x78] sm:$0xff]   ;;  %v18_v32 = vld [vmem:[%s1410_s0] sm:$0x77] }
   0xa   :  { %962 = vmatprep.subr.bf16.mxu1 %v1067_v11  ;;  %v1082_v26 = vld [vmem:[%s1409_s1 + $0x30] sm:$0xff]   ;;  %v1086_v30 = vld [vmem:[%s1409_s1 + $0x38] sm:$0xff]   ;;  %v855_v33 = vcombine.low %v18_v32, %v18_v32  ;;  %v856_v34 = vcombine.high %v18_v32, %v18_v32  ;;  %v1091_v36 = vld [vmem:[%s1409_s1 + $0x140] sm:$0xff]  }
   0xb   :  { %941 = vmatpush3.bf16.msra.mxu0 %v1066_v10  ;;  %v1083_v27 = vld [vmem:[%s1409_s1 + $0xf0] sm:$0xff]   ;;  %v1087_v31 = vld [vmem:[%s1409_s1 + $0xf8] sm:$0xff]   ;;  %v19_v37 = vld [vmem:[%s1410_s0 + $0x8] sm:$0x77]  ;;  %v1139_v10 = vmov 0.0  }
   0xc   :  { %942 = vmatprep.subr.bf16.mxu0 %v1069_v13  ;;  %v1084_v28 = vld [vmem:[%s1409_s1 + $0xb0] sm:$0xff]   ;;  %v1090_v35 = vld [vmem:[%s1409_s1 + $0xb8] sm:$0xff]   ;;  %669 = vmatprep.mubr.bf16.mxu0 %v856_v34  ;;  %v857_v38 = vcombine.low %v19_v37, %v19_v37  ;;  %v858_v39 = vcombine.high %v19_v37, %v19_v37  ;;  %v1094_v40 = vld [vmem:[%s1409_s1 + $0x100] sm:$0xff]  }
   0xd   :  { %963 = vmatpush3.bf16.msra.mxu1 %v1068_v12  ;;  %v1095_v41 = vld [vmem:[%s1409_s1 + $0x1c0] sm:$0xff]   ;;  %v1097_v43 = vld [vmem:[%s1409_s1 + $0x148] sm:$0xff]   ;;  %v1101_v47 = vld [vmem:[%s1409_s1 + $0x150] sm:$0xff]  }
   0xe   :  { %964 = vmatprep.subr.bf16.mxu1 %v1071_v15  ;;  %709 = vmatprep.mubr.bf16.mxu1 %v858_v39  ;;  %v1096_v42 = vld [vmem:[%s1409_s1 + $0x180] sm:$0xff]   ;;  %v1098_v44 = vld [vmem:[%s1409_s1 + $0x108] sm:$0xff]   ;;  %v1102_v48 = vld [vmem:[%s1409_s1 + $0x110] sm:$0xff]  }
   0xf   :  { %943 = vmatpush3.bf16.msra.mxu0 %v1070_v14  ;;  %v1099_v45 = vld [vmem:[%s1409_s1 + $0x1c8] sm:$0xff]   ;;  %v1103_v49 = vld [vmem:[%s1409_s1 + $0x1d0] sm:$0xff]   ;;  %v1105_v51 = vld [vmem:[%s1409_s1 + $0x158] sm:$0xff]  }
  0x10   :  { %944 = vmatprep.subr.bf16.mxu0 %v1073_v17  ;;  %v1100_v46 = vld [vmem:[%s1409_s1 + $0x188] sm:$0xff]   ;;  %v1104_v50 = vld [vmem:[%s1409_s1 + $0x190] sm:$0xff]   ;;  %v1106_v52 = vld [vmem:[%s1409_s1 + $0x118] sm:$0xff]  }
  0x11   :  { %965 = vmatpush3.bf16.msra.mxu1 %v1072_v16  ;;  %v1107_v53 = vld [vmem:[%s1409_s1 + $0x1d8] sm:$0xff]   ;;  %v1109_v55 = vld [vmem:[%s1409_s1 + $0x160] sm:$0xff]   ;;  %v1113_v59 = vld [vmem:[%s1409_s1 + $0x168] sm:$0xff]  }
  0x12   :  { %966 = vmatprep.subr.bf16.mxu1 %v1075_v19  ;;  %v1108_v54 = vld [vmem:[%s1409_s1 + $0x198] sm:$0xff]   ;;  %v1110_v56 = vld [vmem:[%s1409_s1 + $0x120] sm:$0xff]   ;;  %v1114_v60 = vld [vmem:[%s1409_s1 + $0x128] sm:$0xff]  }
  0x13   :  { %945 = vmatpush3.bf16.msra.mxu0 %v1074_v18  ;;  %v1111_v57 = vld [vmem:[%s1409_s1 + $0x1e0] sm:$0xff]   ;;  %v1115_v61 = vld [vmem:[%s1409_s1 + $0x1e8] sm:$0xff]   ;;  %v1117_v63 = vld [vmem:[%s1409_s1 + $0x170] sm:$0xff]  }
  0x14   :  { %946 = vmatprep.subr.bf16.mxu0 %v1077_v21  ;;  %v1112_v58 = vld [vmem:[%s1409_s1 + $0x1a0] sm:$0xff]   ;;  %v1116_v62 = vld [vmem:[%s1409_s1 + $0x1a8] sm:$0xff]   ;;  %v1118_v0 = vld [vmem:[%s1409_s1 + $0x130] sm:$0xff]  }
  0x15   :  { %967 = vmatpush3.bf16.msra.mxu1 %v1076_v20  ;;  %v1119_v1 = vld [vmem:[%s1409_s1 + $0x1f0] sm:$0xff]   ;;  %v1121_v3 = vld [vmem:[%s1409_s1 + $0x178] sm:$0xff]   ;;  %v1129_v14 = vld [vmem:[%s1409_s1 + $0x200] sm:$0xff]  }
  0x16   :  { %968 = vmatprep.subr.bf16.mxu1 %v1079_v23  ;;  %v1120_v2 = vld [vmem:[%s1409_s1 + $0x1b0] sm:$0xff]   ;;  %v1122_v4 = vld [vmem:[%s1409_s1 + $0x138] sm:$0xff]   ;;  %v1130_v15 = vld [vmem:[%s1409_s1 + $0x208] sm:$0xff]  }
  0x17   :  { %947 = vmatpush3.bf16.msra.mxu0 %v1078_v22  ;;  %v1123_v5 = vld [vmem:[%s1409_s1 + $0x1f8] sm:$0xff]   ;;  %v20_v6 = vld [vmem:[%s1410_s0 + $0x10] sm:$0x77]  ;;  %v167_v17 = vld [vmem:[%s1411_s2] sm:$0x1f] }
  0x18   :  { %948 = vmatprep.subr.bf16.mxu0 %v1081_v25  ;;  %v859_v7 = vcombine.low %v20_v6, %v20_v6  ;;  %v860_v8 = vcombine.high %v20_v6, %v20_v6  ;;  %v1126_v9 = vld [vmem:[%s1409_s1 + $0x1b8] sm:$0xff]   ;;  %v1131_v16 = vld [vmem:[%s1409_s1 + $0x210] sm:$0xff]   ;;  %170 = vperm.xlu0 %1056, %v167_v17   ;;  %v837_v19 = vld [vmem:[%s1412_s3] sm:$0x1f] }
  0x19   :  { %969 = vmatpush3.bf16.msra.mxu1 %v1080_v24  ;;  %v21_v11 = vld [vmem:[%s1410_s0 + $0x18] sm:$0x77]  ;;  %v1133_v20 = vld [vmem:[%s1409_s1 + $0x220] sm:$0xff]   ;;  %v1134_v21 = vld [vmem:[%s1409_s1 + $0x228] sm:$0xff]  }
  0x1a   :  { %970 = vmatprep.subr.bf16.mxu1 %v1083_v27  ;;  %v861_v12 = vcombine.low %v21_v11, %v21_v11  ;;  %v862_v13 = vcombine.high %v21_v11, %v21_v11  ;;  %v1132_v18 = vld [vmem:[%s1409_s1 + $0x218] sm:$0xff]   ;;  %v1135_v22 = vld [vmem:[%s1409_s1 + $0x230] sm:$0xff]   ;;  %v1137_v24 = vld [vmem:[%s1410_s0 + $0x20] ss:$0 sps:$4 sm:$0x77]  }
  0x1b   :  { %949 = vmatpush3.bf16.msra.mxu0 %v1082_v26  ;;  %v1136_v23 = vld [vmem:[%s1409_s1 + $0x238] sm:$0xff]   ;;  %vm847_vm3 = vmand %vm845_vm1, %vm846_vm2 }
  0x1c   :  { %950 = vmatprep.subr.bf16.mxu0 %v1085_v29  ;;  %840 = vperm.xlu0 %1056, %v837_v19  }
  0x1d   :  { %971 = vmatpush3.bf16.msra.mxu1 %v1084_v28 }
  0x1e   :  { %972 = vmatprep.subr.bf16.mxu1 %v1087_v31 }
  0x1f   :  { %951 = vmatpush3.bf16.msra.mxu0 %v1086_v30 }
  0x20   :  { %980 = vmatprep.subr.bf16.mxu0 %v1091_v36 }
  0x21   :  { %973 = vmatpush3.bf16.msra.mxu1 %v1090_v35 }
  0x22   :  { %670 = vmatmul.mubr.bf16.vlgmr.msra.gmra.mrb[0].mxu0 %v855_v33  ;;  %1002 = vmatprep.subr.bf16.mxu1 %v1095_v41 }
  0x23   :  { %981 = vmatpush3.bf16.msra.mxu0 %v1094_v40  ;;  %749 = vmatprep.mubr.bf16.mxu0 %v860_v8 }
  0x24   :  { %710 = vmatmul.mubr.bf16.vlgmr.msra.gmra.mrb[0].mxu1 %v857_v38  ;;  %982 = vmatprep.subr.bf16.mxu0 %v1097_v43 }
  0x25   :  { %1003 = vmatpush3.bf16.msra.mxu1 %v1096_v42  ;;  %789 = vmatprep.mubr.bf16.mxu1 %v862_v13 }
  0x26   :  { %1004 = vmatprep.subr.bf16.mxu1 %v1099_v45 }
  0x27   :  { %983 = vmatpush3.bf16.msra.mxu0 %v1098_v44 }
  0x28   :  { %984 = vmatprep.subr.bf16.mxu0 %v1101_v47 }
  0x29   :  { %1005 = vmatpush3.bf16.msra.mxu1 %v1100_v46 }
  0x2a   :  { %1006 = vmatprep.subr.bf16.mxu1 %v1103_v49 }
  0x2b   :  { %985 = vmatpush3.bf16.msra.mxu0 %v1102_v48 }
  0x2c   :  { %986 = vmatprep.subr.bf16.mxu0 %v1105_v51 }
  0x2d   :  { %1007 = vmatpush3.bf16.msra.mxu1 %v1104_v50 }
  0x2e   :  { %1008 = vmatprep.subr.bf16.mxu1 %v1107_v53 }
  0x2f   :  { %987 = vmatpush3.bf16.msra.mxu0 %v1106_v52 }
  0x30   :  { %988 = vmatprep.subr.bf16.mxu0 %v1109_v55 }
  0x31   :  { %1009 = vmatpush3.bf16.msra.mxu1 %v1108_v54 }
  0x32   :  { %1010 = vmatprep.subr.bf16.mxu1 %v1111_v57  ;;  %v848_v57 = vld [vmem:[%s1413_s4] sm:$0x7] }
  0x33   :  { %989 = vmatpush3.bf16.msra.mxu0 %v1110_v56 }
  0x34   :  { %990 = vmatprep.subr.bf16.mxu0 %v1113_v59 }
  0x35   :  { %1011 = vmatpush3.bf16.msra.mxu1 %v1112_v58 }
  0x36   :  { %1012 = vmatprep.subr.bf16.mxu1 %v1115_v61 }
  0x37   :  { %991 = vmatpush3.bf16.msra.mxu0 %v1114_v60 }
  0x38   :  { %992 = vmatprep.subr.bf16.mxu0 %v1117_v63 }
  0x39   :  { %1013 = vmatpush3.bf16.msra.mxu1 %v1116_v62 }
  0x3a   :  { %1014 = vmatprep.subr.bf16.mxu1 %v1119_v1 }
  0x3b   :  { %993 = vmatpush3.bf16.msra.mxu0 %v1118_v0 }
  0x3c   :  { %994 = vmatprep.subr.bf16.mxu0 %v1121_v3 }
  0x3d   :  { %1015 = vmatpush3.bf16.msra.mxu1 %v1120_v2 }
  0x3e   :  { %1016 = vmatprep.subr.bf16.mxu1 %v1123_v5 }
  0x3f   :  { %995 = vmatpush3.bf16.msra.mxu0 %v1122_v4 }
  0x40   :  { %1033 = vmatprep.subr.bf16.mxu0 %v1139_v10 }
  0x41   :  { %1017 = vmatpush3.bf16.msra.mxu1 %v1126_v9 }
  0x42   :  { %750 = vmatmul.mubr.bf16.vlgmr.msra.gmra.mrb[4].mxu0 %v859_v7 }
  0x43   :  { %1034 = vmatpush3.bf16.msra.mxu0 %v1129_v14  ;;  %1049 = vmatprep.mubr.msk.bf16.mxu0 %vm1140_vm0, %v1139_v10 }
  0x44   :  { %790 = vmatmul.mubr.bf16.vlgmr.msra.gmra.mrb[4].mxu1 %v861_v12  ;;  %1035 = vmatprep.subr.bf16.mxu0 %v1139_v10 }
  0x47   :  { %1036 = vmatpush3.bf16.msra.mxu0 %v1130_v15 }
  0x48   :  { %1037 = vmatprep.subr.bf16.mxu0 %v1139_v10 }
  0x4b   :  { %1038 = vmatpush3.bf16.msra.mxu0 %v1131_v16 }
  0x4c   :  { %1039 = vmatprep.subr.bf16.mxu0 %v1139_v10 }
  0x4f   :  { %1040 = vmatpush3.bf16.msra.mxu0 %v1132_v18 }
  0x50   :  { %1041 = vmatprep.subr.bf16.mxu0 %v1139_v10 }
  0x53   :  { %1042 = vmatpush3.bf16.msra.mxu0 %v1133_v20 }
  0x54   :  { %1043 = vmatprep.subr.bf16.mxu0 %v1139_v10 }
  0x57   :  { %1044 = vmatpush3.bf16.msra.mxu0 %v1134_v21 }
  0x58   :  { %1045 = vmatprep.subr.bf16.mxu0 %v1139_v10 }
  0x5b   :  { %1046 = vmatpush3.bf16.msra.mxu0 %v1135_v22 }
  0x5c   :  { %1047 = vmatprep.subr.bf16.mxu0 %v1139_v10 }
  0x5f   :  { %1048 = vmatpush3.bf16.msra.mxu0 %v1136_v23 }
  0x62   :  { %1050 = vmatmul.mubr.bf16.vlgmr.msra.gmra.mrb[8].mxu0 %v1137_v24 }
  0x97   :  { %v171_v27 = vpop.permute.xlu0 %170 }
  0x9b   :  { %v841_v53 = vpop.permute.xlu0 %840 }
  0xf5   :  { %v952_v25 = vpop.f32.mrb[0].mxu0 }
  0xf6   :  { %v953_v26 = vpop.f32.mrb[1].mxu0 }
  0xf7   :  { %v954_v28 = vadd.f32 %v953_v26, %v952_v25  ;;  %v955_v29 = vpop.f32.mrb[2].mxu0  ;;  %v974_v30 = vpop.f32.mrb[0].mxu1 }
  0xf8   :  { %v956_v31 = vpop.f32.mrb[3].mxu0  ;;  %v975_v32 = vpop.f32.mrb[1].mxu1 }
  0xf9   :  { %v672_v33 = vadd.f32 %v954_v28, %v171_v27  ;;  %v976_v34 = vadd.f32 %v975_v32, %v974_v30  ;;  %v977_v35 = vpop.f32.mrb[2].mxu1 }
  0xfa   :  { %v978_v36 = vpop.f32.mrb[3].mxu1 }
  0xfb   :  { %v712_v37 = vadd.f32 %v976_v34, %v672_v33 }
 0x115   :  { %v996_v38 = vpop.f32.mrb[4].mxu0 }
 0x116   :  { %v997_v39 = vpop.f32.mrb[5].mxu0 }
 0x117   :  { %v998_v40 = vadd.f32 %v997_v39, %v996_v38  ;;  %v999_v41 = vpop.f32.mrb[6].mxu0  ;;  %v1018_v42 = vpop.f32.mrb[4].mxu1 }
 0x118   :  { %v1000_v43 = vpop.f32.mrb[7].mxu0  ;;  %v1019_v44 = vpop.f32.mrb[5].mxu1 }
 0x119   :  { %v752_v45 = vadd.f32 %v998_v40, %v712_v37  ;;  %v1020_v46 = vadd.f32 %v1019_v44, %v1018_v42  ;;  %v1021_v47 = vpop.f32.mrb[6].mxu1 }
 0x11a   :  { %v1022_v48 = vpop.f32.mrb[7].mxu1 }
 0x11b   :  { %v792_v49 = vadd.f32 %v1020_v46, %v752_v45 }
 0x135   :  { %v831_v50 = vpop.f32.mrb[8].mxu0 }
 0x136   :  { %v832_v51 = vadd.f32 %v831_v50, %v792_v49  ;;  %v1051_v52 = vpop.f32.mrb[9].mxu0 }
 0x137   :  { %v834_v54 = vpop.f32.mrb[10].mxu0 }
 0x138   :  { %v843_v55 = vmax.f32 %v832_v51, %v841_v53  ;;  %v1052_v56 = vpop.f32.mrb[11].mxu0 }
 0x13a   :  { %v844_v58 = vpack.c.bf16 %v843_v55, %v843_v55 }
 0x13c   :  { %v849_v59 = vsel %vm847_vm3, %v844_v58, %v848_v57 }
 0x13d   :  { %850 = vst [vmem:[%s1413_s4] sm:$0x7] %v849_v59 }

// kernel: fcn_forward.23
= control target key start
LH: loop header
LB: loop body
LE: loop exit
PB: predicated region body
PF: predicated region fallthrough
CT: control target
= control target key end

     0   :  { %v200_v1 = vmov 0   ;;  %vm63_vm0 = vcmask 261120   ;;  %s264_s1 = inlined_call_operand.vmem [shape: bf16[32,128], index: 1, kind: input, shape index: {}]   ;;  %s265_s0 = inlined_call_operand.vmem [shape: bf16[20,32], index: 0, kind: input, shape index: {}]   ;;  %s266_s2 = inlined_call_operand.vmem [shape: f32[20,1], index: 2, kind: input, shape index: {}]   ;;  %s267_s3 = inlined_call_operand.vmem [shape: f32[20,1], index: 3, kind: input, shape index: {}]   ;;  %s268_s4 = inlined_call_operand.vmem [shape: bf16[20,128], index: 4, kind: output, shape index: {}]  }
   0x1   :  { %v196_v0 = vld [vmem:[%s264_s1] sm:$0xff]   ;;  %189 = vset.pattern.permute.xlu0 %v200_v1  ;;  %190 = vset.pattern.permute.xlu1 %v200_v1  ;;  %v197_v2 = vld [vmem:[%s264_s1 + $0x8] sm:$0xff]   ;;  %v27_v5 = vld [vmem:[%s266_s2 + $0x10] sm:$0xf] }
   0x2   :  { %180 = vmatprep.subr.bf16.mxu0 %v196_v0  ;;  %v198_v3 = vld [vmem:[%s265_s0] sm:$0xff]   ;;  %v26_v6 = vld [vmem:[%s266_s2 + $0x8] sm:$0xff]  ;;  %40 = vperm.xlu1 %190, %v27_v5   ;;  %v120_v11 = vld [vmem:[%s267_s3 + $0x10] sm:$0xf] }
   0x3   :  { %181 = vmatpush3.bf16.msra.mxu0 %v196_v0  ;;  %v25_v4 = vld [vmem:[%s266_s2] sm:$0xff]  ;;  %184 = vmatprep.mubr.msk.bf16.mxu0 %vm63_vm0, %v198_v3  ;;  %v119_v8 = vld [vmem:[%s267_s3 + $0x8] sm:$0xff] }
   0x4   :  { %182 = vmatprep.subr.bf16.mxu0 %v197_v2  ;;  %30 = vperm.xlu0 %189, %v25_v4   ;;  %v118_v7 = vld [vmem:[%s267_s3] sm:$0xff]  ;;  %v199_v9 = vld [vmem:[%s265_s0 + $0x8] ss:$0 sps:$4 sm:$0x33]  }
   0x5   :  { %v191_v10 = vpack.i.bf16 %v119_v8, %v118_v7 }
   0x7   :  { %183 = vmatpush3.bf16.msra.mxu0 %v197_v2  ;;  %192 = vperm.xlu1 %190, %v191_v10  }
   0x8   :  { %35 = vperm.xlu0 %189, %v26_v6  }
   0xa   :  { %185 = vmatmul.mubr.msk.bf16.vlgmr.msra.gmra.mrb[0].mxu0 %vm63_vm0, %v199_v9 }
   0xc   :  { %133 = vperm.xlu0 %189, %v120_v11  }
  0x81   :  { %v41_v13 = vpop.permute.xlu1 %40 }
  0x83   :  { %v31_v12 = vpop.permute.xlu0 %30 }
  0x86   :  { %v193_v16 = vpop.permute.xlu1 %192 }
  0x87   :  { %v36_v14 = vpop.permute.xlu0 %35  ;;  %v195_v24 = vunpack.i.h.bf16 %v193_v16  ;;  %v194_v25 = vunpack.i.l.bf16 %v193_v16 }
  0x8b   :  { %v134_v19 = vpop.permute.xlu0 %133 }
  0xdd   :  { %v186_v15 = vpop.f32.mrb[0].mxu0 }
  0xde   :  { %v113_v17 = vadd.f32 %v186_v15, %v41_v13  ;;  %v104_v18 = vpop.f32.mrb[1].mxu0 }
  0xdf   :  { %v105_v20 = vadd.f32 %v104_v18, %v31_v12  ;;  %v187_v21 = vpop.f32.mrb[2].mxu0 }
  0xe0   :  { %v138_v22 = vmax.f32 %v113_v17, %v134_v19  ;;  %v107_v23 = vpop.f32.mrb[3].mxu0 }
  0xe1   :  { %v108_v26 = vadd.f32 %v107_v23, %v36_v14  ;;  %v136_v28 = vmax.f32 %v105_v20, %v194_v25 }
  0xe2   :  { %v170_v27 = vpack.c.bf16 %v138_v22, %v138_v22 }
  0xe3   :  { %v137_v29 = vmax.f32 %v108_v26, %v195_v24 }
  0xe4   :  { %154 = vst [vmem:[%s268_s4 + $0x8] sm:$0x3] %v170_v27 }
  0xe5   :  { %v174_v30 = vpack.c.bf16 %v137_v29, %v136_v28 }
  0xe7   :  { %175 = vst [vmem:[%s268_s4] sm:$0xff] %v174_v30  }

// kernel: fcn_forward.21
= control target key start
LH: loop header
LB: loop body
LE: loop exit
PB: predicated region body
PF: predicated region fallthrough
CT: control target
= control target key end

     0   :  { %v2631_v1 = vmov 0   ;;  %s3389_s1 = inlined_call_operand.vmem [shape: bf16[1152,128], index: 1, kind: input, shape index: {}]   ;;  %s3390_s0 = inlined_call_operand.vmem [shape: bf16[128,1152], index: 0, kind: input, shape index: {}]   ;;  %s3391_s2 = inlined_call_operand.vmem [shape: f32[128,1], index: 2, kind: input, shape index: {}]   ;;  %s3392_s3 = inlined_call_operand.vmem [shape: f32[128,1], index: 3, kind: input, shape index: {}]   ;;  %s3393_s4 = inlined_call_operand.vmem [shape: bf16[128,128], index: 4, kind: input, shape index: {}]   ;;  %s3394_s5 = inlined_call_operand.vmem [shape: bf16[128,128], index: 5, kind: output, shape index: {}]  }
   0x1   :  { %v2455_v0 = vld [vmem:[%s3389_s1 + $0x40] sm:$0xff]   ;;  %2453 = vset.pattern.permute.xlu0 %v2631_v1  ;;  %2454 = vset.pattern.permute.xlu1 %v2631_v1  ;;  %v2459_v5 = vld [vmem:[%s3389_s1 + $0x48] sm:$0xff]   ;;  %v2463_v9 = vld [vmem:[%s3389_s1 + $0x50] sm:$0xff]  }
   0x2   :  { %v2456_v2 = vld [vmem:[%s3389_s1 + $0xc0] sm:$0xff]   ;;  %2132 = vmatprep.subr.bf16.mxu0 %v2455_v0  ;;  %v2460_v6 = vld [vmem:[%s3389_s1 + $0xc8] sm:$0xff]   ;;  %v2464_v10 = vld [vmem:[%s3389_s1 + $0xd0] sm:$0xff]  }
   0x3   :  { %v2457_v3 = vld [vmem:[%s3389_s1] sm:$0xff]   ;;  %2196 = vmatprep.subr.bf16.mxu1 %v2456_v2  ;;  %v2461_v7 = vld [vmem:[%s3389_s1 + $0x8] sm:$0xff]   ;;  %v2465_v11 = vld [vmem:[%s3389_s1 + $0x10] sm:$0xff]  }
   0x4   :  { %v2458_v4 = vld [vmem:[%s3389_s1 + $0x80] sm:$0xff]   ;;  %2133 = vmatpush3.bf16.msra.mxu0 %v2457_v3  ;;  %v2462_v8 = vld [vmem:[%s3389_s1 + $0x88] sm:$0xff]   ;;  %v2466_v12 = vld [vmem:[%s3389_s1 + $0x90] sm:$0xff]  }
   0x5   :  { %2197 = vmatpush3.bf16.msra.mxu1 %v2458_v4  ;;  %2134 = vmatprep.subr.bf16.mxu0 %v2459_v5  ;;  %v2467_v13 = vld [vmem:[%s3389_s1 + $0x58] sm:$0xff]   ;;  %v2471_v17 = vld [vmem:[%s3389_s1 + $0x60] sm:$0xff]   ;;  %v2475_v21 = vld [vmem:[%s3389_s1 + $0x68] sm:$0xff]  }
   0x6   :  { %2198 = vmatprep.subr.bf16.mxu1 %v2460_v6  ;;  %v2468_v14 = vld [vmem:[%s3389_s1 + $0xd8] sm:$0xff]   ;;  %v2472_v18 = vld [vmem:[%s3389_s1 + $0xe0] sm:$0xff]   ;;  %v2476_v22 = vld [vmem:[%s3389_s1 + $0xe8] sm:$0xff]  }
   0x7   :  { %v2469_v15 = vld [vmem:[%s3389_s1 + $0x18] sm:$0xff]   ;;  %v2473_v19 = vld [vmem:[%s3389_s1 + $0x20] sm:$0xff]   ;;  %v2477_v23 = vld [vmem:[%s3389_s1 + $0x28] sm:$0xff]  }
   0x8   :  { %2135 = vmatpush3.bf16.msra.mxu0 %v2461_v7  ;;  %v2470_v16 = vld [vmem:[%s3389_s1 + $0x98] sm:$0xff]   ;;  %v2474_v20 = vld [vmem:[%s3389_s1 + $0xa0] sm:$0xff]   ;;  %v2478_v24 = vld [vmem:[%s3389_s1 + $0xa8] sm:$0xff]  }
   0x9   :  { %2199 = vmatpush3.bf16.msra.mxu1 %v2462_v8  ;;  %2136 = vmatprep.subr.bf16.mxu0 %v2463_v9  ;;  %v2479_v25 = vld [vmem:[%s3389_s1 + $0x70] sm:$0xff]   ;;  %v2483_v29 = vld [vmem:[%s3389_s1 + $0x78] sm:$0xff]   ;;  %v2487_v33 = vld [vmem:[%s3390_s0] ss:$36 sps:$4 sm:$0xff]  }
   0xa   :  { %2200 = vmatprep.subr.bf16.mxu1 %v2464_v10  ;;  %v2480_v26 = vld [vmem:[%s3389_s1 + $0xf0] sm:$0xff]   ;;  %v2484_v30 = vld [vmem:[%s3389_s1 + $0xf8] sm:$0xff]   ;;  %v2489_v34 = vld [vmem:[%s3390_s0 + $0x4] ss:$36 sps:$4 sm:$0xff]  }
   0xb   :  { %v2481_v27 = vld [vmem:[%s3389_s1 + $0x30] sm:$0xff]   ;;  %v2485_v31 = vld [vmem:[%s3389_s1 + $0x38] sm:$0xff]   ;;  %v2490_v35 = vld [vmem:[%s3390_s0 + $0x8] ss:$36 sps:$4 sm:$0xff]   ;;  %1173 = vmatprep.mubr.bf16.mxu0 %v2489_v34 }
   0xc   :  { %2137 = vmatpush3.bf16.msra.mxu0 %v2465_v11  ;;  %v2482_v28 = vld [vmem:[%s3389_s1 + $0xb0] sm:$0xff]   ;;  %v2486_v32 = vld [vmem:[%s3389_s1 + $0xb8] sm:$0xff]   ;;  %v2493_v37 = vld [vmem:[%s3389_s1 + $0x140] sm:$0xff]  }
   0xd   :  { %2201 = vmatpush3.bf16.msra.mxu1 %v2466_v12  ;;  %2138 = vmatprep.subr.bf16.mxu0 %v2467_v13  ;;  %v2492_v36 = vld [vmem:[%s3390_s0 + $0xc] ss:$36 sps:$4 sm:$0xff]   ;;  %v2494_v38 = vld [vmem:[%s3389_s1 + $0x1c0] sm:$0xff]   ;;  %v2499_v42 = vld [vmem:[%s3390_s0 + $0x54] ss:$36 sps:$4 sm:$0xff]  }
   0xe   :  { %2202 = vmatprep.subr.bf16.mxu1 %v2468_v14  ;;  %1270 = vmatprep.mubr.bf16.mxu1 %v2492_v36  ;;  %v2495_v39 = vld [vmem:[%s3389_s1 + $0x100] sm:$0xff]   ;;  %v2497_v41 = vld [vmem:[%s3390_s0 + $0x4c] ss:$36 sps:$4 sm:$0xff]   ;;  %v2507_v49 = vld [vmem:[%s3390_s0 + $0x94] ss:$36 sps:$4 sm:$0xff]  }
   0xf   :  { %v2496_v40 = vld [vmem:[%s3389_s1 + $0x180] sm:$0xff]   ;;  %v2501_v43 = vld [vmem:[%s3390_s0 + $0x48] ss:$36 sps:$4 sm:$0xff]   ;;  %v2502_v44 = vld [vmem:[%s3390_s0 + $0x50] ss:$36 sps:$4 sm:$0xff]  }
  0x10   :  { %2139 = vmatpush3.bf16.msra.mxu0 %v2469_v15  ;;  %v2503_v45 = vld [vmem:[%s3389_s1 + $0x148] sm:$0xff]   ;;  %v2509_v50 = vld [vmem:[%s3390_s0 + $0x9c] ss:$36 sps:$4 sm:$0xff]   ;;  %v2511_v51 = vld [vmem:[%s3390_s0 + $0x90] ss:$36 sps:$4 sm:$0xff]  }
  0x11   :  { %2203 = vmatpush3.bf16.msra.mxu1 %v2470_v16  ;;  %2140 = vmatprep.subr.bf16.mxu0 %v2471_v17  ;;  %v2504_v46 = vld [vmem:[%s3389_s1 + $0x1c8] sm:$0xff]   ;;  %v2512_v52 = vld [vmem:[%s3390_s0 + $0x98] ss:$36 sps:$4 sm:$0xff]   ;;  %v2513_v53 = vld [vmem:[%s3389_s1 + $0x150] sm:$0xff]  }
  0x12   :  { %2204 = vmatprep.subr.bf16.mxu1 %v2472_v18  ;;  %v2505_v47 = vld [vmem:[%s3389_s1 + $0x108] sm:$0xff]   ;;  %v2514_v54 = vld [vmem:[%s3389_s1 + $0x1d0] sm:$0xff]   ;;  %v2517_v57 = vld [vmem:[%s3390_s0 + $0xdc] ss:$36 sps:$4 sm:$0xff]  }
  0x13   :  { %v2506_v48 = vld [vmem:[%s3389_s1 + $0x188] sm:$0xff]   ;;  %v2515_v55 = vld [vmem:[%s3389_s1 + $0x110] sm:$0xff]   ;;  %v2521_v59 = vld [vmem:[%s3390_s0 + $0xd8] ss:$36 sps:$4 sm:$0xff]  }
  0x14   :  { %2141 = vmatpush3.bf16.msra.mxu0 %v2473_v19  ;;  %v2516_v56 = vld [vmem:[%s3389_s1 + $0x190] sm:$0xff]   ;;  %v2519_v58 = vld [vmem:[%s3390_s0 + $0xe4] ss:$36 sps:$4 sm:$0xff]   ;;  %v2523_v61 = vld [vmem:[%s3389_s1 + $0x158] sm:$0xff]  }
  0x15   :  { %2205 = vmatpush3.bf16.msra.mxu1 %v2474_v20  ;;  %2142 = vmatprep.subr.bf16.mxu0 %v2475_v21  ;;  %v2522_v60 = vld [vmem:[%s3390_s0 + $0xe0] ss:$36 sps:$4 sm:$0xff]   ;;  %v2524_v62 = vld [vmem:[%s3389_s1 + $0x1d8] sm:$0xff]   ;;  %v2529_v2 = vld [vmem:[%s3390_s0 + $0x12c] ss:$36 sps:$4 sm:$0xff]  }
  0x16   :  { %2206 = vmatprep.subr.bf16.mxu1 %v2476_v22  ;;  %v2525_v63 = vld [vmem:[%s3389_s1 + $0x118] sm:$0xff]   ;;  %v2527_v1 = vld [vmem:[%s3390_s0 + $0x124] ss:$36 sps:$4 sm:$0xff]   ;;  %v2537_v9 = vld [vmem:[%s3390_s0 + $0x16c] ss:$36 sps:$4 sm:$0xff]  }
  0x17   :  { %v2526_v0 = vld [vmem:[%s3389_s1 + $0x198] sm:$0xff]   ;;  %v2531_v3 = vld [vmem:[%s3390_s0 + $0x120] ss:$36 sps:$4 sm:$0xff]   ;;  %v2532_v5 = vld [vmem:[%s3390_s0 + $0x128] ss:$36 sps:$4 sm:$0xff]  }
  0x18   :  { %2143 = vmatpush3.bf16.msra.mxu0 %v2477_v23  ;;  %v2533_v4 = vld [vmem:[%s3389_s1 + $0x160] sm:$0xff]   ;;  %v2539_v10 = vld [vmem:[%s3390_s0 + $0x174] ss:$36 sps:$4 sm:$0xff]   ;;  %v2543_v11 = vld [vmem:[%s3389_s1 + $0x168] sm:$0xff]  }
  0x19   :  { %2207 = vmatpush3.bf16.msra.mxu1 %v2478_v24  ;;  %2144 = vmatprep.subr.bf16.mxu0 %v2479_v25  ;;  %v2534_v6 = vld [vmem:[%s3389_s1 + $0x1e0] sm:$0xff]   ;;  %v2544_v12 = vld [vmem:[%s3389_s1 + $0x1e8] sm:$0xff]   ;;  %v2542_v16 = vld [vmem:[%s3390_s0 + $0x170] ss:$36 sps:$4 sm:$0xff]  }
  0x1a   :  { %2208 = vmatprep.subr.bf16.mxu1 %v2480_v26  ;;  %v2535_v7 = vld [vmem:[%s3389_s1 + $0x120] sm:$0xff]   ;;  %v2541_v13 = vld [vmem:[%s3390_s0 + $0x168] ss:$36 sps:$4 sm:$0xff]   ;;  %v2547_v17 = vld [vmem:[%s3390_s0 + $0x1b4] ss:$36 sps:$4 sm:$0xff]  }
  0x1b   :  { %v2536_v8 = vld [vmem:[%s3389_s1 + $0x1a0] sm:$0xff]   ;;  %v2545_v14 = vld [vmem:[%s3389_s1 + $0x128] sm:$0xff]   ;;  %v2553_v19 = vld [vmem:[%s3389_s1 + $0x170] sm:$0xff]  }
  0x1c   :  { %2145 = vmatpush3.bf16.msra.mxu0 %v2481_v27  ;;  %v2546_v15 = vld [vmem:[%s3389_s1 + $0x1a8] sm:$0xff]   ;;  %v2549_v18 = vld [vmem:[%s3390_s0 + $0x1bc] ss:$36 sps:$4 sm:$0xff]   ;;  %v2554_v20 = vld [vmem:[%s3389_s1 + $0x1f0] sm:$0xff]  }
  0x1d   :  { %2209 = vmatpush3.bf16.msra.mxu1 %v2482_v28  ;;  %2146 = vmatprep.subr.bf16.mxu0 %v2483_v29  ;;  %v2555_v21 = vld [vmem:[%s3389_s1 + $0x130] sm:$0xff]   ;;  %v2552_v24 = vld [vmem:[%s3390_s0 + $0x1b8] ss:$36 sps:$4 sm:$0xff]   ;;  %v2559_v26 = vld [vmem:[%s3390_s0 + $0x204] ss:$36 sps:$4 sm:$0xff]  }
  0x1e   :  { %2210 = vmatprep.subr.bf16.mxu1 %v2484_v30  ;;  %v2556_v22 = vld [vmem:[%s3389_s1 + $0x1b0] sm:$0xff]   ;;  %v2557_v25 = vld [vmem:[%s3390_s0 + $0x1fc] ss:$36 sps:$4 sm:$0xff]  }
  0x1f   :  { %v2551_v23 = vld [vmem:[%s3390_s0 + $0x1b0] ss:$36 sps:$4 sm:$0xff]   ;;  %v2563_v27 = vld [vmem:[%s3389_s1 + $0x178] sm:$0xff]  }
  0x20   :  { %2147 = vmatpush3.bf16.msra.mxu0 %v2485_v31  ;;  %v2564_v28 = vld [vmem:[%s3389_s1 + $0x1f8] sm:$0xff]   ;;  %v2567_v36 = vld [vmem:[%s3390_s0 + $0x10] ss:$36 sps:$4 sm:$0xff]  }
  0x21   :  { %2211 = vmatpush3.bf16.msra.mxu1 %v2486_v32  ;;  %2260 = vmatprep.subr.bf16.mxu0 %v2493_v37  ;;  %v2565_v29 = vld [vmem:[%s3389_s1 + $0x138] sm:$0xff]   ;;  %v2562_v32 = vld [vmem:[%s3390_s0 + $0x200] ss:$36 sps:$4 sm:$0xff]  }
  0x22   :  { %2324 = vmatprep.subr.bf16.mxu1 %v2494_v38  ;;  %v2566_v30 = vld [vmem:[%s3389_s1 + $0x1b8] sm:$0xff]   ;;  %v245_v37 = vld [vmem:[%s3391_s2] sm:$0xff] }
  0x23   :  { %1174 = vmatmul.mubr.bf16.vlgmr.msra.gmra.mrb[0].mxu0 %v2487_v33  ;;  %v2561_v31 = vld [vmem:[%s3390_s0 + $0x1f8] ss:$36 sps:$4 sm:$0xff]   ;;  %v2573_v33 = vld [vmem:[%s3389_s1 + $0x200] sm:$0xff]   ;;  %263 = vperm.xlu0 %2453, %v245_v37   ;;  %v2625_v37 = vld [vmem:[%s3390_s0 + $0x68] ss:$36 sps:$4 sm:$0xff]  }
  0x24   :  { %1271 = vmatmul.mubr.bf16.vlgmr.msra.gmra.mrb[0].mxu1 %v2490_v35  ;;  %2261 = vmatpush3.bf16.msra.mxu0 %v2495_v39  ;;  %v2569_v34 = vld [vmem:[%s3390_s0 + $0x14] ss:$36 sps:$4 sm:$0xff]   ;;  %v2572_v35 = vld [vmem:[%s3390_s0 + $0x1c] ss:$36 sps:$4 sm:$0xff]  }
  0x25   :  { %2325 = vmatpush3.bf16.msra.mxu1 %v2496_v40  ;;  %1181 = vmatprep.mubr.bf16.mxu0 %v2497_v41  ;;  %v2570_v38 = vld [vmem:[%s3390_s0 + $0x18] ss:$36 sps:$4 sm:$0xff]   ;;  %v2576_v40 = vld [vmem:[%s3390_s0 + $0x64] ss:$36 sps:$4 sm:$0xff]  }
  0x26   :  { %1278 = vmatprep.mubr.bf16.mxu1 %v2499_v42  ;;  %2262 = vmatprep.subr.bf16.mxu0 %v2503_v45  ;;  %v2574_v39 = vld [vmem:[%s3390_s0 + $0x5c] ss:$36 sps:$4 sm:$0xff]   ;;  %v2580_v41 = vld [vmem:[%s3389_s1 + $0x208] sm:$0xff]   ;;  %v2587_v42 = vld [vmem:[%s3389_s1 + $0x210] sm:$0xff]  }
  0x27   :  { %2326 = vmatprep.subr.bf16.mxu1 %v2504_v46  ;;  %v2578_v45 = vld [vmem:[%s3390_s0 + $0x58] ss:$36 sps:$4 sm:$0xff]   ;;  %v2579_v46 = vld [vmem:[%s3390_s0 + $0x60] ss:$36 sps:$4 sm:$0xff]  }
  0x28   :  { %2263 = vmatpush3.bf16.msra.mxu0 %v2505_v47  ;;  %v2581_v47 = vld [vmem:[%s3390_s0 + $0xa4] ss:$36 sps:$4 sm:$0xff]  }
  0x29   :  { %2327 = vmatpush3.bf16.msra.mxu1 %v2506_v48  ;;  %2264 = vmatprep.subr.bf16.mxu0 %v2513_v53  ;;  %v249_v48 = vld [vmem:[%s3391_s2 + $0x20] sm:$0xff] }
  0x2a   :  { %2328 = vmatprep.subr.bf16.mxu1 %v2514_v54  ;;  %v2601_v53 = vld [vmem:[%s3389_s1 + $0x220] sm:$0xff]  }
  0x2b   :  { %1182 = vmatmul.mubr.bf16.gmra.mrb[4].mxu0 %v2501_v43  ;;  %v246_v43 = vld [vmem:[%s3391_s2 + $0x8] sm:$0xff]  ;;  %v2585_v54 = vld [vmem:[%s3390_s0 + $0xa0] ss:$36 sps:$4 sm:$0xff]  }
  0x2c   :  { %1279 = vmatmul.mubr.bf16.gmra.mrb[4].mxu1 %v2502_v44  ;;  %1189 = vmatprep.mubr.bf16.mxu0 %v2507_v49  ;;  %v247_v44 = vld [vmem:[%s3391_s2 + $0x10] sm:$0xff] }
  0x2d   :  { %1286 = vmatprep.mubr.bf16.mxu1 %v2509_v50  ;;  %2265 = vmatpush3.bf16.msra.mxu0 %v2515_v55  ;;  %v2583_v49 = vld [vmem:[%s3390_s0 + $0xac] ss:$36 sps:$4 sm:$0xff]   ;;  %v2594_v50 = vld [vmem:[%s3389_s1 + $0x218] sm:$0xff]  }
  0x2e   :  { %2329 = vmatpush3.bf16.msra.mxu1 %v2516_v56  ;;  %2266 = vmatprep.subr.bf16.mxu0 %v2523_v61  ;;  %v2586_v55 = vld [vmem:[%s3390_s0 + $0xa8] ss:$36 sps:$4 sm:$0xff]   ;;  %v253_v61 = vld [vmem:[%s3391_s2 + $0x40] sm:$0xff] }
  0x2f   :  { %2330 = vmatprep.subr.bf16.mxu1 %v2524_v62  ;;  %268 = vperm.xlu0 %2453, %v246_v43   ;;  %v2588_v56 = vld [vmem:[%s3390_s0 + $0xec] ss:$36 sps:$4 sm:$0xff]   ;;  %v1638_v43 = vld [vmem:[%s3392_s3 + $0x60] sm:$0xff] }
  0x30   :  { %273 = vperm.xlu1 %2454, %v247_v44   ;;  %v2615_v62 = vld [vmem:[%s3389_s1 + $0x230] sm:$0xff]   ;;  %v1639_v44 = vld [vmem:[%s3392_s3 + $0x68] sm:$0xff] }
  0x31   :  { %2267 = vmatpush3.bf16.msra.mxu0 %v2525_v63  ;;  %v2593_v63 = vld [vmem:[%s3390_s0 + $0xf0] ss:$36 sps:$4 sm:$0xff]  }
  0x32   :  { %2331 = vmatpush3.bf16.msra.mxu1 %v2526_v0  ;;  %2268 = vmatprep.subr.bf16.mxu0 %v2533_v4  ;;  %v2595_v0 = vld [vmem:[%s3390_s0 + $0x134] ss:$36 sps:$4 sm:$0xff]  }
  0x33   :  { %1190 = vmatmul.mubr.bf16.gmra.mrb[8].mxu0 %v2511_v51  ;;  %2332 = vmatprep.subr.bf16.mxu1 %v2534_v6  ;;  %v248_v51 = vld [vmem:[%s3391_s2 + $0x18] sm:$0xff]  ;;  %v255_v4 = vld [vmem:[%s3391_s2 + $0x50] sm:$0xff] }
  0x34   :  { %1287 = vmatmul.mubr.bf16.gmra.mrb[8].mxu1 %v2512_v52  ;;  %1197 = vmatprep.mubr.bf16.mxu0 %v2517_v57  ;;  %v251_v52 = vld [vmem:[%s3391_s2 + $0x30] sm:$0xff] }
  0x35   :  { %1294 = vmatprep.mubr.bf16.mxu1 %v2519_v58  ;;  %2269 = vmatpush3.bf16.msra.mxu0 %v2535_v7  ;;  %v2590_v57 = vld [vmem:[%s3390_s0 + $0xf4] ss:$36 sps:$4 sm:$0xff]   ;;  %v2608_v58 = vld [vmem:[%s3389_s1 + $0x228] sm:$0xff]  }
  0x36   :  { %2333 = vmatpush3.bf16.msra.mxu1 %v2536_v8  ;;  %2270 = vmatprep.subr.bf16.mxu0 %v2543_v11  ;;  %v2599_v6 = vld [vmem:[%s3390_s0 + $0x130] ss:$36 sps:$4 sm:$0xff]   ;;  %v2600_v7 = vld [vmem:[%s3390_s0 + $0x138] ss:$36 sps:$4 sm:$0xff]   ;;  %v257_v11 = vld [vmem:[%s3391_s2 + $0x60] sm:$0xff] }
  0x37   :  { %2334 = vmatprep.subr.bf16.mxu1 %v2544_v12  ;;  %283 = vperm.xlu0 %2453, %v249_v48   ;;  %v2602_v8 = vld [vmem:[%s3390_s0 + $0x17c] ss:$36 sps:$4 sm:$0xff]   ;;  %v258_v12 = vld [vmem:[%s3391_s2 + $0x68] sm:$0xff] }
  0x38   :  { %278 = vperm.xlu1 %2454, %v248_v51   ;;  %v1641_v48 = vld [vmem:[%s3392_s3 + $0x78] sm:$0xff] }
  0x39   :  { %2271 = vmatpush3.bf16.msra.mxu0 %v2545_v14  ;;  %v259_v14 = vld [vmem:[%s3391_s2 + $0x70] sm:$0xff] }
  0x3a   :  { %2335 = vmatpush3.bf16.msra.mxu1 %v2546_v15  ;;  %2272 = vmatprep.subr.bf16.mxu0 %v2553_v19  ;;  %v2607_v15 = vld [vmem:[%s3390_s0 + $0x180] ss:$36 sps:$4 sm:$0xff]  }
  0x3b   :  { %1198 = vmatmul.mubr.bf16.gmra.mrb[12].mxu0 %v2521_v59  ;;  %2336 = vmatprep.subr.bf16.mxu1 %v2554_v20  ;;  %v250_v59 = vld [vmem:[%s3391_s2 + $0x28] sm:$0xff]  ;;  %v1626_v19 = vld [vmem:[%s3392_s3] sm:$0xff] }
  0x3c   :  { %1295 = vmatmul.mubr.bf16.gmra.mrb[12].mxu1 %v2522_v60  ;;  %1205 = vmatprep.mubr.bf16.mxu0 %v2527_v1  ;;  %v2592_v60 = vld [vmem:[%s3390_s0 + $0xe8] ss:$36 sps:$4 sm:$0xff]   ;;  %v2597_v1 = vld [vmem:[%s3390_s0 + $0x13c] ss:$36 sps:$4 sm:$0xff]  }
  0x3d   :  { %1302 = vmatprep.mubr.bf16.mxu1 %v2529_v2  ;;  %2273 = vmatpush3.bf16.msra.mxu0 %v2555_v21  ;;  %v252_v2 = vld [vmem:[%s3391_s2 + $0x38] sm:$0xff]  ;;  %v1627_v20 = vld [vmem:[%s3392_s3 + $0x8] sm:$0xff]  ;;  %v2613_v21 = vld [vmem:[%s3390_s0 + $0x1c0] ss:$36 sps:$4 sm:$0xff]  }
  0x3e   :  { %2337 = vmatpush3.bf16.msra.mxu1 %v2556_v22  ;;  %2274 = vmatprep.subr.bf16.mxu0 %v2563_v27  ;;  %v1628_v22 = vld [vmem:[%s3392_s3 + $0x10] sm:$0xff]  ;;  %v1630_v27 = vld [vmem:[%s3392_s3 + $0x20] sm:$0xff] }
  0x3f   :  { %2338 = vmatprep.subr.bf16.mxu1 %v2564_v28  ;;  %293 = vperm.xlu0 %2453, %v251_v52   ;;  %v1631_v28 = vld [vmem:[%s3392_s3 + $0x28] sm:$0xff] }
  0x40   :  { %288 = vperm.xlu1 %2454, %v250_v59  }
  0x41   :  { %2275 = vmatpush3.bf16.msra.mxu0 %v2565_v29  ;;  %v2620_v29 = vld [vmem:[%s3390_s0 + $0x208] ss:$36 sps:$4 sm:$0xff]  }
  0x42   :  { %2339 = vmatpush3.bf16.msra.mxu1 %v2566_v30  ;;  %2404 = vmatprep.subr.bf16.mxu0 %v2573_v33  ;;  %v1632_v30 = vld [vmem:[%s3392_s3 + $0x30] sm:$0xff] }
  0x43   :  { %1206 = vmatmul.mubr.bf16.gmra.mrb[16].mxu0 %v2531_v3  ;;  %2436 = vmatprep.subr.bf16.mxu1 %v2573_v33  ;;  %v2622_v3 = vld [vmem:[%s3389_s1 + $0x238] sm:$0xff]  }
  0x44   :  { %1303 = vmatmul.mubr.bf16.gmra.mrb[16].mxu1 %v2532_v5  ;;  %1213 = vmatprep.mubr.bf16.mxu0 %v2537_v9  ;;  %v254_v5 = vld [vmem:[%s3391_s2 + $0x48] sm:$0xff] }
  0x45   :  { %1310 = vmatprep.mubr.bf16.mxu1 %v2539_v10  ;;  %303 = vperm.xlu0 %2453, %v253_v61   ;;  %v2604_v9 = vld [vmem:[%s3390_s0 + $0x184] ss:$36 sps:$4 sm:$0xff]   ;;  %v256_v10 = vld [vmem:[%s3391_s2 + $0x58] sm:$0xff] }
  0x46   :  { %298 = vperm.xlu1 %2454, %v252_v2  }
  0x49   :  { %313 = vperm.xlu0 %2453, %v255_v4  }
  0x4a   :  { %308 = vperm.xlu1 %2454, %v254_v5  }
  0x4b   :  { %1214 = vmatmul.mubr.bf16.gmra.mrb[20].mxu0 %v2541_v13  ;;  %v2606_v13 = vld [vmem:[%s3390_s0 + $0x178] ss:$36 sps:$4 sm:$0xff]  }
  0x4c   :  { %1311 = vmatmul.mubr.bf16.gmra.mrb[20].mxu1 %v2542_v16  ;;  %1221 = vmatprep.mubr.bf16.mxu0 %v2547_v17  ;;  %v2609_v16 = vld [vmem:[%s3390_s0 + $0x1c4] ss:$36 sps:$4 sm:$0xff]   ;;  %v2611_v17 = vld [vmem:[%s3390_s0 + $0x1cc] ss:$36 sps:$4 sm:$0xff]  }
  0x4d   :  { %1318 = vmatprep.mubr.bf16.mxu1 %v2549_v18  ;;  %323 = vperm.xlu0 %2453, %v257_v11   ;;  %v260_v18 = vld [vmem:[%s3391_s2 + $0x78] sm:$0xff] }
  0x4e   :  { %318 = vperm.xlu1 %2454, %v256_v10  }
  0x51   :  { %333 = vperm.xlu0 %2453, %v259_v14  }
  0x52   :  { %328 = vperm.xlu1 %2454, %v258_v12  }
  0x53   :  { %1222 = vmatmul.mubr.bf16.gmra.mrb[24].mxu0 %v2551_v23  ;;  %v2614_v23 = vld [vmem:[%s3390_s0 + $0x1c8] ss:$36 sps:$4 sm:$0xff]  }
  0x54   :  { %1319 = vmatmul.mubr.bf16.gmra.mrb[24].mxu1 %v2552_v24  ;;  %1229 = vmatprep.mubr.bf16.mxu0 %v2557_v25  ;;  %v2616_v24 = vld [vmem:[%s3390_s0 + $0x20c] ss:$36 sps:$4 sm:$0xff]   ;;  %v2618_v25 = vld [vmem:[%s3390_s0 + $0x214] ss:$36 sps:$4 sm:$0xff]  }
  0x55   :  { %1326 = vmatprep.mubr.bf16.mxu1 %v2559_v26  ;;  %1644 = vperm.xlu0 %2453, %v1626_v19   ;;  %v1629_v26 = vld [vmem:[%s3392_s3 + $0x18] sm:$0xff] }
  0x56   :  { %338 = vperm.xlu1 %2454, %v260_v18  }
  0x59   :  { %1654 = vperm.xlu0 %2453, %v1628_v22  }
  0x5a   :  { %1649 = vperm.xlu1 %2454, %v1627_v20  }
  0x5b   :  { %1230 = vmatmul.mubr.bf16.gmra.mrb[28].mxu0 %v2561_v31  ;;  %v2621_v31 = vld [vmem:[%s3390_s0 + $0x210] ss:$36 sps:$4 sm:$0xff]  }
  0x5c   :  { %1327 = vmatmul.mubr.bf16.gmra.mrb[28].mxu1 %v2562_v32  ;;  %1367 = vmatprep.mubr.bf16.mxu0 %v2569_v34  ;;  %v2623_v32 = vld [vmem:[%s3390_s0 + $0x20] ss:$36 sps:$4 sm:$0xff]   ;;  %v1633_v34 = vld [vmem:[%s3392_s3 + $0x38] sm:$0xff] }
  0x5d   :  { %1464 = vmatprep.mubr.bf16.mxu1 %v2572_v35  ;;  %1664 = vperm.xlu0 %2453, %v1630_v27   ;;  %v1634_v35 = vld [vmem:[%s3392_s3 + $0x40] sm:$0xff] }
  0x5e   :  { %1659 = vperm.xlu1 %2454, %v1629_v26  }
  0x61   :  { %1674 = vperm.xlu0 %2453, %v1632_v30  }
  0x62   :  { %1669 = vperm.xlu1 %2454, %v1631_v28  }
  0x63   :  { %1368 = vmatmul.mubr.bf16.vlgmr.msra.gmra.mrb[32].mxu0 %v2567_v36  ;;  %v1635_v36 = vld [vmem:[%s3392_s3 + $0x48] sm:$0xff] }
  0x64   :  { %1465 = vmatmul.mubr.bf16.vlgmr.msra.gmra.mrb[32].mxu1 %v2570_v38  ;;  %2405 = vmatpush3.bf16.msra.mxu0 %v2573_v33  ;;  %v1636_v38 = vld [vmem:[%s3392_s3 + $0x50] sm:$0xff] }
  0x65   :  { %2444 = vmatpush3.bf16.msra.mxu1 %v2573_v33  ;;  %1375 = vmatprep.mubr.bf16.mxu0 %v2574_v39  ;;  %v2624_v33 = vld [vmem:[%s3390_s0 + $0x140] ss:$36 sps:$4 sm:$0xff]   ;;  %v2626_v39 = vld [vmem:[%s3390_s0 + $0x188] ss:$36 sps:$4 sm:$0xff]  }
  0x66   :  { %1472 = vmatprep.mubr.bf16.mxu1 %v2576_v40  ;;  %2406 = vmatprep.subr.bf16.mxu0 %v2580_v41  ;;  %v2627_v40 = vld [vmem:[%s3390_s0 + $0xb0] ss:$36 sps:$4 sm:$0xff]  }
  0x67   :  { %2437 = vmatprep.subr.bf16.mxu1 %v2580_v41  ;;  %1679 = vperm.xlu1 %2454, %v1633_v34  }
  0x68   :  { %2407 = vmatpush3.bf16.msra.mxu0 %v2580_v41  ;;  %1684 = vperm.xlu0 %2453, %v1634_v35  }
  0x69   :  { %2445 = vmatpush3.bf16.msra.mxu1 %v2580_v41  ;;  %2408 = vmatprep.subr.bf16.mxu0 %v2587_v42  ;;  %v2628_v41 = vld [vmem:[%s3390_s0 + $0x1d0] ss:$36 sps:$4 sm:$0xff]  }
  0x6a   :  { %2438 = vmatprep.subr.bf16.mxu1 %v2587_v42 }
  0x6b   :  { %1376 = vmatmul.mubr.bf16.gmra.mrb[36].mxu0 %v2578_v45  ;;  %1689 = vperm.xlu1 %2454, %v1635_v36   ;;  %v2629_v45 = vld [vmem:[%s3390_s0 + $0xf8] ss:$36 sps:$4 sm:$0xff]  }
  0x6c   :  { %1473 = vmatmul.mubr.bf16.gmra.mrb[36].mxu1 %v2579_v46  ;;  %1383 = vmatprep.mubr.bf16.mxu0 %v2581_v47  ;;  %v1640_v46 = vld [vmem:[%s3392_s3 + $0x70] sm:$0xff]  ;;  %v2630_v47 = vld [vmem:[%s3390_s0 + $0x218] ss:$36 sps:$4 sm:$0xff]  }
  0x6d   :  { %1480 = vmatprep.mubr.bf16.mxu1 %v2583_v49  ;;  %2409 = vmatpush3.bf16.msra.mxu0 %v2587_v42 }
  0x6e   :  { %2446 = vmatpush3.bf16.msra.mxu1 %v2587_v42  ;;  %2410 = vmatprep.subr.bf16.mxu0 %v2594_v50  ;;  %v1637_v42 = vld [vmem:[%s3392_s3 + $0x58] sm:$0xff] }
  0x6f   :  { %2439 = vmatprep.subr.bf16.mxu1 %v2594_v50  ;;  %1694 = vperm.xlu0 %2453, %v1636_v38  }
  0x70   :  { %1699 = vperm.xlu1 %2454, %v1637_v42  }
  0x71   :  { %2411 = vmatpush3.bf16.msra.mxu0 %v2594_v50 }
  0x72   :  { %2447 = vmatpush3.bf16.msra.mxu1 %v2594_v50  ;;  %2412 = vmatprep.subr.bf16.mxu0 %v2601_v53 }
  0x73   :  { %1384 = vmatmul.mubr.bf16.gmra.mrb[40].mxu0 %v2585_v54  ;;  %2440 = vmatprep.subr.bf16.mxu1 %v2601_v53 }
  0x74   :  { %1481 = vmatmul.mubr.bf16.gmra.mrb[40].mxu1 %v2586_v55  ;;  %1391 = vmatprep.mubr.bf16.mxu0 %v2588_v56 }
  0x75   :  { %1488 = vmatprep.mubr.bf16.mxu1 %v2590_v57  ;;  %2413 = vmatpush3.bf16.msra.mxu0 %v2601_v53 }
  0x76   :  { %2448 = vmatpush3.bf16.msra.mxu1 %v2601_v53  ;;  %2414 = vmatprep.subr.bf16.mxu0 %v2608_v58 }
  0x77   :  { %2441 = vmatprep.subr.bf16.mxu1 %v2608_v58  ;;  %1704 = vperm.xlu0 %2453, %v1638_v43  }
  0x78   :  { %1709 = vperm.xlu1 %2454, %v1639_v44  }
  0x79   :  { %2415 = vmatpush3.bf16.msra.mxu0 %v2608_v58 }
  0x7a   :  { %2449 = vmatpush3.bf16.msra.mxu1 %v2608_v58  ;;  %2416 = vmatprep.subr.bf16.mxu0 %v2615_v62 }
  0x7b   :  { %1392 = vmatmul.mubr.bf16.gmra.mrb[44].mxu0 %v2592_v60  ;;  %2442 = vmatprep.subr.bf16.mxu1 %v2615_v62 }
  0x7c   :  { %1489 = vmatmul.mubr.bf16.gmra.mrb[44].mxu1 %v2593_v63  ;;  %1399 = vmatprep.mubr.bf16.mxu0 %v2595_v0 }
  0x7d   :  { %1496 = vmatprep.mubr.bf16.mxu1 %v2597_v1  ;;  %2417 = vmatpush3.bf16.msra.mxu0 %v2615_v62 }
  0x7e   :  { %2450 = vmatpush3.bf16.msra.mxu1 %v2615_v62  ;;  %2418 = vmatprep.subr.bf16.mxu0 %v2622_v3 }
  0x7f   :  { %2443 = vmatprep.subr.bf16.mxu1 %v2622_v3  ;;  %1714 = vperm.xlu0 %2453, %v1640_v46  }
  0x80   :  { %1719 = vperm.xlu1 %2454, %v1641_v48  }
  0x81   :  { %2419 = vmatpush3.bf16.msra.mxu0 %v2622_v3 }
  0x82   :  { %2451 = vmatpush3.bf16.msra.mxu1 %v2622_v3 }
  0x83   :  { %1400 = vmatmul.mubr.bf16.gmra.mrb[48].mxu0 %v2599_v6 }
  0x84   :  { %1497 = vmatmul.mubr.bf16.gmra.mrb[48].mxu1 %v2600_v7  ;;  %1407 = vmatprep.mubr.bf16.mxu0 %v2602_v8 }
  0x85   :  { %1504 = vmatprep.mubr.bf16.mxu1 %v2604_v9 }
  0x8b   :  { %1408 = vmatmul.mubr.bf16.gmra.mrb[52].mxu0 %v2606_v13 }
  0x8c   :  { %1505 = vmatmul.mubr.bf16.gmra.mrb[52].mxu1 %v2607_v15  ;;  %1415 = vmatprep.mubr.bf16.mxu0 %v2609_v16 }
  0x8d   :  { %1512 = vmatprep.mubr.bf16.mxu1 %v2611_v17 }
  0x93   :  { %1416 = vmatmul.mubr.bf16.gmra.mrb[56].mxu0 %v2613_v21 }
  0x94   :  { %1513 = vmatmul.mubr.bf16.gmra.mrb[56].mxu1 %v2614_v23  ;;  %1423 = vmatprep.mubr.bf16.mxu0 %v2616_v24 }
  0x95   :  { %1520 = vmatprep.mubr.bf16.mxu1 %v2618_v25 }
  0x9b   :  { %1424 = vmatmul.mubr.bf16.gmra.mrb[60].mxu0 %v2620_v29 }
  0x9c   :  { %1521 = vmatmul.mubr.bf16.gmra.mrb[60].mxu1 %v2621_v31  ;;  %2420 = vmatprep.mubr.bf16.mxu0 %v2623_v32 }
  0x9d   :  { %2428 = vmatprep.mubr.bf16.mxu1 %v2624_v33 }
  0xa2   :  { %v264_v49 = vpop.permute.xlu0 %263 }
  0xa3   :  { %2421 = vmatmul.mubr.bf16.vlgmr.msra.gmra.mrb[64].mxu0 %v2625_v37 }
  0xa4   :  { %2429 = vmatmul.mubr.bf16.vlgmr.msra.gmra.mrb[64].mxu1 %v2626_v39  ;;  %2424 = vmatprep.mubr.bf16.mxu0 %v2627_v40 }
  0xa5   :  { %2432 = vmatprep.mubr.bf16.mxu1 %v2628_v41 }
  0xab   :  { %2425 = vmatmul.mubr.bf16.gmra.mrb[68].mxu0 %v2629_v45 }
  0xac   :  { %2433 = vmatmul.mubr.bf16.gmra.mrb[68].mxu1 %v2630_v47 }
  0xae   :  { %v269_v50 = vpop.permute.xlu0 %268 }
  0xaf   :  { %v274_v52 = vpop.permute.xlu1 %273 }
  0xb6   :  { %v284_v20 = vpop.permute.xlu0 %283 }
  0xb7   :  { %v279_v5 = vpop.permute.xlu1 %278 }
  0xbe   :  { %v294_v38 = vpop.permute.xlu0 %293 }
  0xbf   :  { %v289_v23 = vpop.permute.xlu1 %288 }
  0xc5   :  { %v299_v41 = vpop.permute.xlu1 %298 }
  0xf6   :  { %v2148_v51 = vpop.f32.mrb[0].mxu0 }
  0xf7   :  { %v2212_v53 = vpop.f32.mrb[0].mxu1  ;;  %v2149_v54 = vpop.f32.mrb[1].mxu0 }
  0xf8   :  { %v2150_v55 = vadd.f32 %v2149_v54, %v2148_v51  ;;  %v2213_v56 = vpop.f32.mrb[1].mxu1  ;;  %v2151_v57 = vpop.f32.mrb[2].mxu0 }
  0xf9   :  { %v2214_v58 = vadd.f32 %v2213_v56, %v2212_v53  ;;  %v2215_v59 = vpop.f32.mrb[2].mxu1  ;;  %v2152_v60 = vpop.f32.mrb[3].mxu0 }
  0xfa   :  { %v1176_v61 = vadd.f32 %v2150_v55, %v264_v49  ;;  %v2153_v62 = vadd.f32 %v2152_v60, %v2151_v57  ;;  %v2216_v63 = vpop.f32.mrb[3].mxu1  ;;  %v304_v56 = vpop.permute.xlu0 %303 }
  0xfb   :  { %v2217_v0 = vadd.f32 %v2216_v63, %v2215_v59  ;;  %v309_v59 = vpop.permute.xlu1 %308 }
  0xfc   :  { %v3190_v1 = vadd.f32 %v2214_v58, %v1176_v61  ;;  %v1179_v2 = vadd.f32 %v2153_v62, %v269_v50 }
  0xfe   :  { %v3192_v3 = vadd.f32 %v2217_v0, %v1179_v2  ;;  %v2154_v4 = vpop.f32.mrb[4].mxu0 }
  0xff   :  { %v2218_v6 = vpop.f32.mrb[4].mxu1  ;;  %v2155_v7 = vpop.f32.mrb[5].mxu0 }
 0x100   :  { %v2156_v8 = vadd.f32 %v2155_v7, %v2154_v4  ;;  %v2219_v9 = vpop.f32.mrb[5].mxu1  ;;  %v2157_v10 = vpop.f32.mrb[6].mxu0 }
 0x101   :  { %v2220_v11 = vadd.f32 %v2219_v9, %v2218_v6  ;;  %v2221_v12 = vpop.f32.mrb[6].mxu1  ;;  %v2158_v13 = vpop.f32.mrb[7].mxu0 }
 0x102   :  { %v1184_v14 = vadd.f32 %v2156_v8, %v274_v52  ;;  %v2159_v15 = vadd.f32 %v2158_v13, %v2157_v10  ;;  %v2222_v16 = vpop.f32.mrb[7].mxu1 }
 0x103   :  { %v2223_v17 = vadd.f32 %v2222_v16, %v2221_v12 }
 0x104   :  { %v3194_v18 = vadd.f32 %v2220_v11, %v1184_v14  ;;  %v1187_v19 = vadd.f32 %v2159_v15, %v279_v5  ;;  %v314_v14 = vpop.permute.xlu0 %313 }
 0x106   :  { %v3196_v21 = vadd.f32 %v2223_v17, %v1187_v19  ;;  %v2160_v22 = vpop.f32.mrb[8].mxu0 }
 0x107   :  { %v2224_v24 = vpop.f32.mrb[8].mxu1  ;;  %v2161_v25 = vpop.f32.mrb[9].mxu0 }
 0x108   :  { %v2162_v26 = vadd.f32 %v2161_v25, %v2160_v22  ;;  %v2225_v27 = vpop.f32.mrb[9].mxu1  ;;  %v2163_v28 = vpop.f32.mrb[10].mxu0 }
 0x109   :  { %v2226_v29 = vadd.f32 %v2225_v27, %v2224_v24  ;;  %v2227_v30 = vpop.f32.mrb[10].mxu1  ;;  %v2164_v31 = vpop.f32.mrb[11].mxu0 }
 0x10a   :  { %v1192_v32 = vadd.f32 %v2162_v26, %v284_v20  ;;  %v2165_v33 = vadd.f32 %v2164_v31, %v2163_v28  ;;  %v2228_v34 = vpop.f32.mrb[11].mxu1  ;;  %v319_v28 = vpop.permute.xlu1 %318 }
 0x10b   :  { %v2229_v35 = vadd.f32 %v2228_v34, %v2227_v30 }
 0x10c   :  { %v3198_v36 = vadd.f32 %v2226_v29, %v1192_v32  ;;  %v1195_v37 = vadd.f32 %v2165_v33, %v289_v23  ;;  %v324_v33 = vpop.permute.xlu0 %323 }
 0x10e   :  { %v3200_v39 = vadd.f32 %v2229_v35, %v1195_v37  ;;  %v2166_v40 = vpop.f32.mrb[12].mxu0 }
 0x10f   :  { %v2230_v42 = vpop.f32.mrb[12].mxu1  ;;  %v2167_v43 = vpop.f32.mrb[13].mxu0 }
 0x110   :  { %v2168_v44 = vadd.f32 %v2167_v43, %v2166_v40  ;;  %v2231_v45 = vpop.f32.mrb[13].mxu1  ;;  %v2169_v46 = vpop.f32.mrb[14].mxu0 }
 0x111   :  { %v2232_v47 = vadd.f32 %v2231_v45, %v2230_v42  ;;  %v2233_v48 = vpop.f32.mrb[14].mxu1  ;;  %v2170_v49 = vpop.f32.mrb[15].mxu0 }
 0x112   :  { %v1200_v50 = vadd.f32 %v2168_v44, %v294_v38  ;;  %v2171_v51 = vadd.f32 %v2170_v49, %v2169_v46  ;;  %v2234_v52 = vpop.f32.mrb[15].mxu1 }
 0x113   :  { %v2235_v53 = vadd.f32 %v2234_v52, %v2233_v48  ;;  %v329_v48 = vpop.permute.xlu1 %328  ;;  %v334_v52 = vpop.permute.xlu0 %333 }
 0x114   :  { %v3202_v54 = vadd.f32 %v2232_v47, %v1200_v50  ;;  %v1203_v55 = vadd.f32 %v2171_v51, %v299_v41 }
 0x116   :  { %v3204_v57 = vadd.f32 %v2235_v53, %v1203_v55  ;;  %v2172_v58 = vpop.f32.mrb[16].mxu0 }
 0x117   :  { %v2236_v60 = vpop.f32.mrb[16].mxu1  ;;  %v2173_v61 = vpop.f32.mrb[17].mxu0 }
 0x118   :  { %v2174_v62 = vadd.f32 %v2173_v61, %v2172_v58  ;;  %v2237_v63 = vpop.f32.mrb[17].mxu1  ;;  %v2175_v0 = vpop.f32.mrb[18].mxu0 }
 0x119   :  { %v2238_v2 = vadd.f32 %v2237_v63, %v2236_v60  ;;  %v2239_v4 = vpop.f32.mrb[18].mxu1  ;;  %v2176_v5 = vpop.f32.mrb[19].mxu0 }
 0x11a   :  { %v1208_v6 = vadd.f32 %v2174_v62, %v304_v56  ;;  %v2177_v7 = vadd.f32 %v2176_v5, %v2175_v0  ;;  %v2240_v8 = vpop.f32.mrb[19].mxu1 }
 0x11b   :  { %v2241_v9 = vadd.f32 %v2240_v8, %v2239_v4 }
 0x11c   :  { %v3206_v10 = vadd.f32 %v2238_v2, %v1208_v6  ;;  %v1211_v11 = vadd.f32 %v2177_v7, %v309_v59  ;;  %v339_v6 = vpop.permute.xlu1 %338 }
 0x11e   :  { %v3208_v12 = vadd.f32 %v2241_v9, %v1211_v11  ;;  %v2178_v13 = vpop.f32.mrb[20].mxu0 }
 0x11f   :  { %v2242_v15 = vpop.f32.mrb[20].mxu1  ;;  %v2179_v16 = vpop.f32.mrb[21].mxu0 }
 0x120   :  { %v2180_v17 = vadd.f32 %v2179_v16, %v2178_v13  ;;  %v2243_v19 = vpop.f32.mrb[21].mxu1  ;;  %v2181_v20 = vpop.f32.mrb[22].mxu0 }
 0x121   :  { %v2244_v22 = vadd.f32 %v2243_v19, %v2242_v15  ;;  %v2245_v23 = vpop.f32.mrb[22].mxu1  ;;  %v2182_v24 = vpop.f32.mrb[23].mxu0 }
 0x122   :  { %v1216_v25 = vadd.f32 %v2180_v17, %v314_v14  ;;  %v2183_v26 = vadd.f32 %v2182_v24, %v2181_v20  ;;  %v2246_v27 = vpop.f32.mrb[23].mxu1 }
 0x123   :  { %v2247_v29 = vadd.f32 %v2246_v27, %v2245_v23 }
 0x124   :  { %v3210_v30 = vadd.f32 %v2244_v22, %v1216_v25  ;;  %v1219_v31 = vadd.f32 %v2183_v26, %v319_v28 }
 0x126   :  { %v3212_v32 = vadd.f32 %v2247_v29, %v1219_v31  ;;  %v2184_v34 = vpop.f32.mrb[24].mxu0 }
 0x127   :  { %v2248_v35 = vpop.f32.mrb[24].mxu1  ;;  %v2185_v37 = vpop.f32.mrb[25].mxu0 }
 0x128   :  { %v2186_v38 = vadd.f32 %v2185_v37, %v2184_v34  ;;  %v2249_v40 = vpop.f32.mrb[25].mxu1  ;;  %v2187_v41 = vpop.f32.mrb[26].mxu0 }
 0x129   :  { %v2250_v42 = vadd.f32 %v2249_v40, %v2248_v35  ;;  %v2251_v43 = vpop.f32.mrb[26].mxu1  ;;  %v2188_v44 = vpop.f32.mrb[27].mxu0 }
 0x12a   :  { %v1224_v45 = vadd.f32 %v2186_v38, %v324_v33  ;;  %v2189_v46 = vadd.f32 %v2188_v44, %v2187_v41  ;;  %v2252_v47 = vpop.f32.mrb[27].mxu1 }
 0x12b   :  { %v2253_v49 = vadd.f32 %v2252_v47, %v2251_v43 }
 0x12c   :  { %v3214_v50 = vadd.f32 %v2250_v42, %v1224_v45  ;;  %v1227_v51 = vadd.f32 %v2189_v46, %v329_v48  ;;  %v3232_v48 = vpop.permute.xlu0 %1644 }
 0x12e   :  { %v3216_v53 = vadd.f32 %v2253_v49, %v1227_v51  ;;  %v2190_v55 = vpop.f32.mrb[28].mxu0 }
 0x12f   :  { %v2254_v56 = vpop.f32.mrb[28].mxu1  ;;  %v2191_v58 = vpop.f32.mrb[29].mxu0 }
 0x130   :  { %v2192_v59 = vadd.f32 %v2191_v58, %v2190_v55  ;;  %v2255_v60 = vpop.f32.mrb[29].mxu1  ;;  %v2193_v61 = vpop.f32.mrb[30].mxu0 }
 0x131   :  { %v2256_v62 = vadd.f32 %v2255_v60, %v2254_v56  ;;  %v2257_v63 = vpop.f32.mrb[30].mxu1  ;;  %v2194_v0 = vpop.f32.mrb[31].mxu0 }
 0x132   :  { %v1232_v2 = vadd.f32 %v2192_v59, %v334_v52  ;;  %v2195_v4 = vadd.f32 %v2194_v0, %v2193_v61  ;;  %v2258_v5 = vpop.f32.mrb[31].mxu1 }
 0x133   :  { %v2259_v7 = vadd.f32 %v2258_v5, %v2257_v63  ;;  %v3240_v5 = vpop.permute.xlu1 %1649 }
 0x134   :  { %v3218_v8 = vadd.f32 %v2256_v62, %v1232_v2  ;;  %v1235_v9 = vadd.f32 %v2195_v4, %v339_v6  ;;  %v3242_v6 = vpop.permute.xlu0 %1654 }
 0x136   :  { %v3220_v11 = vadd.f32 %v2259_v7, %v1235_v9  ;;  %v2276_v13 = vpop.f32.mrb[32].mxu0 }
 0x137   :  { %v2340_v14 = vpop.f32.mrb[32].mxu1  ;;  %v2277_v15 = vpop.f32.mrb[33].mxu0 }
 0x138   :  { %v2278_v16 = vadd.f32 %v2277_v15, %v2276_v13  ;;  %v2341_v17 = vpop.f32.mrb[33].mxu1  ;;  %v2279_v19 = vpop.f32.mrb[34].mxu0 }
 0x139   :  { %v2342_v20 = vadd.f32 %v2341_v17, %v2340_v14  ;;  %v2343_v22 = vpop.f32.mrb[34].mxu1  ;;  %v2280_v23 = vpop.f32.mrb[35].mxu0 }
 0x13a   :  { %v1370_v24 = vadd.f32 %v2278_v16, %v3190_v1  ;;  %v2281_v25 = vadd.f32 %v2280_v23, %v2279_v19  ;;  %v2344_v26 = vpop.f32.mrb[35].mxu1 }
 0x13b   :  { %v2345_v27 = vadd.f32 %v2344_v26, %v2343_v22 }
 0x13c   :  { %v1373_v28 = vadd.f32 %v2281_v25, %v3192_v3  ;;  %v3224_v29 = vadd.f32 %v2342_v20, %v1370_v24 }
 0x13e   :  { %v2282_v31 = vpop.f32.mrb[36].mxu0  ;;  %v3226_v33 = vadd.f32 %v2345_v27, %v1373_v28  ;;  %v3250_v27 = vpop.permute.xlu1 %1659 }
 0x13f   :  { %v2346_v34 = vpop.f32.mrb[36].mxu1  ;;  %v2283_v35 = vpop.f32.mrb[37].mxu0 }
 0x140   :  { %v2284_v37 = vadd.f32 %v2283_v35, %v2282_v31  ;;  %v2347_v38 = vpop.f32.mrb[37].mxu1  ;;  %v2285_v40 = vpop.f32.mrb[38].mxu0 }
 0x141   :  { %v2348_v41 = vadd.f32 %v2347_v38, %v2346_v34  ;;  %v2349_v42 = vpop.f32.mrb[38].mxu1  ;;  %v2286_v43 = vpop.f32.mrb[39].mxu0 }
 0x142   :  { %v1378_v1 = vadd.f32 %v2284_v37, %v3194_v18  ;;  %v2287_v44 = vadd.f32 %v2286_v43, %v2285_v40  ;;  %v2350_v45 = vpop.f32.mrb[39].mxu1  ;;  %v3252_v28 = vpop.permute.xlu0 %1664 }
 0x143   :  { %v2351_v46 = vadd.f32 %v2350_v45, %v2349_v42 }
 0x144   :  { %v1381_v3 = vadd.f32 %v2287_v44, %v3196_v21  ;;  %v3230_v47 = vadd.f32 %v2348_v41, %v1378_v1 }
 0x146   :  { %v2288_v49 = vpop.f32.mrb[40].mxu0  ;;  %v3234_v51 = vadd.f32 %v2351_v46, %v1381_v3 }
 0x147   :  { %v2352_v52 = vpop.f32.mrb[40].mxu1  ;;  %v2289_v55 = vpop.f32.mrb[41].mxu0 }
 0x148   :  { %v2290_v56 = vadd.f32 %v2289_v55, %v2288_v49  ;;  %v2353_v58 = vpop.f32.mrb[41].mxu1  ;;  %v2291_v59 = vpop.f32.mrb[42].mxu0 }
 0x149   :  { %v2354_v60 = vadd.f32 %v2353_v58, %v2352_v52  ;;  %v2355_v61 = vpop.f32.mrb[42].mxu1  ;;  %v2292_v18 = vpop.f32.mrb[43].mxu0 }
 0x14a   :  { %v1386_v62 = vadd.f32 %v2290_v56, %v3198_v36  ;;  %v2293_v63 = vadd.f32 %v2292_v18, %v2291_v59  ;;  %v2356_v0 = vpop.f32.mrb[43].mxu1  ;;  %v3260_v49 = vpop.permute.xlu1 %1669 }
 0x14b   :  { %v2357_v21 = vadd.f32 %v2356_v0, %v2355_v61  ;;  %v3262_v52 = vpop.permute.xlu0 %1674 }
 0x14c   :  { %v1389_v2 = vadd.f32 %v2293_v63, %v3200_v39  ;;  %v3238_v4 = vadd.f32 %v2354_v60, %v1386_v62 }
 0x14e   :  { %v2294_v7 = vpop.f32.mrb[44].mxu0  ;;  %v3244_v9 = vadd.f32 %v2357_v21, %v1389_v2 }
 0x14f   :  { %v2358_v13 = vpop.f32.mrb[44].mxu1  ;;  %v2295_v14 = vpop.f32.mrb[45].mxu0 }
 0x150   :  { %v2296_v15 = vadd.f32 %v2295_v14, %v2294_v7  ;;  %v2359_v16 = vpop.f32.mrb[45].mxu1  ;;  %v2297_v17 = vpop.f32.mrb[46].mxu0 }
 0x151   :  { %v2360_v36 = vadd.f32 %v2359_v16, %v2358_v13  ;;  %v2361_v19 = vpop.f32.mrb[46].mxu1  ;;  %v2298_v20 = vpop.f32.mrb[47].mxu0 }
 0x152   :  { %v1394_v22 = vadd.f32 %v2296_v15, %v3202_v54  ;;  %v2299_v39 = vadd.f32 %v2298_v20, %v2297_v17  ;;  %v2362_v23 = vpop.f32.mrb[47].mxu1  ;;  %v3268_v14 = vpop.permute.xlu1 %1679 }
 0x153   :  { %v2363_v24 = vadd.f32 %v2362_v23, %v2361_v19  ;;  %v3270_v15 = vpop.permute.xlu0 %1684 }
 0x154   :  { %v1397_v25 = vadd.f32 %v2299_v39, %v3204_v57  ;;  %v3248_v26 = vadd.f32 %v2360_v36, %v1394_v22 }
 0x156   :  { %v2300_v31 = vpop.f32.mrb[48].mxu0  ;;  %v3254_v34 = vadd.f32 %v2363_v24, %v1397_v25 }
 0x157   :  { %v2364_v35 = vpop.f32.mrb[48].mxu1  ;;  %v2301_v37 = vpop.f32.mrb[49].mxu0 }
 0x158   :  { %v2302_v38 = vadd.f32 %v2301_v37, %v2300_v31  ;;  %v2365_v40 = vpop.f32.mrb[49].mxu1  ;;  %v2303_v41 = vpop.f32.mrb[50].mxu0 }
 0x159   :  { %v2366_v54 = vadd.f32 %v2365_v40, %v2364_v35  ;;  %v2367_v42 = vpop.f32.mrb[50].mxu1  ;;  %v2304_v43 = vpop.f32.mrb[51].mxu0 }
 0x15a   :  { %v1402_v1 = vadd.f32 %v2302_v38, %v3206_v10  ;;  %v2305_v57 = vadd.f32 %v2304_v43, %v2303_v41  ;;  %v2368_v44 = vpop.f32.mrb[51].mxu1  ;;  %v3278_v40 = vpop.permute.xlu1 %1689 }
 0x15b   :  { %v2369_v45 = vadd.f32 %v2368_v44, %v2367_v42  ;;  %v3280_v41 = vpop.permute.xlu0 %1694 }
 0x15c   :  { %v1405_v46 = vadd.f32 %v2305_v57, %v3208_v12  ;;  %v3258_v3 = vadd.f32 %v2366_v54, %v1402_v1 }
 0x15e   :  { %v2306_v55 = vpop.f32.mrb[52].mxu0  ;;  %v3264_v56 = vadd.f32 %v2369_v45, %v1405_v46 }
 0x15f   :  { %v2370_v58 = vpop.f32.mrb[52].mxu1  ;;  %v2307_v59 = vpop.f32.mrb[53].mxu0 }
 0x160   :  { %v2308_v60 = vadd.f32 %v2307_v59, %v2306_v55  ;;  %v2371_v61 = vpop.f32.mrb[53].mxu1  ;;  %v2309_v18 = vpop.f32.mrb[54].mxu0 }
 0x161   :  { %v2372_v10 = vadd.f32 %v2371_v61, %v2370_v58  ;;  %v2373_v62 = vpop.f32.mrb[54].mxu1  ;;  %v2310_v63 = vpop.f32.mrb[55].mxu0  ;;  %v2122_v61 = vld [vmem:[%s3393_s4 + $0x28] sm:$0xff]  }
 0x162   :  { %v1410_v0 = vadd.f32 %v2308_v60, %v3210_v30  ;;  %v2311_v12 = vadd.f32 %v2310_v63, %v2309_v18  ;;  %v2374_v21 = vpop.f32.mrb[55].mxu1  ;;  %v2118_v60 = vld [vmem:[%s3393_s4 + $0x8] sm:$0xff]  }
 0x163   :  { %v2375_v2 = vadd.f32 %v2374_v21, %v2373_v62  ;;  %v2121_v62 = vld [vmem:[%s3393_s4 + $0x20] sm:$0xff]   ;;  %v2068_v21 = vunpack.c.l.bf16 %v2122_v61 }
 0x164   :  { %v1413_v7 = vadd.f32 %v2311_v12, %v3212_v32  ;;  %v1507_v13 = vadd.f32 %v2372_v10, %v1410_v0  ;;  %v2047_v10 = vld [vmem:[%s3393_s4] sm:$0xff]   ;;  %v1700_v0 = vpop.permute.xlu1 %1699  ;;  %v2052_v12 = vunpack.c.l.bf16 %v2118_v60 }
 0x166   :  { %v2312_v16 = vpop.f32.mrb[56].mxu0  ;;  %v3272_v17 = vadd.f32 %v2375_v2, %v1413_v7  ;;  %v3303_v2 = vld [vmem:[%s3393_s4 + $0x18] sm:$0xff]  }
 0x167   :  { %v2376_v36 = vpop.f32.mrb[56].mxu1  ;;  %v2313_v19 = vpop.f32.mrb[57].mxu0  ;;  %v3308_v7 = vld [vmem:[%s3393_s4 + $0x38] sm:$0xff]  }
 0x168   :  { %v2314_v20 = vadd.f32 %v2313_v19, %v2312_v16  ;;  %v2377_v22 = vpop.f32.mrb[57].mxu1  ;;  %v2315_v39 = vpop.f32.mrb[58].mxu0  ;;  %v2048_v19 = vunpack.c.l.bf16 %v2047_v10 }
 0x169   :  { %v2378_v23 = vadd.f32 %v2377_v22, %v2376_v36  ;;  %v2379_v30 = vpop.f32.mrb[58].mxu1  ;;  %v2316_v24 = vpop.f32.mrb[59].mxu0  ;;  %v3315_v22 = vld [vmem:[%s3393_s4 + $0x10] sm:$0xff]  }
 0x16a   :  { %v1418_v25 = vadd.f32 %v2314_v20, %v3214_v50  ;;  %v2317_v31 = vadd.f32 %v2316_v24, %v2315_v39  ;;  %v2380_v32 = vpop.f32.mrb[59].mxu1  ;;  %v3310_v16 = vpop.permute.xlu0 %1704  ;;  %v2053_v20 = vunpack.c.h.bf16 %v2118_v60 }
 0x16b   :  { %v2381_v35 = vadd.f32 %v2380_v32, %v2379_v30  ;;  %v2065_v32 = vunpack.c.h.bf16 %v2121_v62 }
 0x16c   :  { %v1421_v37 = vadd.f32 %v2317_v31, %v3216_v53  ;;  %v3276_v38 = vadd.f32 %v2378_v23, %v1418_v25  ;;  %v2069_v25 = vunpack.c.h.bf16 %v2122_v61  ;;  %v2049_v31 = vunpack.c.h.bf16 %v2047_v10 }
 0x16e   :  { %v2318_v54 = vpop.f32.mrb[60].mxu0  ;;  %v3282_v42 = vadd.f32 %v2381_v35, %v1421_v37 }
 0x16f   :  { %v2382_v43 = vpop.f32.mrb[60].mxu1  ;;  %v2319_v1 = vpop.f32.mrb[61].mxu0 }
 0x170   :  { %v2320_v57 = vadd.f32 %v2319_v1, %v2318_v54  ;;  %v2383_v44 = vpop.f32.mrb[61].mxu1  ;;  %v2321_v45 = vpop.f32.mrb[62].mxu0  ;;  %v2060_v1 = vunpack.c.l.bf16 %v3303_v2 }
 0x171   :  { %v2384_v50 = vadd.f32 %v2383_v44, %v2382_v43  ;;  %v2385_v46 = vpop.f32.mrb[62].mxu1  ;;  %v2322_v55 = vpop.f32.mrb[63].mxu0  ;;  %v3326_v44 = vld [vmem:[%s3393_s4 + $0x30] sm:$0xff]  }
 0x172   :  { %v1426_v58 = vadd.f32 %v2320_v57, %v3218_v8  ;;  %v2323_v53 = vadd.f32 %v2322_v55, %v2321_v45  ;;  %v2386_v59 = vpop.f32.mrb[63].mxu1  ;;  %v2076_v57 = vunpack.c.l.bf16 %v3308_v7 }
 0x173   :  { %v2387_v18 = vadd.f32 %v2386_v59, %v2385_v46 }
 0x174   :  { %v1429_v8 = vadd.f32 %v2323_v53, %v3220_v11  ;;  %v3298_v63 = vadd.f32 %v2384_v50, %v1426_v58  ;;  %v2064_v11 = vunpack.c.l.bf16 %v2121_v62  ;;  %v1710_v62 = vpop.permute.xlu1 %1709 }
 0x176   :  { %v2422_v36 = vpop.f32.mrb[64].mxu0  ;;  %v3317_v39 = vadd.f32 %v2387_v18, %v1429_v8 }
 0x177   :  { %v1572_v23 = vadd.f32 %v2422_v36, %v3230_v47  ;;  %v2430_v30 = vpop.f32.mrb[64].mxu1  ;;  %v1563_v24 = vpop.f32.mrb[65].mxu0 }
 0x178   :  { %v1604_v35 = vadd.f32 %v2430_v30, %v1507_v13  ;;  %v1564_v37 = vadd.f32 %v1563_v24, %v3224_v29  ;;  %v1595_v54 = vpop.f32.mrb[65].mxu1  ;;  %v2423_v43 = vpop.f32.mrb[66].mxu0  ;;  %v2056_v29 = vunpack.c.l.bf16 %v3315_v22 }
 0x179   :  { %v1724_v47 = vmax.f32 %v1572_v23, %v3242_v6  ;;  %v1596_v45 = vadd.f32 %v1595_v54, %v3258_v3  ;;  %v1575_v50 = vadd.f32 %v2423_v43, %v3234_v51  ;;  %v2431_v13 = vpop.f32.mrb[66].mxu1  ;;  %v1566_v46 = vpop.f32.mrb[67].mxu0  ;;  %v2072_v51 = vunpack.c.l.bf16 %v3326_v44 }
 0x17a   :  { %v1732_v55 = vmax.f32 %v1604_v35, %v3280_v41  ;;  %v1722_v58 = vmax.f32 %v1564_v37, %v3232_v48  ;;  %v1607_v53 = vadd.f32 %v2431_v13, %v3272_v17  ;;  %v1567_v59 = vadd.f32 %v1566_v46, %v3226_v33  ;;  %v1598_v60 = vpop.f32.mrb[67].mxu1  ;;  %v1715_v36 = vpop.permute.xlu0 %1714 }
 0x17b   :  { %v1730_v61 = vmax.f32 %v1596_v45, %v3270_v15  ;;  %v1725_v6 = vmax.f32 %v1575_v50, %v3250_v27  ;;  %v1599_v3 = vadd.f32 %v1598_v60, %v3264_v56  ;;  %v2061_v41 = vunpack.c.h.bf16 %v3303_v2  ;;  %v1720_v13 = vpop.permute.xlu1 %1719 }
 0x17c   :  { %v1733_v18 = vmax.f32 %v1607_v53, %v1700_v0  ;;  %v1723_v10 = vmax.f32 %v1567_v59, %v3240_v5  ;;  %v2077_v48 = vunpack.c.h.bf16 %v3308_v7  ;;  %v1772_v17 = vadd.f32 %v2052_v12, %v1724_v47 }
 0x17d   :  { %v1773_v8 = vadd.f32 %v2053_v20, %v1725_v6  ;;  %v1731_v33 = vmax.f32 %v1599_v3, %v3278_v40  ;;  %v2057_v15 = vunpack.c.h.bf16 %v3315_v22  ;;  %v1780_v27 = vadd.f32 %v2068_v21, %v1732_v55 }
 0x17e   :  { %v1770_v23 = vadd.f32 %v2048_v19, %v1722_v58  ;;  %v1781_v56 = vadd.f32 %v2069_v25, %v1733_v18  ;;  %v1771_v30 = vadd.f32 %v2049_v31, %v1723_v10  ;;  %v2426_v24 = vpop.f32.mrb[68].mxu0  ;;  %v1778_v0 = vadd.f32 %v2064_v11, %v1730_v61 }
 0x17f   :  { %v2086_v35 = vpack.c.bf16 %v1773_v8, %v1772_v17  ;;  %v1779_v5 = vadd.f32 %v2065_v32, %v1731_v33  ;;  %v1588_v37 = vadd.f32 %v2426_v24, %v3248_v26  ;;  %v2434_v54 = vpop.f32.mrb[68].mxu1  ;;  %v1579_v43 = vpop.f32.mrb[69].mxu0  ;;  %v2073_v58 = vunpack.c.h.bf16 %v3326_v44 }
 0x180   :  { %v2106_v45 = vpack.c.bf16 %v1781_v56, %v1780_v27  ;;  %v2081_v12 = vpack.c.bf16 %v1771_v30, %v1770_v23  ;;  %v1620_v20 = vadd.f32 %v2434_v54, %v3298_v63  ;;  %v1580_v40 = vadd.f32 %v1579_v43, %v3238_v4  ;;  %v1611_v47 = vpop.f32.mrb[69].mxu1  ;;  %v2427_v50 = vpop.f32.mrb[70].mxu0 }
 0x181   :  { %2125 = vst [vmem:[%s3394_s5 + $0x8] sm:$0xff] %v2086_v35   ;;  %v2101_v21 = vpack.c.bf16 %v1779_v5, %v1778_v0  ;;  %v1728_v19 = vmax.f32 %v1588_v37, %v3262_v52  ;;  %v1612_v11 = vadd.f32 %v1611_v47, %v3276_v38  ;;  %v1591_v26 = vadd.f32 %v2427_v50, %v3254_v34  ;;  %v2435_v25 = vpop.f32.mrb[70].mxu1  ;;  %v1582_v31 = vpop.f32.mrb[71].mxu0 }
 0x182   :  { %2129 = vst [vmem:[%s3394_s5 + $0x28] sm:$0xff] %v2106_v45   ;;  %2082 = vst [vmem:[%s3394_s5] sm:$0xff] %v2081_v12   ;;  %v1736_v4 = vmax.f32 %v1620_v20, %v1715_v36  ;;  %v1726_v63 = vmax.f32 %v1580_v40, %v3252_v28  ;;  %v1623_v32 = vadd.f32 %v2435_v25, %v3317_v39  ;;  %v1614_v38 = vpop.f32.mrb[71].mxu1 }
 0x183   :  { %v1583_v52 = vadd.f32 %v1582_v31, %v3244_v9  ;;  %2128 = vst [vmem:[%s3394_s5 + $0x20] sm:$0xff] %v2101_v21   ;;  %v1734_v34 = vmax.f32 %v1612_v11, %v3310_v16  ;;  %v1729_v46 = vmax.f32 %v1591_v26, %v3268_v14  ;;  %v1615_v55 = vadd.f32 %v1614_v38, %v3282_v42 }
 0x184   :  { %v1737_v53 = vmax.f32 %v1623_v32, %v1720_v13  ;;  %v1776_v9 = vadd.f32 %v2060_v1, %v1728_v19  ;;  %v1784_v60 = vadd.f32 %v2076_v57, %v1736_v4  ;;  %v1774_v16 = vadd.f32 %v2056_v29, %v1726_v63 }
 0x185   :  { %v1727_v28 = vmax.f32 %v1583_v52, %v3260_v49  ;;  %v1777_v39 = vadd.f32 %v2061_v41, %v1729_v46  ;;  %v1735_v59 = vmax.f32 %v1615_v55, %v1710_v62  ;;  %v1782_v6 = vadd.f32 %v2072_v51, %v1734_v34 }
 0x186   :  { %v1785_v61 = vadd.f32 %v2077_v48, %v1737_v53 }
 0x187   :  { %v1775_v14 = vadd.f32 %v2057_v15, %v1727_v28  ;;  %v2096_v42 = vpack.c.bf16 %v1777_v39, %v1776_v9  ;;  %v1783_v3 = vadd.f32 %v2073_v58, %v1735_v59 }
 0x188   :  { %v2116_v44 = vpack.c.bf16 %v1785_v61, %v1784_v60 }
 0x189   :  { %v2091_v18 = vpack.c.bf16 %v1775_v14, %v1774_v16  ;;  %2127 = vst [vmem:[%s3394_s5 + $0x18] sm:$0xff] %v2096_v42   ;;  %v2111_v49 = vpack.c.bf16 %v1783_v3, %v1782_v6 }
 0x18a   :  { %2131 = vst [vmem:[%s3394_s5 + $0x38] sm:$0xff] %v2116_v44  }
 0x18b   :  { %2126 = vst [vmem:[%s3394_s5 + $0x10] sm:$0xff] %v2091_v18   ;;  %2130 = vst [vmem:[%s3394_s5 + $0x30] sm:$0xff] %v2111_v49  }

// kernel: fcn_forward.24
= control target key start
LH: loop header
LB: loop body
LE: loop exit
PB: predicated region body
PF: predicated region fallthrough
CT: control target
= control target key end

     0   :  { %v136_v0 = vmov 0.0   ;;  %vm137_vm0 = vmmov 0   ;;  %v138_v2 = vmov 0   ;;  %vm49_vm1 = vcmask 392192   ;;  %s188_s1 = inlined_call_operand.vmem [shape: bf16[48,128], index: 1, kind: input, shape index: {}]   ;;  %s189_s2 = inlined_call_operand.vmem [shape: f32[5,1], index: 2, kind: input, shape index: {}]   ;;  %s190_s3 = inlined_call_operand.vmem [shape: f32[5,1], index: 3, kind: input, shape index: {}]   ;;  %s191_s0 = inlined_call_operand.vmem [shape: bf16[5,48], index: 0, kind: input, shape index: {}]   ;;  %s192_s4 = inlined_call_operand.vmem [shape: bf16[5,128], index: 4, kind: output, shape index: {}]  }
   0x1   :  { %119 = vmatprep.subr.bf16.mxu0 %v136_v0  ;;  %v133_v1 = vld [vmem:[%s188_s1] sm:$0xff]   ;;  %125 = vmatprep.mubr.msk.bf16.mxu0 %vm137_vm0, %v136_v0  ;;  %v134_v3 = vld [vmem:[%s188_s1 + $0x8] sm:$0xff]   ;;  %v135_v6 = vld [vmem:[%s188_s1 + $0x10] sm:$0xff]   ;;  %vm101_vm2 = vcmask 1042432   ;;  %vm102_vm3 = vsmask.f32 2304 }
   0x2   :  { %132 = vset.pattern.permute.xlu0 %v138_v2  ;;  %120 = vmatpush3.bf16.msra.mxu0 %v133_v1  ;;  %v25_v4 = vld [vmem:[%s189_s2] sm:$0x1f]  ;;  %vm103_vm4 = vmand %vm101_vm2, %vm102_vm3 }
   0x3   :  { %121 = vmatprep.subr.bf16.mxu0 %v136_v0  ;;  %28 = vperm.xlu0 %132, %v25_v4   ;;  %v93_v5 = vld [vmem:[%s190_s3] sm:$0x1f] }
   0x4   :  { %v18_v7 = vld [vmem:[%s191_s0] sm:$0x7] }
   0x5   :  { %v104_v16 = vld [vmem:[%s192_s4] sm:$0x7] }
   0x6   :  { %122 = vmatpush3.bf16.msra.mxu0 %v134_v3 }
   0x7   :  { %123 = vmatprep.subr.bf16.mxu0 %v136_v0  ;;  %96 = vperm.xlu0 %132, %v93_v5  }
   0xa   :  { %124 = vmatpush3.bf16.msra.mxu0 %v135_v6 }
   0xd   :  { %126 = vmatmul.mubr.msk.bf16.vlgmr.msra.gmra.mrb[0].mxu0 %vm49_vm1, %v18_v7 }
  0x82   :  { %v29_v8 = vpop.permute.xlu0 %28 }
  0x86   :  { %v97_v12 = vpop.permute.xlu0 %96 }
  0xe0   :  { %v87_v9 = vpop.f32.mrb[0].mxu0 }
  0xe1   :  { %v88_v10 = vadd.f32 %v87_v9, %v29_v8  ;;  %v127_v11 = vpop.f32.mrb[1].mxu0 }
  0xe2   :  { %v90_v13 = vpop.f32.mrb[2].mxu0 }
  0xe3   :  { %v99_v14 = vmax.f32 %v88_v10, %v97_v12  ;;  %v128_v15 = vpop.f32.mrb[3].mxu0 }
  0xe5   :  { %v100_v17 = vpack.c.bf16 %v99_v14, %v99_v14 }
  0xe7   :  { %v105_v18 = vsel %vm103_vm4, %v100_v17, %v104_v16 }
  0xe8   :  { %106 = vst [vmem:[%s192_s4] sm:$0x7] %v105_v18 }

// kernel: fcn_forward.29
= control target key start
LH: loop header
LB: loop body
LE: loop exit
PB: predicated region body
PF: predicated region fallthrough
CT: control target
= control target key end

     0   :  { %s711_s15 = smov 0   ;;  %s713_s16 = smov 0   ;;  %s811_s0 = inlined_call_operand.vmem [shape: bf16[20,80], index: 0, kind: input, shape index: {}]   ;;  %s812_s1 = inlined_call_operand.vmem [shape: bf16[80,512], index: 1, kind: input, shape index: {}]   ;;  %s813_s2 = inlined_call_operand.vmem [shape: f32[20,1], index: 2, kind: input, shape index: {}]   ;;  %s814_s3 = inlined_call_operand.vmem [shape: f32[20,1], index: 3, kind: input, shape index: {}]   ;;  %s815_s4 = inlined_call_operand.vmem [shape: bf16[20,512], index: 4, kind: output, shape index: {}]  }
   0x1   :  { %s715_s17 = smov 0  }
   0x2 LB: > { %s566_s18 = sadd.s32 4294967295, %s683_s17   ;;  %s728_s19 = sadd.s32 1, %s683_s17   ;;  %s683_s17 = sphi %s715_s17, %s819_s17   ;;  %s679_s16 = sphi %s713_s16, %s818_s16   ;;  %s675_s15 = sphi %s711_s15, %s817_s15  }
   0x3   : > { %s39_s20 = ssub.s32 %s683_s17, %s728_s19  ;;  %s42_s21 = sadd.s32 1, %s679_s16 }
   0x4   : > { %p40_p0 = scmp.eq.s32.totalorder %s39_s20, 0  ;;  %p49_p1 = scmp.ne.s32.totalorder %s679_s16, %s675_s15 }
   0x5   : > { %p50_p2 = scmp.eq.s32.totalorder %s683_s17, 0  ;;  %p121_p3 = scmp.eq.s32.totalorder %s566_s18, 1 }
   0x6   : > { %s739_s22 = scalar_select %p40_p0, %s679_s16, %s42_s21  }
   0x7   : > { %p51_p4 = por %p50_p2, %p49_p1  ;;  %p741_p5 = por %p121_p3, %p49_p1 }
   0x8   : > { %p569_p6 = scmp.ge.s32.totalorder %s683_s17, 2 }
   0xa   : > { %152 = sbr.rel (%p569_p6) target bundleno = 26 (0x1a), region = 28 }
  0x11   : > { %155 = sbr.rel (!%p51_p4) target bundleno = 26 (0x1a), region = 32  ;;  %s157_s24 = sand.u32 (%p51_p4), 1, %s679_s16  }
  0x12   : > { %s594_s25 = sshll.u32 (%p51_p4), %s683_s17, 3  ;;  %s609_s26 = smul.u32 (%p51_p4), 80, %s157_s24 }
  0x13   : > { %s162_s29 = scalar_lea.vmem (%p51_p4), %s812_s1, %s594_s25 }
  0x14   : > { %v208_v0 = vld [vmem:[%s162_s29] sm:$0xff] (%p51_p4)  ;;  %v210_v1 = vld [vmem:[%s162_s29 + $0x10] sm:$0xff] (%p51_p4)  ;;  %s159_s30 = scalar_lea.vmem (%p51_p4), [#allocation2], %s609_s26 }
  0x15   : > { %v212_v2 = vld [vmem:[%s162_s29 + $0x20] sm:$0xff] (%p51_p4)  ;;  %v214_v3 = vld [vmem:[%s162_s29 + $0x30] sm:$0xff] (%p51_p4)  ;;  %209 = vst [vmem:[%s159_s30] sm:$0xff] (%p51_p4), %v208_v0  ;;  %211 = vst [vmem:[%s159_s30 + $0x8] sm:$0xff] (%p51_p4), %v210_v1 }
  0x16   : > { %v216_v4 = vld [vmem:[%s162_s29 + $0x40] sm:$0xff] (%p51_p4)  ;;  %v218_v5 = vld [vmem:[%s162_s29 + $0x50] sm:$0xff] (%p51_p4)  ;;  %213 = vst [vmem:[%s159_s30 + $0x10] sm:$0xff] (%p51_p4), %v212_v2  ;;  %215 = vst [vmem:[%s159_s30 + $0x18] sm:$0xff] (%p51_p4), %v214_v3 }
  0x17   : > { %217 = vst [vmem:[%s159_s30 + $0x20] sm:$0xff] (%p51_p4), %v216_v4  ;;  %219 = vst [vmem:[%s159_s30 + $0x28] sm:$0xff] (%p51_p4), %v218_v5  ;;  %v220_v6 = vld [vmem:[%s162_s29 + $0x60] sm:$0xff] (%p51_p4)  ;;  %v222_v7 = vld [vmem:[%s162_s29 + $0x70] sm:$0xff] (%p51_p4) }
  0x18   : > { %v224_v8 = vld [vmem:[%s162_s29 + $0x80] sm:$0xff]  ;;  %221 = vst [vmem:[%s159_s30 + $0x30] sm:$0xff] %v220_v6  ;;  %223 = vst [vmem:[%s159_s30 + $0x38] sm:$0xff] %v222_v7  ;;  %v226_v9 = vld [vmem:[%s162_s29 + $0x90] sm:$0xff] }
  0x19   : > { %225 = vst [vmem:[%s159_s30 + $0x40] sm:$0xff] %v224_v8  ;;  %227 = vst [vmem:[%s159_s30 + $0x48] sm:$0xff] %v226_v9 }
  0x1a PF: > { %p572_p7 = scmp.ge.s32.totalorder %s683_s17, 1  ;;  %p232_p8 = scmp.lt.s32.totalorder %s683_s17, 3 }
  0x1c   : > { %p233_p9 = pnand %p572_p7, %p232_p8 }
  0x1d   : > { %s239_s5 = sand.u32 (!%p233_p9), 1, %s675_s15   ;;  %v685_v10 = vmov (!%p233_p9), 0   ;;  %v279_v11 = vld [vmem:[%s813_s2] sm:$0xff] (!%p233_p9)  ;;  %v281_v12 = vld [vmem:[%s813_s2 + $0x10] sm:$0xf] (!%p233_p9)  ;;  %v414_v14 = vld [vmem:[%s814_s3 + $0x8] sm:$0xff] (!%p233_p9) }
  0x1e   : > { %236 = sbr.rel (%p233_p9) target bundleno = 285 (0x11d), region = 70  ;;  %394 = vmatprep.mubr.bf16.mxu0 (!%p233_p9), %v685_v10  ;;  %404 = vmatprep.mubr.bf16.mxu1 (!%p233_p9), %v685_v10  ;;  %v413_v13 = vld [vmem:[%s814_s3] sm:$0xff] (!%p233_p9)  ;;  %v280_v19 = vld [vmem:[%s813_s2 + $0x8] sm:$0xff] (!%p233_p9)  ;;  %v415_v22 = vld [vmem:[%s814_s3 + $0x10] sm:$0xf] (!%p233_p9)  ;;  %vm355_vm0 = vcmask (!%p233_p9), 654336  }
  0x1f   : > { %s610_s6 = smul.u32 (!%p233_p9), 80, %s239_s5  ;;  %637 = vset.pattern.permute.xlu0 (!%p233_p9), %v685_v10  ;;  %638 = vset.pattern.permute.xlu1 (!%p233_p9), %v685_v10  ;;  %v639_v17 = vpack.i.bf16 (!%p233_p9), %v414_v14, %v413_v13  ;;  %v659_v28 = vld [vmem:[%s811_s0] sm:$0xff] (!%p233_p9)   ;;  %v660_v29 = vld [vmem:[%s811_s0 + $0x8] ss:$0 sps:$4 sm:$0x33] (!%p233_p9)  }
  0x20   : > { %284 = vperm.xlu0 (!%p233_p9), %637, %v279_v11   ;;  %294 = vperm.xlu1 (!%p233_p9), %638, %v281_v12  }
  0x21   : > { %s768_s20 = scalar_lea.vmem (!%p233_p9), [#allocation2], %s610_s6  ;;  %s611_s6 = smul.u32 (!%p233_p9), 24, %s239_s5 }
  0x22   : > { %v644_v15 = vld [vmem:[%s768_s20 + $0x4] ss:$8 sps:$4 sm:$0xff] (!%p233_p9)   ;;  %v646_v16 = vld [vmem:[%s768_s20] ss:$8 sps:$4 sm:$0xff] (!%p233_p9)   ;;  %v647_v18 = vld [vmem:[%s768_s20 + $0x14] ss:$8 sps:$4 sm:$0xff] (!%p233_p9)  }
  0x23   : > { %362 = vmatprep.subr.bf16.mxu0 (!%p233_p9), %v644_v15  ;;  %599 = vmatprep.subr.bf16.mxu1 (!%p233_p9), %v644_v15  ;;  %v649_v20 = vld [vmem:[%s768_s20 + $0x10] ss:$8 sps:$4 sm:$0xff] (!%p233_p9)   ;;  %v650_v21 = vld [vmem:[%s768_s20 + $0x24] ss:$8 sps:$4 sm:$0xff] (!%p233_p9)   ;;  %v652_v23 = vld [vmem:[%s768_s20 + $0x20] ss:$8 sps:$4 sm:$0xff] (!%p233_p9)  }
  0x24   : > { %363 = vmatpush1.bf16.msra.mxu0 (!%p233_p9), %v646_v16  ;;  %604 = vmatpush1.bf16.msra.mxu1 (!%p233_p9), %v646_v16  ;;  %v653_v24 = vld [vmem:[%s768_s20 + $0x34] ss:$8 sps:$4 sm:$0xff] (!%p233_p9)   ;;  %v655_v25 = vld [vmem:[%s768_s20 + $0x30] ss:$8 sps:$4 sm:$0xff] (!%p233_p9)   ;;  %v656_v26 = vld [vmem:[%s768_s20 + $0x44] ss:$8 sps:$4 sm:$0xff] (!%p233_p9)  }
  0x25   : > { %364 = vmatprep.subr.bf16.mxu0 %v647_v18  ;;  %600 = vmatprep.subr.bf16.mxu1 %v647_v18  ;;  %v658_v27 = vld [vmem:[%s768_s20 + $0x40] ss:$8 sps:$4 sm:$0xff]   ;;  %s262_s15 = scalar_lea.vmem [#allocation3], %s611_s6  ;;  %s598_s5 = sshll.u32 (%p741_p5), %s566_s18, 3 }
  0x26   : > { %289 = vperm.xlu0 %637, %v280_v19   ;;  %640 = vperm.xlu1 %638, %v639_v17   ;;  %s469_s9 = scalar_lea.vmem (%p741_p5), %s815_s4, %s598_s5 }
  0x28   : > { %365 = vmatpush1.bf16.msra.mxu0 %v649_v20  ;;  %605 = vmatpush1.bf16.msra.mxu1 %v649_v20 }
  0x29   : > { %366 = vmatprep.subr.bf16.mxu0 %v650_v21  ;;  %601 = vmatprep.subr.bf16.mxu1 %v650_v21 }
  0x2a   : > { %428 = vperm.xlu0 %637, %v415_v22  }
  0x2c   : > { %367 = vmatpush1.bf16.msra.mxu0 %v652_v23  ;;  %606 = vmatpush1.bf16.msra.mxu1 %v652_v23 }
  0x2d   : > { %368 = vmatprep.subr.bf16.mxu0 %v653_v24  ;;  %602 = vmatprep.subr.bf16.mxu1 %v653_v24 }
  0x30   : > { %369 = vmatpush1.bf16.msra.mxu0 %v655_v25  ;;  %607 = vmatpush1.bf16.msra.mxu1 %v655_v25 }
  0x31   : > { %370 = vmatprep.subr.bf16.mxu0 %v656_v26  ;;  %603 = vmatprep.subr.bf16.mxu1 %v656_v26 }
  0x34   : > { %371 = vmatpush1.bf16.msra.mxu0 %v658_v27  ;;  %608 = vmatpush1.bf16.msra.mxu1 %v658_v27 }
  0x37   : > { %585 = vmatmul.mubr.msk.bf16.vlgmr.msra.gmra.mrb[0].mxu0 %vm355_vm0, %v659_v28  ;;  %586 = vmatmul.mubr.msk.bf16.vlgmr.msra.gmra.mrb[0].mxu1 %vm355_vm0, %v660_v29 }
  0x9f   : > { %v285_v30 = vpop.permute.xlu0 %284  ;;  %v295_v31 = vpop.permute.xlu1 %294 }
  0xa5   : > { %v290_v32 = vpop.permute.xlu0 %289  ;;  %v641_v33 = vpop.permute.xlu1 %640 }
  0xa6   : > { %v642_v35 = vunpack.i.l.bf16 %v641_v33  ;;  %v643_v46 = vunpack.i.h.bf16 %v641_v33 }
  0xa9   : > { %v429_v34 = vpop.permute.xlu0 %428 }
 0x10a   : > { %v396_v36 = vpop.f32.mrb[0].mxu0  ;;  %v406_v37 = vpop.f32.mrb[0].mxu1 }
 0x10b   : > { %v397_v38 = vadd.f32 %v396_v36, %v285_v30  ;;  %v407_v39 = vadd.f32 %v406_v37, %v295_v31  ;;  %v398_v40 = vpop.f32.mrb[1].mxu0  ;;  %v408_v41 = vpop.f32.mrb[1].mxu1 }
 0x10c   : > { %v399_v42 = vadd.f32 %v398_v40, %v285_v30  ;;  %v409_v43 = vadd.f32 %v408_v41, %v295_v31  ;;  %v400_v44 = vpop.f32.mrb[2].mxu0  ;;  %v410_v45 = vpop.f32.mrb[2].mxu1 }
 0x10d   : > { %v431_v47 = vmax.f32 %v397_v38, %v642_v35  ;;  %v435_v48 = vmax.f32 %v407_v39, %v429_v34  ;;  %v401_v49 = vadd.f32 %v400_v44, %v290_v32  ;;  %v402_v50 = vpop.f32.mrb[3].mxu0  ;;  %v411_v51 = vpop.f32.mrb[3].mxu1 }
 0x10e   : > { %v432_v52 = vmax.f32 %v399_v42, %v642_v35  ;;  %v436_v53 = vmax.f32 %v409_v43, %v429_v34  ;;  %v403_v54 = vadd.f32 %v402_v50, %v290_v32  ;;  %466 = sbr.rel (!%p741_p5) target bundleno = 285 (0x11d), region = 78 }
 0x10f   : > { %v433_v55 = vmax.f32 %v401_v49, %v643_v46 }
 0x110   : > { %v595_v56 = vpack.c.bf16 %v432_v52, %v431_v47  ;;  %v597_v57 = vpack.c.bf16 %v436_v53, %v435_v48  ;;  %v434_v58 = vmax.f32 %v403_v54, %v643_v46 }
 0x112   : > { %457 = vst [vmem:[%s262_s15] sm:$0xff] %v595_v56  ;;  %459 = vst [vmem:[%s262_s15 + $0x10] sm:$0x33] %v597_v57  ;;  %v596_v59 = vpack.c.bf16 %v434_v58, %v433_v55 }
 0x114   : > { %458 = vst [vmem:[%s262_s15 + $0x8] sm:$0xff] %v596_v59 }
 0x119   : > { %v501_v60 = vld [vmem:[%s262_s15] sm:$0xff]  ;;  %v505_v62 = vld [vmem:[%s262_s15 + $0x10] sm:$0xff] }
 0x11a   : > { %502 = vst [vmem:[%s469_s9] sm:$0xff] %v501_v60  ;;  %506 = vst [vmem:[%s469_s9 + $0x20] sm:$0xff] %v505_v62 }
 0x11b   : > { %v503_v61 = vld [vmem:[%s262_s15 + $0x8] sm:$0xff] }
 0x11c   : > { %504 = vst [vmem:[%s469_s9 + $0x10] sm:$0xff] %v503_v61 }
 0x11d PF: > { %p11_p10 = scmp.ge.s32.totalorder %s728_s19, 4   ;;  %s817_s15 = smov %s679_s16 }
 0x11e   : > { %s818_s16 = smov %s739_s22  ;;  %s819_s17 = smov %s728_s19 }
 0x11f   :  { %13 = sbr.rel (!%p11_p10) target bundleno = 2 (0x2), region = 147 }

</bundles_post_ra>
